<compile_context>
chip_gen: v7x
topology: tpu7x:2x2x1
jax: 0.10.0
libtpu: 0.0.40
codegen_flags: <defaults>
</compile_context>

<pallas_src>
import functools
import math

import jax
import jax.numpy as jnp
from jax.experimental import pallas as pl
from jax.experimental.pallas import tpu as pltpu

# ----------------------------- config (small) -----------------------------
BATCH = 2
IM_SIZE = 32                 # cfg.IM_SCALE
IN_CH = 3
DOUT_BASE = 32               # self.dout_base_model
FEAT_STRIDE = 2              # backbone stride
POOLING_SIZE = 7             # cfg.POOLING_SIZE
HIDDEN = 64                  # _head_to_tail output dim
CLASSES = ('__background__', 'car', 'person', 'bike', 'dog')
N_CLASSES = len(CLASSES)
CLASS_AGNOSTIC = False
ANCHOR_SIZES = (8., 16., 32., 64., 128., 256.)
ANCHOR_RATIOS = (0.33, 0.5, 1.0, 2.0, 3.0)
NUM_ANCHORS = len(ANCHOR_SIZES) * len(ANCHOR_RATIOS)   # 30
RPN_POST_NMS_TOP_N = 16      # rpn_post_nms_top_n_test (small)


def _round_up(x, m):
    return ((x + m - 1) // m) * m


def _default_vmem_limit():
    # Derive per-chip: ~half of physical VMEM (v7x 64MiB -> 32MiB, v5e/v6e
    # 128MiB -> 64MiB), capped, with a safe 32MiB fallback.
    try:
        info = pltpu.get_tpu_info()
        cap = int(getattr(info, "vmem_capacity_bytes"))
        return max(16 * 1024 * 1024, min(cap // 2, 96 * 1024 * 1024))
    except Exception:
        return 32 * 1024 * 1024


VMEM_LIMIT_BYTES = _default_vmem_limit()


# ----------------------------- Pallas kernels -----------------------------

def _mm_bias_kernel(x_ref, w_ref, b_ref, o_ref, *, relu):
    """Single-K matmul + bias (+ReLU): no accumulator scratch, no pl.when."""
    o = jnp.dot(x_ref[...], w_ref[...], preferred_element_type=jnp.float32)
    o = o + b_ref[...]
    if relu:
        o = jnp.maximum(o, 0.0)
    o_ref[...] = o.astype(o_ref.dtype)


def _mm_bias_acc_kernel(x_ref, w_ref, b_ref, o_ref, acc_ref, *, relu):
    """Multi-K matmul with f32 VMEM accumulator (K is innermost grid axis)."""
    @pl.when(pl.program_id(2) == 0)
    def _():
        acc_ref[...] = jnp.zeros_like(acc_ref)

    acc_ref[...] += jnp.dot(x_ref[...], w_ref[...],
                            preferred_element_type=jnp.float32)

    @pl.when(pl.program_id(2) == pl.num_programs(2) - 1)
    def _():
        out = acc_ref[...] + b_ref[...]
        if relu:
            out = jnp.maximum(out, 0.0)
        o_ref[...] = out.astype(o_ref.dtype)


def matmul_bias(x, w, b, relu=False, out_dtype=jnp.float32):
    """x:(M,K) @ w:(K,N) + b:(N,) -> (M,N) out_dtype. Lane-dense bf16 MXU inputs."""
    M, K = x.shape
    N = w.shape[1]

    Mp = _round_up(M, 8)
    if Mp > 256:
        Mp = _round_up(M, 256)
        tm = 256
    else:
        tm = Mp
    Np = _round_up(N, 128)
    tn = 256 if Np % 256 == 0 else 128
    Kp = _round_up(K, 128)

    def prep(a, rows, cols):
        if a.dtype != jnp.bfloat16:
            a = a.astype(jnp.bfloat16)
        if a.shape != (rows, cols):
            a = jnp.pad(a, ((0, rows - a.shape[0]), (0, cols - a.shape[1])))
        return a

    xp = prep(x, Mp, Kp)
    wp = prep(w, Kp, Np)
    b = b.reshape(1, -1).astype(jnp.float32)
    bp = b if b.shape[1] == Np else jnp.pad(b, ((0, 0), (0, Np - b.shape[1])))

    cost = pl.CostEstimate(
        flops=2 * Mp * Np * Kp,
        transcendentals=0,
        bytes_accessed=(Mp * Kp + Kp * Np) * 2 + Mp * Np * out_dtype(0).itemsize)

    if Kp <= 512:
        # single K step: skip accumulator scratch entirely
        grid = (Mp // tm, Np // tn)
        out = pl.pallas_call(
            functools.partial(_mm_bias_kernel, relu=relu),
            out_shape=jax.ShapeDtypeStruct((Mp, Np), out_dtype),
            grid=grid,
            in_specs=[pl.BlockSpec((tm, Kp), lambda i, j: (i, 0)),
                      pl.BlockSpec((Kp, tn), lambda i, j: (0, j)),
                      pl.BlockSpec((1, tn), lambda i, j: (0, j))],
            out_specs=pl.BlockSpec((tm, tn), lambda i, j: (i, j)),
            compiler_params=pltpu.CompilerParams(
                dimension_semantics=("parallel", "parallel"),
                vmem_limit_bytes=VMEM_LIMIT_BYTES),
            cost_estimate=cost,
        )(xp, wp, bp)
    else:
        tk = 512 if Kp % 512 == 0 else (256 if Kp % 256 == 0 else 128)
        grid = (Mp // tm, Np // tn, Kp // tk)
        out = pl.pallas_call(
            functools.partial(_mm_bias_acc_kernel, relu=relu),
            out_shape=jax.ShapeDtypeStruct((Mp, Np), out_dtype),
            grid=grid,
            in_specs=[pl.BlockSpec((tm, tk), lambda i, j, k: (i, k)),
                      pl.BlockSpec((tk, tn), lambda i, j, k: (k, j)),
                      pl.BlockSpec((1, tn), lambda i, j, k: (0, j))],
            out_specs=pl.BlockSpec((tm, tn), lambda i, j, k: (i, j)),
            scratch_shapes=[pltpu.VMEM((tm, tn), jnp.float32)],
            compiler_params=pltpu.CompilerParams(
                dimension_semantics=("parallel", "parallel", "arbitrary"),
                vmem_limit_bytes=VMEM_LIMIT_BYTES),
            cost_estimate=cost,
        )(xp, wp, bp)
    return out[:M, :N]


def _rpn_fused_kernel(cols_ref, w3_ref, b3_ref, wh_ref, bh_ref, o_ref):
    """Fused RPN: 3x3-conv matmul + bias + ReLU, then 1x1 head matmul + bias.

    The (tm, C) conv activation never leaves VMEM/registers.
    """
    t = jnp.dot(cols_ref[...], w3_ref[...], preferred_element_type=jnp.float32)
    t = jnp.maximum(t + b3_ref[...], 0.0)
    o = jnp.dot(t.astype(jnp.bfloat16), wh_ref[...],
                preferred_element_type=jnp.float32)
    o_ref[...] = (o + bh_ref[...]).astype(o_ref.dtype)


def rpn_fused(cols, params):
    """cols:(M, 9C) bf16 -> rpn_out:(M, N2p) f32 (objectness | bbox deltas, padded)."""
    M, K1 = cols.shape
    K1p = params['rpn_w3mat'].shape[0]
    Cmid = params['rpn_w3mat'].shape[1]
    N2p = params['rpn_whmat'].shape[1]

    Mp = _round_up(M, 256) if M > 256 else _round_up(M, 8)
    tm = 256 if Mp % 256 == 0 else Mp

    colsp = cols
    if colsp.dtype != jnp.bfloat16:
        colsp = colsp.astype(jnp.bfloat16)
    if colsp.shape != (Mp, K1p):
        colsp = jnp.pad(colsp, ((0, Mp - M), (0, K1p - K1)))

    out = pl.pallas_call(
        _rpn_fused_kernel,
        out_shape=jax.ShapeDtypeStruct((Mp, N2p), jnp.float32),
        grid=(Mp // tm,),
        in_specs=[pl.BlockSpec((tm, K1p), lambda i: (i, 0)),
                  pl.BlockSpec((K1p, Cmid), lambda i: (0, 0)),
                  pl.BlockSpec((1, Cmid), lambda i: (0, 0)),
                  pl.BlockSpec((Cmid, N2p), lambda i: (0, 0)),
                  pl.BlockSpec((1, N2p), lambda i: (0, 0))],
        out_specs=pl.BlockSpec((tm, N2p), lambda i: (i, 0)),
        compiler_params=pltpu.CompilerParams(
            dimension_semantics=("parallel",),
            vmem_limit_bytes=VMEM_LIMIT_BYTES),
        cost_estimate=pl.CostEstimate(
            flops=2 * Mp * (K1p * Cmid + Cmid * N2p),
            transcendentals=0,
            bytes_accessed=(Mp * K1p + K1p * Cmid + Cmid * N2p) * 2 + Mp * N2p * 4),
    )(colsp, params['rpn_w3mat'], params['rpn_b3'],
      params['rpn_whmat'], params['rpn_bh'])
    return out[:M, :]


def _roi_align_kernel(bidx_ref, di_ref, df_ref, kmap_ref, feat_ref, o_ref):
    """One ROI per grid step.

    Builds the per-ROI (P*P, Hf*Wf) bilinear weight matrix in-kernel from iota
    comparisons (never materialized in HBM), then contracts it against the
    (Hf*Wf, C) feature slab of the right batch image (selected via the
    scalar-prefetched batch index in the feature BlockSpec index_map).
    """
    del bidx_ref  # only used by the index_maps
    d_i = di_ref[0]                       # (PP, 4) int32: y0 | y1 | x0 | x1
    d_f = df_ref[0]                       # (PP, 4) f32  : hy | ly | hx | lx
    y0 = d_i[:, 0:1]
    y1 = d_i[:, 1:2]
    x0 = d_i[:, 2:3]
    x1 = d_i[:, 3:4]
    hy = d_f[:, 0:1]
    ly = d_f[:, 1:2]
    hx = d_f[:, 2:3]
    lx = d_f[:, 3:4]
    ky = kmap_ref[0:1, :]                 # (1, HW) int32 : row index of flat cell
    kx = kmap_ref[1:2, :]                 # (1, HW) int32 : col index of flat cell
    wy = jnp.where(ky == y0, hy, 0.0) + jnp.where(ky == y1, ly, 0.0)   # (PP, HW)
    wx = jnp.where(kx == x0, hx, 0.0) + jnp.where(kx == x1, lx, 0.0)   # (PP, HW)
    w2 = (wy * wx).astype(jnp.bfloat16)                                # (PP, HW)
    feat = feat_ref[0]                                                 # (HW, C) bf16
    o_ref[0] = jnp.dot(w2, feat,
                       preferred_element_type=jnp.float32).astype(o_ref.dtype)


def roi_align(base_feat, rois_flat, P, scale):
    """RoIAlign (single center sample per bin) -> (R, P*P, C) bf16."""
    # TODO(synk): torchvision RoIAlign uses sampling_ratio=2 sub-samples per bin
    # with averaging; here a single center sample per bin is used.
    B, Hf, Wf, C = base_feat.shape
    R = rois_flat.shape[0]
    PP = P * P
    HW = Hf * Wf

    bidx = rois_flat[:, 0].astype(jnp.int32)                 # (R,)
    x1 = rois_flat[:, 1] * scale
    y1 = rois_flat[:, 2] * scale
    x2 = rois_flat[:, 3] * scale
    y2 = rois_flat[:, 4] * scale
    bw = jnp.maximum(x2 - x1, 1e-3) / P
    bh = jnp.maximum(y2 - y1, 1e-3) / P
    cgrid = jnp.arange(P, dtype=jnp.float32) + 0.5
    ys = jnp.clip(y1[:, None] + cgrid[None, :] * bh[:, None], 0.0, Hf - 1.0)  # (R,P)
    xs = jnp.clip(x1[:, None] + cgrid[None, :] * bw[:, None], 0.0, Wf - 1.0)  # (R,P)
    y0 = jnp.floor(ys).astype(jnp.int32)
    x0 = jnp.floor(xs).astype(jnp.int32)
    y1i = jnp.minimum(y0 + 1, Hf - 1)
    x1i = jnp.minimum(x0 + 1, Wf - 1)
    ly = ys - y0.astype(jnp.float32)
    hy = 1.0 - ly
    lx = xs - x0.astype(jnp.float32)
    hx = 1.0 - lx

    # bin index b = py*P + px : row quantities repeat over px, col quantities tile
    rep = lambda a: jnp.repeat(a, P, axis=1)                  # (R,P) -> (R,P*P)
    til = lambda a: jnp.tile(a, (1, P))                       # (R,P) -> (R,P*P)
    desc_i = jnp.stack([rep(y0), rep(y1i), til(x0), til(x1i)], axis=-1)  # (R,PP,4)
    desc_f = jnp.stack([rep(hy), rep(ly), til(hx), til(lx)], axis=-1)    # (R,PP,4)
    desc_i = desc_i.astype(jnp.int32)
    desc_f = desc_f.astype(jnp.float32)

    kidx = jnp.arange(HW, dtype=jnp.int32)
    kmap = jnp.stack([kidx // Wf, kidx % Wf], axis=0)         # (2, HW) int32

    feat2 = base_feat.reshape(B, HW, C)
    if feat2.dtype != jnp.bfloat16:
        feat2 = feat2.astype(jnp.bfloat16)

    out = pl.pallas_call(
        _roi_align_kernel,
        out_shape=jax.ShapeDtypeStruct((R, PP, C), jnp.bfloat16),
        grid_spec=pltpu.PrefetchScalarGridSpec(
            num_scalar_prefetch=1,
            grid=(R,),
            in_specs=[pl.BlockSpec((1, PP, 4), lambda r, b: (r, 0, 0)),
                      pl.BlockSpec((1, PP, 4), lambda r, b: (r, 0, 0)),
                      pl.BlockSpec((2, HW), lambda r, b: (0, 0)),
                      pl.BlockSpec((1, HW, C), lambda r, b: (b[r], 0, 0))],
            out_specs=pl.BlockSpec((1, PP, C), lambda r, b: (r, 0, 0))),
        compiler_params=pltpu.CompilerParams(
            dimension_semantics=("parallel",),
            vmem_limit_bytes=VMEM_LIMIT_BYTES),
    )(bidx, desc_i, desc_f, kmap, feat2)
    return out


def _head_fused_kernel(x_ref, w1_ref, b1_ref, w2_ref, b2_ref, o_ref, *, n_bbox, n_cls):
    """Fused _head_to_tail FC(+ReLU) + [bbox_pred | cls_score] FC + class softmax."""
    h = jnp.dot(x_ref[...], w1_ref[...], preferred_element_type=jnp.float32)
    h = jnp.maximum(h + b1_ref[...], 0.0)
    acc = jnp.dot(h.astype(jnp.bfloat16), w2_ref[...],
                  preferred_element_type=jnp.float32)
    acc = acc + b2_ref[...]
    col = jax.lax.broadcasted_iota(jnp.int32, acc.shape, 1)
    is_cls = jnp.logical_and(col >= n_bbox, col < n_bbox + n_cls)
    neg = jnp.float32(-1e30)                     # finite mask: no exp(-inf-(-inf)) NaN
    cls_vals = jnp.where(is_cls, acc, neg)
    m = jnp.max(cls_vals, axis=-1, keepdims=True)
    e = jnp.where(is_cls, jnp.exp(cls_vals - m), 0.0)
    s = jnp.sum(e, axis=-1, keepdims=True)
    prob = e / s
    o_ref[...] = jnp.where(is_cls, prob, acc).astype(o_ref.dtype)


def head_fused(x, params, n_bbox, n_cls):
    """x:(R, P*P*C) -> (bbox_pred (R,n_bbox), cls_prob (R,n_cls)) in one kernel."""
    R, K = x.shape
    Rp = _round_up(R, 8)
    Kp = params['head_w1'].shape[0]
    H = params['head_w1'].shape[1]
    Np = params['head_w2'].shape[1]

    xp = x
    if xp.dtype != jnp.bfloat16:
        xp = xp.astype(jnp.bfloat16)
    if xp.shape != (Rp, Kp):
        xp = jnp.pad(xp, ((0, Rp - R), (0, Kp - K)))

    out = pl.pallas_call(
        functools.partial(_head_fused_kernel, n_bbox=n_bbox, n_cls=n_cls),
        out_shape=jax.ShapeDtypeStruct((Rp, Np), jnp.float32),
        grid=(1,),
        in_specs=[pl.BlockSpec((Rp, Kp), lambda i: (0, 0)),
                  pl.BlockSpec((Kp, H), lambda i: (0, 0)),
                  pl.BlockSpec((1, H), lambda i: (0, 0)),
                  pl.BlockSpec((H, Np), lambda i: (0, 0)),
                  pl.BlockSpec((1, Np), lambda i: (0, 0))],
        out_specs=pl.BlockSpec((Rp, Np), lambda i: (0, 0)),
        compiler_params=pltpu.CompilerParams(
            dimension_semantics=("arbitrary",),
            vmem_limit_bytes=VMEM_LIMIT_BYTES),
    )(xp, params['head_w1'], params['head_b1'],
      params['head_w2'], params['head_b2'])
    return out[:R, :n_bbox], out[:R, n_bbox:n_bbox + n_cls]


# ------------------- conv via channels-last im2col (XLA glue) ---------------

def im2col_nhwc(x, kh, kw, stride, padding):
    # x: (N, H, W, C) channels-last; dtype preserved (bf16 stays bf16)
    # TODO(synk): fuse im2col into the conv kernel (halo-window blocks + KH*KW
    # shifted dots) to avoid the 9x HBM expansion at real feature-map sizes.
    N, H, W, C = x.shape
    xp = jnp.pad(x, ((0, 0), (padding, padding), (padding, padding), (0, 0)))
    OH = (H + 2 * padding - kh) // stride + 1
    OW = (W + 2 * padding - kw) // stride + 1
    cols = []
    for i in range(kh):
        for j in range(kw):
            patch = xp[:, i:i + stride * (OH - 1) + 1:stride,
                          j:j + stride * (OW - 1) + 1:stride, :]   # (N,OH,OW,C)
            cols.append(patch)
    cols = jnp.concatenate(cols, axis=-1)                          # (N,OH,OW,kh*kw*C)
    return cols.reshape(N * OH * OW, kh * kw * C), OH, OW


# ----------------------------- RPN pieces (glue) ----------------------------

def make_anchors(feat_h, feat_w, stride):
    sizes = jnp.asarray(ANCHOR_SIZES, jnp.float32)
    ratios = jnp.asarray(ANCHOR_RATIOS, jnp.float32)
    h_ratios = jnp.sqrt(ratios)
    w_ratios = 1.0 / h_ratios
    ws = (w_ratios[:, None] * sizes[None, :]).reshape(-1)
    hs = (h_ratios[:, None] * sizes[None, :]).reshape(-1)
    base = jnp.stack([-ws / 2, -hs / 2, ws / 2, hs / 2], axis=1)      # (A,4)
    sx = jnp.arange(feat_w, dtype=jnp.float32) * stride
    sy = jnp.arange(feat_h, dtype=jnp.float32) * stride
    syy, sxx = jnp.meshgrid(sy, sx, indexing='ij')
    shifts = jnp.stack([sxx.reshape(-1), syy.reshape(-1),
                        sxx.reshape(-1), syy.reshape(-1)], axis=1)    # (H*W,4)
    return (shifts[:, None, :] + base[None, :, :]).reshape(-1, 4)     # (H*W*A,4)


def decode_boxes(anchors, deltas, im_size):
    wa = anchors[..., 2] - anchors[..., 0]
    ha = anchors[..., 3] - anchors[..., 1]
    cxa = anchors[..., 0] + 0.5 * wa
    cya = anchors[..., 1] + 0.5 * ha
    dx, dy, dw, dh = deltas[..., 0], deltas[..., 1], deltas[..., 2], deltas[..., 3]
    clamp = math.log(1000.0 / 16.0)
    dw = jnp.minimum(dw, clamp)
    dh = jnp.minimum(dh, clamp)
    cx = dx * wa + cxa
    cy = dy * ha + cya
    w = jnp.exp(dw) * wa
    h = jnp.exp(dh) * ha
    boxes = jnp.stack([cx - 0.5 * w, cy - 0.5 * h, cx + 0.5 * w, cy + 0.5 * h], axis=-1)
    return jnp.clip(boxes, 0.0, float(im_size))


# ----------------------------- parameters -----------------------------------

def init_params(key):
    """Weights are stored pre-transposed / pre-padded / pre-cast (bf16) for the
    Pallas kernels so the jitted forward does no weight pad/cast glue."""
    ks = jax.random.split(key, 8)
    n = lambda k, s, std=0.01: std * jax.random.normal(k, s, jnp.float32)
    A = NUM_ANCHORS
    C = DOUT_BASE
    p = {}

    # RCNN_base: 3x3 stride-2 conv (OC=C, IC=3) -> im2col matrix (9*IC, C)
    base_w = n(ks[0], (C, IN_CH, 3, 3), 0.05)
    p['base_wmat'] = jnp.transpose(base_w, (2, 3, 1, 0)).reshape(9 * IN_CH, C)
    p['base_b'] = jnp.zeros((C,), jnp.float32)

    # RPN: 3x3 conv + fused 1x1 heads [objectness (A) | bbox deltas (4A)]
    K1 = 9 * C
    K1p = _round_up(K1, 128)
    rpn_w3 = n(ks[1], (C, C, 3, 3))
    w3mat = jnp.transpose(rpn_w3, (2, 3, 1, 0)).reshape(K1, C)
    p['rpn_w3mat'] = jnp.pad(w3mat, ((0, K1p - K1), (0, 0))).astype(jnp.bfloat16)
    p['rpn_b3'] = jnp.zeros((1, C), jnp.float32)
    rpn_cls_w = n(ks[2], (A, C))
    rpn_bbox_w = n(ks[3], (4 * A, C))
    whead = jnp.concatenate([rpn_cls_w, rpn_bbox_w], axis=0).T        # (C, 5A)
    N2 = 5 * A
    N2p = _round_up(N2, 128)
    p['rpn_whmat'] = jnp.pad(whead, ((0, 0), (0, N2p - N2))).astype(jnp.bfloat16)
    p['rpn_bh'] = jnp.zeros((1, N2p), jnp.float32)

    # _head_to_tail FC (+ReLU) and fused RCNN_bbox_pred + RCNN_cls_score
    Kh = C * POOLING_SIZE * POOLING_SIZE
    Khp = _round_up(Kh, 128)
    w1 = n(ks[4], (Kh, HIDDEN))
    p['head_w1'] = jnp.pad(w1, ((0, Khp - Kh), (0, 0))).astype(jnp.bfloat16)
    p['head_b1'] = jnp.zeros((1, HIDDEN), jnp.float32)
    nb = 4 if CLASS_AGNOSTIC else 4 * N_CLASSES
    bbox_w = n(ks[5], (nb, HIDDEN), 0.001)
    cls_w = n(ks[6], (N_CLASSES, HIDDEN))
    w2 = jnp.concatenate([bbox_w, cls_w], axis=0).T                   # (HIDDEN, nb+ncls)
    Nh = nb + N_CLASSES
    Nhp = _round_up(Nh, 128)
    p['head_w2'] = jnp.pad(w2, ((0, 0), (0, Nhp - Nh))).astype(jnp.bfloat16)
    p['head_b2'] = jnp.zeros((1, Nhp), jnp.float32)
    return p


# ----------------------------- forward --------------------------------------

def faster_rcnn_forward(params, im_data, im_data_2, im_info, gt_boxes, num_boxes):
    """Inference-mode forward of _fasterRCNN (self.training == False)."""
    del im_data_2, im_info, gt_boxes, num_boxes   # unused in inference forward
    batch_size = im_data.shape[0]
    A = NUM_ANCHORS
    C = DOUT_BASE

    # NCHW -> NHWC once; everything downstream stays channels-last.
    x = jnp.transpose(im_data, (0, 2, 3, 1))

    # ---- RCNN_base : 3x3/s2 conv + ReLU (Pallas matmul on im2col cols) ----
    cols, Hf, Wf = im2col_nhwc(x, 3, 3, FEAT_STRIDE, 1)
    base_flat = matmul_bias(cols, params['base_wmat'], params['base_b'],
                            relu=True, out_dtype=jnp.bfloat16)        # (B*Hf*Wf, C)
    base_feat = base_flat.reshape(batch_size, Hf, Wf, C)              # bf16, NHWC

    # ---- RCNN_rpn : fused 3x3 conv + ReLU + 1x1 heads, one Pallas call ----
    rpn_cols, _, _ = im2col_nhwc(base_feat, 3, 3, 1, 1)               # (B*Hf*Wf, 9C) bf16
    rpn_flat = rpn_fused(rpn_cols, params)                            # (B*Hf*Wf, N2p) f32
    rpn_out = rpn_flat[:, :5 * A].reshape(batch_size, Hf, Wf, 5 * A)
    objectness = rpn_out[..., :A]                                     # (B,Hf,Wf,A)
    bbox_deltas = rpn_out[..., A:]                                    # (B,Hf,Wf,4A)

    scores = objectness.reshape(batch_size, -1)                       # (B, Hf*Wf*A)
    deltas = bbox_deltas.reshape(batch_size, Hf * Wf * A, 4)

    anchors = make_anchors(Hf, Wf, FEAT_STRIDE)                       # (Hf*Wf*A, 4)
    proposals_all = decode_boxes(anchors[None], deltas, IM_SIZE)      # (B,Hf*Wf*A,4)

    # TODO(synk): torchvision RPN applies per-image NMS; replaced by pure top-k
    # over objectness logits (no clean Pallas NMS equivalent).
    _, top_idx = jax.lax.top_k(scores, RPN_POST_NMS_TOP_N)
    rpn_boxes = jnp.take_along_axis(proposals_all, top_idx[..., None], axis=1)

    inds = jnp.broadcast_to(
        jnp.arange(batch_size, dtype=jnp.float32)[:, None, None],
        (batch_size, RPN_POST_NMS_TOP_N, 1))
    rois = jnp.concatenate([inds, rpn_boxes], axis=2)                 # (B,N_roi,5)

    # ---- RCNN_roi_align : scalar-prefetch Pallas kernel ----
    rois_flat = rois.reshape(-1, 5)
    spatial_scale = float(Hf) / float(IM_SIZE)
    pooled = roi_align(base_feat, rois_flat, POOLING_SIZE, spatial_scale)  # (R,P*P,C) bf16
    R = rois_flat.shape[0]
    pooled_flat = pooled.reshape(R, POOLING_SIZE * POOLING_SIZE * C)

    # ---- _head_to_tail + RCNN_bbox_pred + RCNN_cls_score + softmax (fused) ----
    nb = 4 if CLASS_AGNOSTIC else 4 * N_CLASSES
    bbox_pred, cls_prob = head_fused(pooled_flat, params, nb, N_CLASSES)

    # inference mode: no losses, no label gather
    rpn_loss_cls = jnp.float32(0.0)
    rpn_loss_bbox = jnp.float32(0.0)
    RCNN_loss_cls = jnp.float32(0.0)
    RCNN_loss_bbox = jnp.float32(0.0)
    rois_label = None

    cls_prob = cls_prob.reshape(batch_size, rois.shape[1], -1)
    bbox_pred = bbox_pred.reshape(batch_size, rois.shape[1], -1)

    return (rois, cls_prob, bbox_pred, rpn_loss_cls, rpn_loss_bbox,
            RCNN_loss_cls, RCNN_loss_bbox, rois_label)


faster_rcnn_forward_jit = jax.jit(faster_rcnn_forward)


# ----------------------------- main ------------------------------------------

if __name__ == "__main__":
    key = jax.random.PRNGKey(0)
    k_p, k_im, k_im2, k_gt = jax.random.split(key, 4)

    params = init_params(k_p)

    im_data = jax.random.normal(k_im, (BATCH, IN_CH, IM_SIZE, IM_SIZE), jnp.float32)
    im_data_2 = jax.random.normal(k_im2, (BATCH, IN_CH, IM_SIZE, IM_SIZE), jnp.float32)
    im_info = jnp.tile(jnp.array([[IM_SIZE, IM_SIZE, 1.0]], jnp.float32), (BATCH, 1))
    gt_boxes = jnp.abs(jax.random.normal(k_gt, (BATCH, 4, 5), jnp.float32)) * 8.0
    num_boxes = jnp.array([2, 3], jnp.int32)

    outs = faster_rcnn_forward_jit(params, im_data, im_data_2, im_info,
                                   gt_boxes, num_boxes)
    (rois, cls_prob, bbox_pred, rpn_lc, rpn_lb, rcnn_lc, rcnn_lb, rois_label) = outs

    jax.block_until_ready(rois)
    jax.block_until_ready(cls_prob)
    jax.block_until_ready(bbox_pred)

    assert rois.shape == (BATCH, RPN_POST_NMS_TOP_N, 5)
    assert cls_prob.shape == (BATCH, RPN_POST_NMS_TOP_N, N_CLASSES)
    assert bbox_pred.shape == (BATCH, RPN_POST_NMS_TOP_N, 4 * N_CLASSES)
    assert bool(jnp.all(jnp.isfinite(cls_prob)))
    assert bool(jnp.all(jnp.isfinite(bbox_pred)))
    # softmax rows must sum to ~1
    assert bool(jnp.all(jnp.abs(jnp.sum(cls_prob, axis=-1) - 1.0) < 1e-3))
    assert rois_label is None

    print("KERNEL_OK")
</pallas_src>

<mosaic_0001>
module attributes {stable_mosaic.version = 11 : i64} {
  func.func @_mm_bias_kernel(%arg0: i32, %arg1: i32, %arg2: memref<256x128xbf16, #tpu.memory_space<vmem>>, %arg3: memref<128x128xbf16, #tpu.memory_space<vmem>>, %arg4: memref<1x128xf32, #tpu.memory_space<vmem>>, %arg5: memref<256x128xbf16, #tpu.memory_space<vmem>>) attributes {dimension_semantics = [#tpu.dimension_semantics<parallel>, #tpu.dimension_semantics<parallel>], iteration_bounds = array<i64: 2, 1>, scalar_prefetch = 0 : i64, scratch_operands = 0 : i64, tpu.core_type = #tpu.core_type<tc>, window_params = [{transform_indices = @transform_0, window_bounds = array<i64: 256, 128>}, {transform_indices = @transform_1, window_bounds = array<i64: 128, 128>}, {transform_indices = @transform_2, window_bounds = array<i64: 1, 128>}, {transform_indices = @transform_3, window_bounds = array<i64: 256, 128>}]} {
    %c0 = arith.constant 0 : index
    %c0_0 = arith.constant 0 : index
    %0 = vector.load %arg2[%c0, %c0_0] : memref<256x128xbf16, #tpu.memory_space<vmem>>, vector<256x128xbf16>
    %c0_1 = arith.constant 0 : index
    %c0_2 = arith.constant 0 : index
    %1 = vector.load %arg3[%c0_1, %c0_2] : memref<128x128xbf16, #tpu.memory_space<vmem>>, vector<128x128xbf16>
    %cst = arith.constant dense<0.000000e+00> : vector<256x128xf32>
    %2 = tpu.matmul %0, %1, %cst {dimension_numbers = #tpu.dot_dimension_numbers<[1], [0], [0], [1], [0, 0, 1, 1], [], []>} : vector<256x128xbf16>, vector<128x128xbf16>, vector<256x128xf32> -> vector<256x128xf32>
    %c0_3 = arith.constant 0 : index
    %c0_4 = arith.constant 0 : index
    %3 = vector.load %arg4[%c0_3, %c0_4] : memref<1x128xf32, #tpu.memory_space<vmem>>, vector<1x128xf32>
    %4 = vector.broadcast %3 : vector<1x128xf32> to vector<256x128xf32>
    %5 = arith.addf %2, %4 : vector<256x128xf32>
    %cst_5 = arith.constant 0.000000e+00 : f32
    %6 = vector.broadcast %cst_5 : f32 to vector<256x128xf32>
    %7 = arith.maximumf %5, %6 : vector<256x128xf32>
    %8 = arith.truncf %7 : vector<256x128xf32> to vector<256x128xbf16>
    %c0_6 = arith.constant 0 : index
    %c0_7 = arith.constant 0 : index
    %9 = vector.load %arg5[%c0_6, %c0_7] : memref<256x128xbf16, #tpu.memory_space<vmem>>, vector<256x128xbf16>
    tpu.vector_store %arg5[%c0_6, %c0_7], %8 {strides = array<i32>} : memref<256x128xbf16, #tpu.memory_space<vmem>>, vector<256x128xbf16>,
    return
  }
  func.func @transform_0(%arg0: i32, %arg1: i32) -> (i32, i32) {
    %c0_i32 = arith.constant 0 : i32
    %c0_i32_0 = arith.constant 0 : i32
    return %arg0, %c0_i32 : i32, i32
  }
  func.func @transform_1(%arg0: i32, %arg1: i32) -> (i32, i32) {
    %c0_i32 = arith.constant 0 : i32
    %c0_i32_0 = arith.constant 0 : i32
    return %c0_i32, %arg1 : i32, i32
  }
  func.func @transform_2(%arg0: i32, %arg1: i32) -> (i32, i32) {
    %c0_i32 = arith.constant 0 : i32
    %c0_i32_0 = arith.constant 0 : i32
    return %c0_i32, %arg1 : i32, i32
  }
  func.func @transform_3(%arg0: i32, %arg1: i32) -> (i32, i32) {
    %c0_i32 = arith.constant 0 : i32
    return %arg0, %arg1 : i32, i32
  }
}

module attributes {stable_mosaic.version = 11 : i64} {
  func.func @_rpn_fused_kernel(%arg0: i32, %arg1: memref<256x384xbf16, #tpu.memory_space<vmem>>, %arg2: memref<384x32xbf16, #tpu.memory_space<vmem>>, %arg3: memref<1x32xf32, #tpu.memory_space<vmem>>, %arg4: memref<32x256xbf16, #tpu.memory_space<vmem>>, %arg5: memref<1x256xf32, #tpu.memory_space<vmem>>, %arg6: memref<256x256xf32, #tpu.memory_space<vmem>>) attributes {dimension_semantics = [#tpu.dimension_semantics<parallel>], iteration_bounds = array<i64: 2>, scalar_prefetch = 0 : i64, scratch_operands = 0 : i64, tpu.core_type = #tpu.core_type<tc>, window_params = [{transform_indices = @transform_0, window_bounds = array<i64: 256, 384>}, {pipeline_mode = #tpu.pipeline_mode<synchronous>, transform_indices = @transform_1, window_bounds = array<i64: 384, 32>}, {pipeline_mode = #tpu.pipeline_mode<synchronous>, transform_indices = @transform_2, window_bounds = array<i64: 1, 32>}, {pipeline_mode = #tpu.pipeline_mode<synchronous>, transform_indices = @transform_3, window_bounds = array<i64: 32, 256>}, {pipeline_mode = #tpu.pipeline_mode<synchronous>, transform_indices = @transform_4, window_bounds = array<i64: 1, 256>}, {transform_indices = @transform_5, window_bounds = array<i64: 256, 256>}]} {
    %c0 = arith.constant 0 : index
    %c0_0 = arith.constant 0 : index
    %0 = vector.load %arg1[%c0, %c0_0] : memref<256x384xbf16, #tpu.memory_space<vmem>>, vector<256x384xbf16>
    %c0_1 = arith.constant 0 : index
    %c0_2 = arith.constant 0 : index
    %1 = vector.load %arg2[%c0_1, %c0_2] : memref<384x32xbf16, #tpu.memory_space<vmem>>, vector<384x32xbf16>
    %cst = arith.constant dense<0.000000e+00> : vector<256x32xf32>
    %2 = tpu.matmul %0, %1, %cst {dimension_numbers = #tpu.dot_dimension_numbers<[1], [0], [0], [1], [0, 0, 1, 1], [], []>} : vector<256x384xbf16>, vector<384x32xbf16>, vector<256x32xf32> -> vector<256x32xf32>
    %c0_3 = arith.constant 0 : index
    %c0_4 = arith.constant 0 : index
    %3 = vector.load %arg3[%c0_3, %c0_4] : memref<1x32xf32, #tpu.memory_space<vmem>>, vector<1x32xf32>
    %4 = vector.broadcast %3 : vector<1x32xf32> to vector<256x32xf32>
    %5 = arith.addf %2, %4 : vector<256x32xf32>
    %cst_5 = arith.constant 0.000000e+00 : f32
    %6 = vector.broadcast %cst_5 : f32 to vector<256x32xf32>
    %7 = arith.maximumf %5, %6 : vector<256x32xf32>
    %8 = arith.truncf %7 : vector<256x32xf32> to vector<256x32xbf16>
    %c0_6 = arith.constant 0 : index
    %c0_7 = arith.constant 0 : index
    %9 = vector.load %arg4[%c0_6, %c0_7] : memref<32x256xbf16, #tpu.memory_space<vmem>>, vector<32x256xbf16>
    %cst_8 = arith.constant dense<0.000000e+00> : vector<256x256xf32>
    %10 = tpu.matmul %8, %9, %cst_8 {dimension_numbers = #tpu.dot_dimension_numbers<[1], [0], [0], [1], [0, 0, 1, 1], [], []>} : vector<256x32xbf16>, vector<32x256xbf16>, vector<256x256xf32> -> vector<256x256xf32>
    %c0_9 = arith.constant 0 : index
    %c0_10 = arith.constant 0 : index
    %11 = vector.load %arg5[%c0_9, %c0_10] : memref<1x256xf32, #tpu.memory_space<vmem>>, vector<1x256xf32>
    %12 = vector.broadcast %11 : vector<1x256xf32> to vector<256x256xf32>
    %13 = arith.addf %10, %12 : vector<256x256xf32>
    %c0_11 = arith.constant 0 : index
    %c0_12 = arith.constant 0 : index
    %14 = vector.load %arg6[%c0_11, %c0_12] : memref<256x256xf32, #tpu.memory_space<vmem>>, vector<256x256xf32>
    tpu.vector_store %arg6[%c0_11, %c0_12], %13 {strides = array<i32>} : memref<256x256xf32, #tpu.memory_space<vmem>>, vector<256x256xf32>,
    return
  }
  func.func @transform_0(%arg0: i32) -> (i32, i32) {
    %c0_i32 = arith.constant 0 : i32
    %c0_i32_0 = arith.constant 0 : i32
    return %arg0, %c0_i32 : i32, i32
  }
  func.func @transform_1(%arg0: i32) -> (i32, i32) {
    %c0_i32 = arith.constant 0 : i32
    %c0_i32_0 = arith.constant 0 : i32
    %c0_i32_1 = arith.constant 0 : i32
    return %c0_i32, %c0_i32_0 : i32, i32
  }
  func.func @transform_2(%arg0: i32) -> (i32, i32) {
    %c0_i32 = arith.constant 0 : i32
    %c0_i32_0 = arith.constant 0 : i32
    %c0_i32_1 = arith.constant 0 : i32
    return %c0_i32, %c0_i32_0 : i32, i32
  }
  func.func @transform_3(%arg0: i32) -> (i32, i32) {
    %c0_i32 = arith.constant 0 : i32
    %c0_i32_0 = arith.constant 0 : i32
    %c0_i32_1 = arith.constant 0 : i32
    return %c0_i32, %c0_i32_0 : i32, i32
  }
  func.func @transform_4(%arg0: i32) -> (i32, i32) {
    %c0_i32 = arith.constant 0 : i32
    %c0_i32_0 = arith.constant 0 : i32
    %c0_i32_1 = arith.constant 0 : i32
    return %c0_i32, %c0_i32_0 : i32, i32
  }
  func.func @transform_5(%arg0: i32) -> (i32, i32) {
    %c0_i32 = arith.constant 0 : i32
    %c0_i32_0 = arith.constant 0 : i32
    return %arg0, %c0_i32 : i32, i32
  }
}

module attributes {stable_mosaic.version = 11 : i64} {
  func.func @_roi_align_kernel(%arg0: i32, %arg1: memref<32xi32, #tpu.memory_space<smem>>, %arg2: memref<1x49x4xi32, #tpu.memory_space<vmem>>, %arg3: memref<1x49x4xf32, #tpu.memory_space<vmem>>, %arg4: memref<2x256xi32, #tpu.memory_space<vmem>>, %arg5: memref<1x256x32xbf16, #tpu.memory_space<vmem>>, %arg6: memref<1x49x32xbf16, #tpu.memory_space<vmem>>) attributes {dimension_semantics = [#tpu.dimension_semantics<parallel>], iteration_bounds = array<i64: 32>, scalar_prefetch = 1 : i64, scratch_operands = 0 : i64, tpu.core_type = #tpu.core_type<tc>, window_params = [{transform_indices = @transform_0, window_bounds = array<i64: 1, 49, 4>}, {transform_indices = @transform_1, window_bounds = array<i64: 1, 49, 4>}, {pipeline_mode = #tpu.pipeline_mode<synchronous>, transform_indices = @transform_2, window_bounds = array<i64: 2, 256>}, {transform_indices = @transform_3, window_bounds = array<i64: 1, 256, 32>}, {transform_indices = @transform_4, window_bounds = array<i64: 1, 49, 32>}]} {
    %c0 = arith.constant 0 : index
    %c0_0 = arith.constant 0 : index
    %c0_1 = arith.constant 0 : index
    %0 = vector.load %arg2[%c0, %c0_0, %c0_1] : memref<1x49x4xi32, #tpu.memory_space<vmem>>, vector<1x49x4xi32>
    %1 = vector.shape_cast %0 : vector<1x49x4xi32> to vector<49x4xi32>
    %c0_2 = arith.constant 0 : index
    %c0_3 = arith.constant 0 : index
    %c0_4 = arith.constant 0 : index
    %2 = vector.load %arg3[%c0_2, %c0_3, %c0_4] : memref<1x49x4xf32, #tpu.memory_space<vmem>>, vector<1x49x4xf32>
    %3 = vector.shape_cast %2 : vector<1x49x4xf32> to vector<49x4xf32>
    %4 = vector.extract_strided_slice %1 {offsets = [0, 0], sizes = [49, 1], strides = [1, 1]} : vector<49x4xi32> to vector<49x1xi32>
    %5 = vector.extract_strided_slice %1 {offsets = [0, 1], sizes = [49, 1], strides = [1, 1]} : vector<49x4xi32> to vector<49x1xi32>
    %6 = vector.extract_strided_slice %1 {offsets = [0, 2], sizes = [49, 1], strides = [1, 1]} : vector<49x4xi32> to vector<49x1xi32>
    %7 = vector.extract_strided_slice %1 {offsets = [0, 3], sizes = [49, 1], strides = [1, 1]} : vector<49x4xi32> to vector<49x1xi32>
    %8 = vector.extract_strided_slice %3 {offsets = [0, 0], sizes = [49, 1], strides = [1, 1]} : vector<49x4xf32> to vector<49x1xf32>
    %9 = vector.extract_strided_slice %3 {offsets = [0, 1], sizes = [49, 1], strides = [1, 1]} : vector<49x4xf32> to vector<49x1xf32>
    %10 = vector.extract_strided_slice %3 {offsets = [0, 2], sizes = [49, 1], strides = [1, 1]} : vector<49x4xf32> to vector<49x1xf32>
    %11 = vector.extract_strided_slice %3 {offsets = [0, 3], sizes = [49, 1], strides = [1, 1]} : vector<49x4xf32> to vector<49x1xf32>
    %c0_5 = arith.constant 0 : index
    %c0_6 = arith.constant 0 : index
    %12 = vector.load %arg4[%c0_5, %c0_6] : memref<2x256xi32, #tpu.memory_space<vmem>>, vector<1x256xi32>
    %c1 = arith.constant 1 : index
    %c0_7 = arith.constant 0 : index
    %13 = vector.load %arg4[%c1, %c0_7] : memref<2x256xi32, #tpu.memory_space<vmem>>, vector<1x256xi32>
    %14 = vector.broadcast %12 : vector<1x256xi32> to vector<49x256xi32>
    %15 = vector.broadcast %4 : vector<49x1xi32> to vector<49x256xi32>
    %16 = arith.cmpi eq, %14, %15 : vector<49x256xi32>
    %cst = arith.constant 0.000000e+00 : f32
    %17 = vector.shape_cast %8 : vector<49x1xf32> to vector<49x1xf32>
    %18 = vector.broadcast %17 : vector<49x1xf32> to vector<49x256xf32>
    %19 = vector.broadcast %cst : f32 to vector<49x256xf32>
    %20 = arith.select %16, %18, %19 : vector<49x256xi1>, vector<49x256xf32>
    %21 = vector.broadcast %12 : vector<1x256xi32> to vector<49x256xi32>
    %22 = vector.broadcast %5 : vector<49x1xi32> to vector<49x256xi32>
    %23 = arith.cmpi eq, %21, %22 : vector<49x256xi32>
    %cst_8 = arith.constant 0.000000e+00 : f32
    %24 = vector.shape_cast %9 : vector<49x1xf32> to vector<49x1xf32>
    %25 = vector.broadcast %24 : vector<49x1xf32> to vector<49x256xf32>
    %26 = vector.broadcast %cst_8 : f32 to vector<49x256xf32>
    %27 = arith.select %23, %25, %26 : vector<49x256xi1>, vector<49x256xf32>
    %28 = arith.addf %20, %27 : vector<49x256xf32>
    %29 = vector.broadcast %13 : vector<1x256xi32> to vector<49x256xi32>
    %30 = vector.broadcast %6 : vector<49x1xi32> to vector<49x256xi32>
    %31 = arith.cmpi eq, %29, %30 : vector<49x256xi32>
    %cst_9 = arith.constant 0.000000e+00 : f32
    %32 = vector.shape_cast %10 : vector<49x1xf32> to vector<49x1xf32>
    %33 = vector.broadcast %32 : vector<49x1xf32> to vector<49x256xf32>
    %34 = vector.broadcast %cst_9 : f32 to vector<49x256xf32>
    %35 = arith.select %31, %33, %34 : vector<49x256xi1>, vector<49x256xf32>
    %36 = vector.broadcast %13 : vector<1x256xi32> to vector<49x256xi32>
    %37 = vector.broadcast %7 : vector<49x1xi32> to vector<49x256xi32>
    %38 = arith.cmpi eq, %36, %37 : vector<49x256xi32>
    %cst_10 = arith.constant 0.000000e+00 : f32
    %39 = vector.shape_cast %11 : vector<49x1xf32> to vector<49x1xf32>
    %40 = vector.broadcast %39 : vector<49x1xf32> to vector<49x256xf32>
    %41 = vector.broadcast %cst_10 : f32 to vector<49x256xf32>
    %42 = arith.select %38, %40, %41 : vector<49x256xi1>, vector<49x256xf32>
    %43 = arith.addf %35, %42 : vector<49x256xf32>
    %44 = arith.mulf %28, %43 : vector<49x256xf32>
    %45 = arith.truncf %44 : vector<49x256xf32> to vector<49x256xbf16>
    %c0_11 = arith.constant 0 : index
    %c0_12 = arith.constant 0 : index
    %c0_13 = arith.constant 0 : index
    %46 = vector.load %arg5[%c0_11, %c0_12, %c0_13] : memref<1x256x32xbf16, #tpu.memory_space<vmem>>, vector<1x256x32xbf16>
    %47 = vector.shape_cast %46 : vector<1x256x32xbf16> to vector<256x32xbf16>
    %cst_14 = arith.constant dense<0.000000e+00> : vector<49x32xf32>
    %48 = tpu.matmul %45, %47, %cst_14 {dimension_numbers = #tpu.dot_dimension_numbers<[1], [0], [0], [1], [0, 0, 1, 1], [], []>} : vector<49x256xbf16>, vector<256x32xbf16>, vector<49x32xf32> -> vector<49x32xf32>
    %49 = arith.truncf %48 : vector<49x32xf32> to vector<49x32xbf16>
    %c0_15 = arith.constant 0 : index
    %c0_16 = arith.constant 0 : index
    %c0_17 = arith.constant 0 : index
    %50 = vector.load %arg6[%c0_15, %c0_16, %c0_17] : memref<1x49x32xbf16, #tpu.memory_space<vmem>>, vector<1x49x32xbf16>
    %51 = vector.shape_cast %50 : vector<1x49x32xbf16> to vector<49x32xbf16>
    %52 = vector.shape_cast %49 : vector<49x32xbf16> to vector<1x49x32xbf16>
    tpu.vector_store %arg6[%c0_15, %c0_16, %c0_17], %52 {strides = array<i32>} : memref<1x49x32xbf16, #tpu.memory_space<vmem>>, vector<1x49x32xbf16>,
    return
  }
  func.func @transform_0(%arg0: i32, %arg1: memref<32xi32, #tpu.memory_space<smem>>) -> (i32, i32, i32) {
    %c0_i32 = arith.constant 0 : i32
    %c0_i32_0 = arith.constant 0 : i32
    %c0_i32_1 = arith.constant 0 : i32
    return %arg0, %c0_i32, %c0_i32_0 : i32, i32, i32
  }
  func.func @transform_1(%arg0: i32, %arg1: memref<32xi32, #tpu.memory_space<smem>>) -> (i32, i32, i32) {
    %c0_i32 = arith.constant 0 : i32
    %c0_i32_0 = arith.constant 0 : i32
    %c0_i32_1 = arith.constant 0 : i32
    return %arg0, %c0_i32, %c0_i32_0 : i32, i32, i32
  }
  func.func @transform_2(%arg0: i32, %arg1: memref<32xi32, #tpu.memory_space<smem>>) -> (i32, i32) {
    %c0_i32 = arith.constant 0 : i32
    %c0_i32_0 = arith.constant 0 : i32
    %c0_i32_1 = arith.constant 0 : i32
    return %c0_i32, %c0_i32_0 : i32, i32
  }
  func.func @transform_3(%arg0: i32, %arg1: memref<32xi32, #tpu.memory_space<smem>>) -> (i32, i32, i32) {
    %0 = arith.index_cast %arg0 : i32 to index
    %1 = memref.load %arg1[%0] : memref<32xi32, #tpu.memory_space<smem>>
    %c0_i32 = arith.constant 0 : i32
    %c0_i32_0 = arith.constant 0 : i32
    %c0_i32_1 = arith.constant 0 : i32
    return %1, %c0_i32, %c0_i32_0 : i32, i32, i32
  }
  func.func @transform_4(%arg0: i32, %arg1: memref<32xi32, #tpu.memory_space<smem>>) -> (i32, i32, i32) {
    %c0_i32 = arith.constant 0 : i32
    %c0_i32_0 = arith.constant 0 : i32
    %c0_i32_1 = arith.constant 0 : i32
    return %arg0, %c0_i32, %c0_i32_0 : i32, i32, i32
  }
}

module attributes {stable_mosaic.version = 11 : i64} {
  func.func @_head_fused_kernel(%arg0: i32, %arg1: memref<32x1664xbf16, #tpu.memory_space<vmem>>, %arg2: memref<1664x64xbf16, #tpu.memory_space<vmem>>, %arg3: memref<1x64xf32, #tpu.memory_space<vmem>>, %arg4: memref<64x128xbf16, #tpu.memory_space<vmem>>, %arg5: memref<1x128xf32, #tpu.memory_space<vmem>>, %arg6: memref<32x128xf32, #tpu.memory_space<vmem>>) attributes {dimension_semantics = [#tpu.dimension_semantics<arbitrary>], iteration_bounds = array<i64: 1>, scalar_prefetch = 0 : i64, scratch_operands = 0 : i64, tpu.core_type = #tpu.core_type<tc>, window_params = [{pipeline_mode = #tpu.pipeline_mode<synchronous>, transform_indices = @transform_0, window_bounds = array<i64: 32, 1664>}, {pipeline_mode = #tpu.pipeline_mode<synchronous>, transform_indices = @transform_1, window_bounds = array<i64: 1664, 64>}, {pipeline_mode = #tpu.pipeline_mode<synchronous>, transform_indices = @transform_2, window_bounds = array<i64: 1, 64>}, {pipeline_mode = #tpu.pipeline_mode<synchronous>, transform_indices = @transform_3, window_bounds = array<i64: 64, 128>}, {pipeline_mode = #tpu.pipeline_mode<synchronous>, transform_indices = @transform_4, window_bounds = array<i64: 1, 128>}, {pipeline_mode = #tpu.pipeline_mode<synchronous>, transform_indices = @transform_5, window_bounds = array<i64: 32, 128>}]} {
    %c0 = arith.constant 0 : index
    %c0_0 = arith.constant 0 : index
    %0 = vector.load %arg1[%c0, %c0_0] : memref<32x1664xbf16, #tpu.memory_space<vmem>>, vector<32x1664xbf16>
    %c0_1 = arith.constant 0 : index
    %c0_2 = arith.constant 0 : index
    %1 = vector.load %arg2[%c0_1, %c0_2] : memref<1664x64xbf16, #tpu.memory_space<vmem>>, vector<1664x64xbf16>
    %cst = arith.constant dense<0.000000e+00> : vector<32x64xf32>
    %2 = tpu.matmul %0, %1, %cst {dimension_numbers = #tpu.dot_dimension_numbers<[1], [0], [0], [1], [0, 0, 1, 1], [], []>} : vector<32x1664xbf16>, vector<1664x64xbf16>, vector<32x64xf32> -> vector<32x64xf32>
    %c0_3 = arith.constant 0 : index
    %c0_4 = arith.constant 0 : index
    %3 = vector.load %arg3[%c0_3, %c0_4] : memref<1x64xf32, #tpu.memory_space<vmem>>, vector<1x64xf32>
    %4 = vector.broadcast %3 : vector<1x64xf32> to vector<32x64xf32>
    %5 = arith.addf %2, %4 : vector<32x64xf32>
    %cst_5 = arith.constant 0.000000e+00 : f32
    %6 = vector.broadcast %cst_5 : f32 to vector<32x64xf32>
    %7 = arith.maximumf %5, %6 : vector<32x64xf32>
    %8 = arith.truncf %7 : vector<32x64xf32> to vector<32x64xbf16>
    %c0_6 = arith.constant 0 : index
    %c0_7 = arith.constant 0 : index
    %9 = vector.load %arg4[%c0_6, %c0_7] : memref<64x128xbf16, #tpu.memory_space<vmem>>, vector<64x128xbf16>
    %cst_8 = arith.constant dense<0.000000e+00> : vector<32x128xf32>
    %10 = tpu.matmul %8, %9, %cst_8 {dimension_numbers = #tpu.dot_dimension_numbers<[1], [0], [0], [1], [0, 0, 1, 1], [], []>} : vector<32x64xbf16>, vector<64x128xbf16>, vector<32x128xf32> -> vector<32x128xf32>
    %c0_9 = arith.constant 0 : index
    %c0_10 = arith.constant 0 : index
    %11 = vector.load %arg5[%c0_9, %c0_10] : memref<1x128xf32, #tpu.memory_space<vmem>>, vector<1x128xf32>
    %12 = vector.broadcast %11 : vector<1x128xf32> to vector<32x128xf32>
    %13 = arith.addf %10, %12 : vector<32x128xf32>
    %14 = tpu.iota {dimensions = array<i32: 1>} : vector<32x128xi32>
    %c20_i32 = arith.constant 20 : i32
    %15 = vector.broadcast %c20_i32 : i32 to vector<32x128xi32>
    %16 = arith.cmpi sge, %14, %15 : vector<32x128xi32>
    %c25_i32 = arith.constant 25 : i32
    %17 = vector.broadcast %c25_i32 : i32 to vector<32x128xi32>
    %18 = arith.cmpi slt, %14, %17 : vector<32x128xi32>
    %19 = arith.andi %16, %18 : vector<32x128xi1>
    %cst_11 = arith.constant -1.000000e+30 : f32
    %20 = vector.broadcast %cst_11 : f32 to vector<32x128xf32>
    %21 = arith.select %19, %13, %20 : vector<32x128xi1>, vector<32x128xf32>
    %cst_12 = arith.constant dense<0xFF800000> : vector<32xf32>
    %22 = vector.multi_reduction <maximumf>, %21, %cst_12 [1] : vector<32x128xf32> to vector<32xf32>
    %23 = vector.shape_cast %22 : vector<32xf32> to vector<32x1xf32>
    %24 = vector.broadcast %23 : vector<32x1xf32> to vector<32x128xf32>
    %25 = arith.subf %21, %24 : vector<32x128xf32>
    %26 = math.exp %25 : vector<32x128xf32>
    %cst_13 = arith.constant 0.000000e+00 : f32
    %27 = vector.broadcast %cst_13 : f32 to vector<32x128xf32>
    %28 = arith.select %19, %26, %27 : vector<32x128xi1>, vector<32x128xf32>
    %cst_14 = arith.constant dense<0.000000e+00> : vector<32xf32>
    %29 = vector.multi_reduction <add>, %28, %cst_14 [1] : vector<32x128xf32> to vector<32xf32>
    %30 = vector.shape_cast %29 : vector<32xf32> to vector<32x1xf32>
    %31 = vector.broadcast %30 : vector<32x1xf32> to vector<32x128xf32>
    %32 = arith.divf %28, %31 : vector<32x128xf32>
    %33 = arith.select %19, %32, %13 : vector<32x128xi1>, vector<32x128xf32>
    %c0_15 = arith.constant 0 : index
    %c0_16 = arith.constant 0 : index
    %34 = vector.load %arg6[%c0_15, %c0_16] : memref<32x128xf32, #tpu.memory_space<vmem>>, vector<32x128xf32>
    tpu.vector_store %arg6[%c0_15, %c0_16], %33 {strides = array<i32>} : memref<32x128xf32, #tpu.memory_space<vmem>>, vector<32x128xf32>,
    return
  }
  func.func @transform_0(%arg0: i32) -> (i32, i32) {
    %c0_i32 = arith.constant 0 : i32
    %c0_i32_0 = arith.constant 0 : i32
    %c0_i32_1 = arith.constant 0 : i32
    return %c0_i32, %c0_i32_0 : i32, i32
  }
  func.func @transform_1(%arg0: i32) -> (i32, i32) {
    %c0_i32 = arith.constant 0 : i32
    %c0_i32_0 = arith.constant 0 : i32
    %c0_i32_1 = arith.constant 0 : i32
    return %c0_i32, %c0_i32_0 : i32, i32
  }
  func.func @transform_2(%arg0: i32) -> (i32, i32) {
    %c0_i32 = arith.constant 0 : i32
    %c0_i32_0 = arith.constant 0 : i32
    %c0_i32_1 = arith.constant 0 : i32
    return %c0_i32, %c0_i32_0 : i32, i32
  }
  func.func @transform_3(%arg0: i32) -> (i32, i32) {
    %c0_i32 = arith.constant 0 : i32
    %c0_i32_0 = arith.constant 0 : i32
    %c0_i32_1 = arith.constant 0 : i32
    return %c0_i32, %c0_i32_0 : i32, i32
  }
  func.func @transform_4(%arg0: i32) -> (i32, i32) {
    %c0_i32 = arith.constant 0 : i32
    %c0_i32_0 = arith.constant 0 : i32
    %c0_i32_1 = arith.constant 0 : i32
    return %c0_i32, %c0_i32_0 : i32, i32
  }
  func.func @transform_5(%arg0: i32) -> (i32, i32) {
    %c0_i32 = arith.constant 0 : i32
    %c0_i32_0 = arith.constant 0 : i32
    %c0_i32_1 = arith.constant 0 : i32
    return %c0_i32, %c0_i32_0 : i32, i32
  }
}

</mosaic_0001>

<bundles_post_ra>
// kernel: faster_rcnn_forward.4
= control target key start
LH: loop header
LB: loop body
LE: loop exit
PB: predicated region body
PF: predicated region fallthrough
CT: control target
= control target key end

     0   :  { %s1257_s12 = smov 0   ;;  %s1259_s13 = smov 0   ;;  %s1394_s0 = inlined_call_operand.vmem [shape: bf16[512,128], index: 0, kind: input, shape index: {}]   ;;  %s1395_s1 = inlined_call_operand.vmem [shape: bf16[128,128], index: 1, kind: input, shape index: {}]   ;;  %s1396_s2 = inlined_call_operand.vmem [shape: f32[1,128], index: 2, kind: input, shape index: {}]   ;;  %s1397_s3 = inlined_call_operand.vmem [shape: bf16[512,128], index: 3, kind: output, shape index: {}]  }
   0x1   :  { %s1261_s14 = smov 0  }
   0x2 LB: > { %s25_s15 = sadd.s32 1, %s1231_s13  ;;  %p886_p0 = scmp.ge.s32.totalorder %s1235_s14, 1  ;;  %s1235_s14 = sphi %s1261_s14, %s13_s14   ;;  %s1231_s13 = sphi %s1259_s13, %s1399_s13   ;;  %s1227_s12 = sphi %s1257_s12, %s1398_s12  }
   0x3   : > { %p27_p1 = scmp.ge.s32.totalorder %s25_s15, 2  ;;  %p169_p2 = scmp.lt.s32.totalorder %s1235_s14, 3 }
   0x5   : > { %s1401_s15 = smov (%p27_p1, %s25_s15), 0  ;;  %p170_p3 = pnand %p886_p0, %p169_p2 }
   0x6   : > { %v1189_v0 = vld [vmem:[%s1395_s1] sm:$0xff] (!%p170_p3)   ;;  %s887_s18 = sshll.u32 (!%p170_p3), %s1227_s12, 5  ;;  %v1190_v1 = vld [vmem:[%s1395_s1 + $0x8] sm:$0xff] (!%p170_p3)   ;;  %v1191_v2 = vld [vmem:[%s1395_s1 + $0x10] sm:$0xff] (!%p170_p3)  }
   0x7   : > { %173 = sbr.rel (%p170_p3) target bundleno = 285 (0x11d), region = 32  ;;  %p204_p4 = scmp.lt.s32.totalorder (!%p170_p3), %s887_s18, 63  ;;  %1101 = vmatprep.subr.bf16.mxu0 (!%p170_p3), %v1189_v0  ;;  %1149 = vmatprep.subr.bf16.mxu1 (!%p170_p3), %v1189_v0  ;;  %v1192_v3 = vld [vmem:[%s1395_s1 + $0x18] sm:$0xff] (!%p170_p3)   ;;  %v1193_v6 = vld [vmem:[%s1395_s1 + $0x20] sm:$0xff] (!%p170_p3)   ;;  %v1194_v7 = vld [vmem:[%s1395_s1 + $0x28] sm:$0xff] (!%p170_p3)  }
   0x8   : > { %1102 = vmatpush3.bf16.msra.mxu0 (!%p170_p3), %v1189_v0  ;;  %1157 = vmatpush3.bf16.msra.mxu1 (!%p170_p3), %v1189_v0  ;;  %v1195_v8 = vld [vmem:[%s1395_s1 + $0x30] sm:$0xff] (!%p170_p3)   ;;  %v1196_v9 = vld [vmem:[%s1395_s1 + $0x38] sm:$0xff] (!%p170_p3)   ;;  %v1328_v24 = vld [vmem:[%s1396_s2] ss:$0 sm:$0xff] (!%p170_p3) }
   0x9   : > { %1103 = vmatprep.subr.bf16.mxu0 (!%p170_p3), %v1190_v1  ;;  %1150 = vmatprep.subr.bf16.mxu1 (!%p170_p3), %v1190_v1 }
   0xc   : > { %1104 = vmatpush3.bf16.msra.mxu0 (!%p170_p3), %v1190_v1  ;;  %1158 = vmatpush3.bf16.msra.mxu1 (!%p170_p3), %v1190_v1 }
   0xd   : > { %1105 = vmatprep.subr.bf16.mxu0 (!%p170_p3), %v1191_v2  ;;  %1151 = vmatprep.subr.bf16.mxu1 (!%p170_p3), %v1191_v2 }
   0xe   : > { %s1403_s18 = smov (!%p204_p4, %s887_s18), 63 }
   0xf   : > { %s888_s23 = sshll.u32 %s1403_s18, 2 }
  0x10   : > { %s1292_s26 = scalar_lea.vmem %s1394_s0, %s888_s23  ;;  %1106 = vmatpush3.bf16.msra.mxu0 %v1191_v2  ;;  %1159 = vmatpush3.bf16.msra.mxu1 %v1191_v2  ;;  %s1343_s17 = scalar_lea.vmem %s1397_s3, %s888_s23 }
  0x11   : > { %v1197_v4 = vld [vmem:[%s1292_s26] sm:$0xff]   ;;  %1107 = vmatprep.subr.bf16.mxu0 %v1192_v3  ;;  %1152 = vmatprep.subr.bf16.mxu1 %v1192_v3  ;;  %v1199_v10 = vld [vmem:[%s1292_s26 + $0x8] sm:$0xff]   ;;  %v1201_v12 = vld [vmem:[%s1292_s26 + $0x10] sm:$0xff]  }
  0x12   : > { %v1198_v5 = vld [vmem:[%s1292_s26 + $0x40] sm:$0xff]   ;;  %1117 = vmatprep.mubr.bf16.mxu0 %v1197_v4  ;;  %v1200_v11 = vld [vmem:[%s1292_s26 + $0x48] sm:$0xff]   ;;  %v1202_v13 = vld [vmem:[%s1292_s26 + $0x50] sm:$0xff]  }
  0x13   : > { %1133 = vmatprep.mubr.bf16.mxu1 %v1198_v5  ;;  %v1203_v14 = vld [vmem:[%s1292_s26 + $0x18] sm:$0xff]   ;;  %v1205_v16 = vld [vmem:[%s1292_s26 + $0x20] sm:$0xff]   ;;  %v1207_v18 = vld [vmem:[%s1292_s26 + $0x28] sm:$0xff]  }
  0x14   : > { %1108 = vmatpush3.bf16.msra.mxu0 %v1192_v3  ;;  %1160 = vmatpush3.bf16.msra.mxu1 %v1192_v3  ;;  %v1204_v15 = vld [vmem:[%s1292_s26 + $0x58] sm:$0xff]   ;;  %v1206_v17 = vld [vmem:[%s1292_s26 + $0x60] sm:$0xff]   ;;  %v1208_v19 = vld [vmem:[%s1292_s26 + $0x68] sm:$0xff]  }
  0x15   : > { %1109 = vmatprep.subr.bf16.mxu0 %v1193_v6  ;;  %1153 = vmatprep.subr.bf16.mxu1 %v1193_v6  ;;  %v1209_v20 = vld [vmem:[%s1292_s26 + $0x30] sm:$0xff]   ;;  %v1211_v22 = vld [vmem:[%s1292_s26 + $0x38] sm:$0xff]  }
  0x16   : > { %v1210_v21 = vld [vmem:[%s1292_s26 + $0x70] sm:$0xff]   ;;  %v1212_v23 = vld [vmem:[%s1292_s26 + $0x78] sm:$0xff]  }
  0x18   : > { %1110 = vmatpush3.bf16.msra.mxu0 %v1193_v6  ;;  %1161 = vmatpush3.bf16.msra.mxu1 %v1193_v6 }
  0x19   : > { %1111 = vmatprep.subr.bf16.mxu0 %v1194_v7  ;;  %1154 = vmatprep.subr.bf16.mxu1 %v1194_v7 }
  0x1c   : > { %1112 = vmatpush3.bf16.msra.mxu0 %v1194_v7  ;;  %1162 = vmatpush3.bf16.msra.mxu1 %v1194_v7 }
  0x1d   : > { %1113 = vmatprep.subr.bf16.mxu0 %v1195_v8  ;;  %1155 = vmatprep.subr.bf16.mxu1 %v1195_v8 }
  0x20   : > { %1114 = vmatpush3.bf16.msra.mxu0 %v1195_v8  ;;  %1163 = vmatpush3.bf16.msra.mxu1 %v1195_v8 }
  0x21   : > { %1115 = vmatprep.subr.bf16.mxu0 %v1196_v9  ;;  %1156 = vmatprep.subr.bf16.mxu1 %v1196_v9 }
  0x24   : > { %1116 = vmatpush3.bf16.msra.mxu0 %v1196_v9  ;;  %1164 = vmatpush3.bf16.msra.mxu1 %v1196_v9 }
  0x27   : > { %1118 = vmatmul.mubr.bf16.vlgmr.msra.gmra.mrb[0].mxu0 %v1199_v10  ;;  %1134 = vmatmul.mubr.bf16.vlgmr.msra.gmra.mrb[0].mxu1 %v1200_v11 }
  0x28   : > { %1121 = vmatprep.mubr.bf16.mxu0 %v1201_v12  ;;  %1137 = vmatprep.mubr.bf16.mxu1 %v1202_v13 }
  0x2f   : > { %1122 = vmatmul.mubr.bf16.gmra.mrb[4].mxu0 %v1203_v14  ;;  %1138 = vmatmul.mubr.bf16.gmra.mrb[4].mxu1 %v1204_v15 }
  0x30   : > { %1125 = vmatprep.mubr.bf16.mxu0 %v1205_v16  ;;  %1141 = vmatprep.mubr.bf16.mxu1 %v1206_v17 }
  0x37   : > { %1126 = vmatmul.mubr.bf16.gmra.mrb[8].mxu0 %v1207_v18  ;;  %1142 = vmatmul.mubr.bf16.gmra.mrb[8].mxu1 %v1208_v19 }
  0x38   : > { %1129 = vmatprep.mubr.bf16.mxu0 %v1209_v20  ;;  %1145 = vmatprep.mubr.bf16.mxu1 %v1210_v21 }
  0x3f   : > { %1130 = vmatmul.mubr.bf16.gmra.mrb[12].mxu0 %v1211_v22  ;;  %1146 = vmatmul.mubr.bf16.gmra.mrb[12].mxu1 %v1212_v23 }
  0xfa   : > { %v1119_v25 = vpop.f32.mrb[0].mxu0  ;;  %v1135_v26 = vpop.f32.mrb[0].mxu1 }
  0xfb   : > { %v468_v27 = vadd.f32 %v1119_v25, %v1328_v24  ;;  %v532_v28 = vadd.f32 %v1135_v26, %v1328_v24  ;;  %v459_v29 = vpop.f32.mrb[1].mxu0  ;;  %v523_v30 = vpop.f32.mrb[1].mxu1 }
  0xfc   : > { %v460_v31 = vadd.f32 %v1328_v24, %v459_v29  ;;  %v524_v32 = vadd.f32 %v1328_v24, %v523_v30  ;;  %v1120_v33 = vpop.f32.mrb[2].mxu0  ;;  %v1136_v34 = vpop.f32.mrb[2].mxu1 }
  0xfd   : > { %v471_v35 = vadd.f32 %v1120_v33, %v1328_v24  ;;  %v535_v36 = vadd.f32 %v1136_v34, %v1328_v24  ;;  %v462_v37 = vpop.f32.mrb[3].mxu0  ;;  %v526_v38 = vpop.f32.mrb[3].mxu1  ;;  %v588_v41 = vmax.f32 %v468_v27, 0.0  ;;  %v604_v42 = vmax.f32 %v532_v28, 0.0 }
  0xfe   : > { %v463_v39 = vadd.f32 %v1328_v24, %v462_v37  ;;  %v527_v40 = vadd.f32 %v1328_v24, %v526_v38  ;;  %v586_v45 = vmax.f32 %v460_v31, 0.0  ;;  %v602_v46 = vmax.f32 %v524_v32, 0.0 }
  0xff   : > { %v589_v43 = vmax.f32 %v471_v35, 0.0  ;;  %v605_v44 = vmax.f32 %v535_v36, 0.0 }
 0x100   : > { %v587_v47 = vmax.f32 %v463_v39, 0.0  ;;  %v603_v48 = vmax.f32 %v527_v40, 0.0 }
 0x101   : > { %v990_v49 = vpack.c.bf16 %v589_v43, %v588_v41  ;;  %v1030_v50 = vpack.c.bf16 %v605_v44, %v604_v42 }
 0x102   : > { %v985_v51 = vpack.c.bf16 %v587_v47, %v586_v45  ;;  %v1025_v52 = vpack.c.bf16 %v603_v48, %v602_v46  ;;  %v1123_v53 = vpop.f32.mrb[4].mxu0  ;;  %v1139_v54 = vpop.f32.mrb[4].mxu1 }
 0x103   : > { %1062 = vst [vmem:[%s1343_s17 + $0x8] sm:$0xff] %v990_v49   ;;  %1070 = vst [vmem:[%s1343_s17 + $0x48] sm:$0xff] %v1030_v50   ;;  %v484_v55 = vadd.f32 %v1123_v53, %v1328_v24  ;;  %v548_v56 = vadd.f32 %v1139_v54, %v1328_v24  ;;  %v475_v57 = vpop.f32.mrb[5].mxu0  ;;  %v539_v58 = vpop.f32.mrb[5].mxu1 }
 0x104   : > { %986 = vst [vmem:[%s1343_s17] sm:$0xff] %v985_v51   ;;  %1069 = vst [vmem:[%s1343_s17 + $0x40] sm:$0xff] %v1025_v52   ;;  %v476_v59 = vadd.f32 %v1328_v24, %v475_v57  ;;  %v540_v60 = vadd.f32 %v1328_v24, %v539_v58  ;;  %v1124_v61 = vpop.f32.mrb[6].mxu0  ;;  %v1140_v62 = vpop.f32.mrb[6].mxu1 }
 0x105   : > { %v487_v63 = vadd.f32 %v1124_v61, %v1328_v24  ;;  %v551_v0 = vadd.f32 %v1140_v62, %v1328_v24  ;;  %v478_v1 = vpop.f32.mrb[7].mxu0  ;;  %v542_v2 = vpop.f32.mrb[7].mxu1  ;;  %v592_v5 = vmax.f32 %v484_v55, 0.0  ;;  %v608_v6 = vmax.f32 %v548_v56, 0.0 }
 0x106   : > { %v479_v3 = vadd.f32 %v1328_v24, %v478_v1  ;;  %v543_v4 = vadd.f32 %v1328_v24, %v542_v2  ;;  %v590_v9 = vmax.f32 %v476_v59, 0.0  ;;  %v606_v10 = vmax.f32 %v540_v60, 0.0 }
 0x107   : > { %v593_v7 = vmax.f32 %v487_v63, 0.0  ;;  %v609_v8 = vmax.f32 %v551_v0, 0.0 }
 0x108   : > { %v591_v11 = vmax.f32 %v479_v3, 0.0  ;;  %v607_v12 = vmax.f32 %v543_v4, 0.0 }
 0x109   : > { %v1000_v13 = vpack.c.bf16 %v593_v7, %v592_v5  ;;  %v1040_v14 = vpack.c.bf16 %v609_v8, %v608_v6 }
 0x10a   : > { %v995_v15 = vpack.c.bf16 %v591_v11, %v590_v9  ;;  %v1035_v16 = vpack.c.bf16 %v607_v12, %v606_v10  ;;  %v1127_v17 = vpop.f32.mrb[8].mxu0  ;;  %v1143_v18 = vpop.f32.mrb[8].mxu1 }
 0x10b   : > { %1064 = vst [vmem:[%s1343_s17 + $0x18] sm:$0xff] %v1000_v13   ;;  %1072 = vst [vmem:[%s1343_s17 + $0x58] sm:$0xff] %v1040_v14   ;;  %v500_v19 = vadd.f32 %v1127_v17, %v1328_v24  ;;  %v564_v20 = vadd.f32 %v1143_v18, %v1328_v24  ;;  %v491_v21 = vpop.f32.mrb[9].mxu0  ;;  %v555_v22 = vpop.f32.mrb[9].mxu1 }
 0x10c   : > { %1063 = vst [vmem:[%s1343_s17 + $0x10] sm:$0xff] %v995_v15   ;;  %1071 = vst [vmem:[%s1343_s17 + $0x50] sm:$0xff] %v1035_v16   ;;  %v492_v23 = vadd.f32 %v1328_v24, %v491_v21  ;;  %v556_v25 = vadd.f32 %v1328_v24, %v555_v22  ;;  %v1128_v26 = vpop.f32.mrb[10].mxu0  ;;  %v1144_v27 = vpop.f32.mrb[10].mxu1 }
 0x10d   : > { %v503_v28 = vadd.f32 %v1128_v26, %v1328_v24  ;;  %v567_v29 = vadd.f32 %v1144_v27, %v1328_v24  ;;  %v494_v30 = vpop.f32.mrb[11].mxu0  ;;  %v558_v31 = vpop.f32.mrb[11].mxu1  ;;  %v596_v34 = vmax.f32 %v500_v19, 0.0  ;;  %v612_v35 = vmax.f32 %v564_v20, 0.0 }
 0x10e   : > { %v495_v32 = vadd.f32 %v1328_v24, %v494_v30  ;;  %v559_v33 = vadd.f32 %v1328_v24, %v558_v31  ;;  %v594_v38 = vmax.f32 %v492_v23, 0.0  ;;  %v610_v39 = vmax.f32 %v556_v25, 0.0 }
 0x10f   : > { %v597_v36 = vmax.f32 %v503_v28, 0.0  ;;  %v613_v37 = vmax.f32 %v567_v29, 0.0 }
 0x110   : > { %v595_v40 = vmax.f32 %v495_v32, 0.0  ;;  %v611_v41 = vmax.f32 %v559_v33, 0.0 }
 0x111   : > { %v1010_v42 = vpack.c.bf16 %v597_v36, %v596_v34  ;;  %v1050_v43 = vpack.c.bf16 %v613_v37, %v612_v35 }
 0x112   : > { %v1005_v44 = vpack.c.bf16 %v595_v40, %v594_v38  ;;  %v1045_v45 = vpack.c.bf16 %v611_v41, %v610_v39  ;;  %v1131_v46 = vpop.f32.mrb[12].mxu0  ;;  %v1147_v47 = vpop.f32.mrb[12].mxu1 }
 0x113   : > { %1066 = vst [vmem:[%s1343_s17 + $0x28] sm:$0xff] %v1010_v42   ;;  %1074 = vst [vmem:[%s1343_s17 + $0x68] sm:$0xff] %v1050_v43   ;;  %v516_v48 = vadd.f32 %v1131_v46, %v1328_v24  ;;  %v580_v49 = vadd.f32 %v1147_v47, %v1328_v24  ;;  %v507_v50 = vpop.f32.mrb[13].mxu0  ;;  %v571_v51 = vpop.f32.mrb[13].mxu1 }
 0x114   : > { %1065 = vst [vmem:[%s1343_s17 + $0x20] sm:$0xff] %v1005_v44   ;;  %1073 = vst [vmem:[%s1343_s17 + $0x60] sm:$0xff] %v1045_v45   ;;  %v508_v52 = vadd.f32 %v1328_v24, %v507_v50  ;;  %v572_v53 = vadd.f32 %v1328_v24, %v571_v51  ;;  %v1132_v54 = vpop.f32.mrb[14].mxu0  ;;  %v1148_v55 = vpop.f32.mrb[14].mxu1 }
 0x115   : > { %v519_v56 = vadd.f32 %v1132_v54, %v1328_v24  ;;  %v583_v57 = vadd.f32 %v1148_v55, %v1328_v24  ;;  %v510_v58 = vpop.f32.mrb[15].mxu0  ;;  %v574_v59 = vpop.f32.mrb[15].mxu1  ;;  %v600_v62 = vmax.f32 %v516_v48, 0.0  ;;  %v616_v63 = vmax.f32 %v580_v49, 0.0 }
 0x116   : > { %v511_v60 = vadd.f32 %v1328_v24, %v510_v58  ;;  %v575_v61 = vadd.f32 %v1328_v24, %v574_v59  ;;  %v598_v2 = vmax.f32 %v508_v52, 0.0  ;;  %v614_v3 = vmax.f32 %v572_v53, 0.0 }
 0x117   : > { %v601_v0 = vmax.f32 %v519_v56, 0.0  ;;  %v617_v1 = vmax.f32 %v583_v57, 0.0 }
 0x118   : > { %v599_v4 = vmax.f32 %v511_v60, 0.0  ;;  %v615_v5 = vmax.f32 %v575_v61, 0.0 }
 0x119   : > { %v1020_v6 = vpack.c.bf16 %v601_v0, %v600_v62  ;;  %v1060_v7 = vpack.c.bf16 %v617_v1, %v616_v63 }
 0x11a   : > { %v1015_v8 = vpack.c.bf16 %v599_v4, %v598_v2  ;;  %v1055_v9 = vpack.c.bf16 %v615_v5, %v614_v3 }
 0x11b   : > { %1068 = vst [vmem:[%s1343_s17 + $0x38] sm:$0xff] %v1020_v6   ;;  %1076 = vst [vmem:[%s1343_s17 + $0x78] sm:$0xff] %v1060_v7  }
 0x11c   : > { %1067 = vst [vmem:[%s1343_s17 + $0x30] sm:$0xff] %v1015_v8   ;;  %1075 = vst [vmem:[%s1343_s17 + $0x70] sm:$0xff] %v1055_v9  }
 0x11d PF: > { %s13_s14 = sadd.s32 1, %s1235_s14   ;;  %s1398_s12 = smov %s1231_s13 }
 0x11e   : > { %p10_p5 = scmp.ge.s32.totalorder %s13_s14, 4   ;;  %s1399_s13 = smov %s1401_s15 }
 0x120   :  { %12 = sbr.rel (!%p10_p5) target bundleno = 2 (0x2), region = 68 }

// kernel: faster_rcnn_forward.5
= control target key start
LH: loop header
LB: loop body
LE: loop exit
PB: predicated region body
PF: predicated region fallthrough
CT: control target
= control target key end

     0   :  { %10 = vsyncpa [#allocation3], 0  ;;  %s2748_s0 = inlined_call_operand.vmem [shape: bf16[512,384], index: 0, kind: input, shape index: {}]   ;;  %s2749_s1 = inlined_call_operand.vmem [shape: bf16[384,32], index: 1, kind: input, shape index: {}]   ;;  %s2750_s2 = inlined_call_operand.hbm [shape: f32[1,32], index: 2, kind: input, shape index: {}]   ;;  %s2751_s3 = inlined_call_operand.hbm [shape: bf16[32,256], index: 3, kind: input, shape index: {}]   ;;  %s2752_s4 = inlined_call_operand.hbm [shape: f32[1,256], index: 4, kind: input, shape index: {}]   ;;  %s2753_s5 = inlined_call_operand.vmem [shape: f32[512,256], index: 5, kind: output, shape index: {}]  }
   0x1   :  { %11 = vsyncpa [#allocation5], 0  ;;  %s2179_s18 = smov 0  }
   0x2 LB: > { %s2143_s19 = smov [#allocation4]   ;;  %s1594_s21 = sadd.s32 4294967295, %s2141_s18   ;;  %s2141_s18 = sphi %s2179_s18, %s17_s18  }
   0x3   : > { %s184_s20 = sshll.u32 %s2143_s19, 4  ;;  %p1596_p0 = scmp.ge.s32.totalorder %s2141_s18, 1  ;;  %s2197_s20 = int_to_ptr.vmem [resolvable:$true] %s184_s20 }
   0x4   : > { %p158_p1 = scmp.lt.s32.totalorder %s2141_s18, 3  ;;  %p2189_p2 = scmp.eq.s32.totalorder %s1594_s21, 0 }
   0x5   : > { %s2144_s24 = smov [#allocation2]   ;;  %s2145_s27 = smov [#allocation6]  }
   0x6   : > { %p2193_p3 = pnand %p1596_p0, %p158_p1  ;;  %s174_s25 = sshll.u32 %s2144_s24, 4  ;;  %s2207_s25 = int_to_ptr.vmem [resolvable:$true] %s174_s25 }
   0x7   : > { %s198_s28 = sshll.u32 %s2145_s27, 4  ;;  %s2043_s6 = scalar_lea.hbm %s2751_s3, 512  ;;  %s2209_s28 = int_to_ptr.vmem [resolvable:$true] %s198_s28 }
   0x8   : > { %p1919_p4 = pneg %p2193_p3  ;;  %p2044_p6 = scmp.ne.s32.totalorder %s2751_s3, %s2043_s6 }
   0x9   : > { %p2050_p10 = scmp.lt.u32.totalorder %s2043_s6, %s2751_s3 }
   0xa   : > { %p2203_p5 = pnand %p2189_p2, %p1919_p4 }
   0xc   : > { %p2219_p7 = pneg %p2203_p5 }
   0xe   : > { %p2046_p8 = pnand %p2219_p7, %p2044_p6 }
  0x10   : > { %p2047_p9 = pneg %p2046_p8 }
  0x12   : > { %p2052_p11 = pnand %p2050_p10, %p2047_p9 }
  0x14   : > { %2055 = shalt.err (!%p2052_p11)
}
  0x15   : > { %s2056_s12 = scalar_lea.vmem %s2197_s20, 512  ;;  %p2064_p1 = scmp.lt.s32.totalorder %s2197_s20, %s2197_s20 }
  0x16   : > { %p2057_p12 = scmp.ne.s32.totalorder %s2197_s20, %s2056_s12  ;;  %p2065_p4 = scmp.lt.s32.totalorder %s2056_s12, %s2056_s12 }
  0x18   : > { %p2059_p13 = pnand %p2057_p12, %p2219_p7  ;;  %p2066_p6 = por %p2065_p4, %p2064_p1 }
  0x1a   : > { %p2060_p0 = pneg %p2059_p13 }
  0x1c   : > { %p2067_p8 = pnand %p2066_p6, %p2060_p0 }
  0x1e   : > { %2070 = shalt.err (!%p2067_p8)
}
  0x1f   : > { %s2146_s13 = smov 128   ;;  %s2147_s14 = smov 8  }
  0x20   : > { %1925 = dma.hbm_to_vmem [thread:$0]  (!%p2203_p5), %s2751_s3, 512, %s2197_s20, [#allocation5], %s2146_s13, %s2146_s13, %s2147_s14  }
  0x21   : > { %s2071_s24 = scalar_lea.hbm %s2750_s2, 16 }
  0x22   : > { %p2072_p9 = scmp.ne.s32.totalorder %s2750_s2, %s2071_s24  ;;  %p2078_p12 = scmp.lt.u32.totalorder %s2071_s24, %s2750_s2 }
  0x24   : > { %p2074_p10 = pnand %p2072_p9, %p2219_p7 }
  0x26   : > { %p2075_p11 = pneg %p2074_p10 }
  0x28   : > { %p2080_p13 = pnand %p2078_p12, %p2075_p11 }
  0x2a   : > { %2083 = shalt.err (!%p2080_p13)
}
  0x2b   : > { %s2084_s20 = scalar_lea.vmem %s2207_s25, 16  ;;  %s2091_s7 = scalar_lea.vmem %s2207_s25, 32 }
  0x2c   : > { %p2085_p0 = scmp.ne.s32.totalorder %s2207_s25, %s2084_s20  ;;  %p2092_p6 = scmp.lt.s32.totalorder %s2207_s25, %s2207_s25 }
  0x2d   : > { %p2093_p8 = scmp.lt.s32.totalorder %s2091_s7, %s2084_s20 }
  0x2e   : > { %p2087_p1 = pnand %p2085_p0, %p2219_p7 }
  0x2f   : > { %p2094_p9 = por %p2093_p8, %p2092_p6 }
  0x30   : > { %p2088_p4 = pneg %p2087_p1 }
  0x32   : > { %p2095_p10 = pnand %p2094_p9, %p2088_p4 }
  0x34   : > { %2098 = shalt.err (!%p2095_p10)
}
  0x35   : > { %1922 = dma.hbm_to_vmem [thread:$0]  (!%p2203_p5), %s2750_s2, 16, %s2207_s25, [#allocation3]  }
  0x36   : > { %s2099_s13 = scalar_lea.hbm %s2752_s4, 32 }
  0x37   : > { %p2100_p11 = scmp.ne.s32.totalorder %s2752_s4, %s2099_s13  ;;  %p2106_p0 = scmp.lt.u32.totalorder %s2099_s13, %s2752_s4 }
  0x39   : > { %p2102_p12 = pnand %p2100_p11, %p2219_p7 }
  0x3b   : > { %p2103_p13 = pneg %p2102_p12 }
  0x3d   : > { %p2108_p1 = pnand %p2106_p0, %p2103_p13 }
  0x3f   : > { %2111 = shalt.err (!%p2108_p1)
}
  0x40   : > { %s2112_s25 = scalar_lea.vmem %s2209_s28, 32  ;;  %p2120_p9 = scmp.lt.s32.totalorder %s2209_s28, %s2209_s28 }
  0x41   : > { %p2113_p4 = scmp.ne.s32.totalorder %s2209_s28, %s2112_s25  ;;  %p2121_p10 = scmp.lt.s32.totalorder %s2112_s25, %s2112_s25 }
  0x43   : > { %p2115_p6 = pnand %p2113_p4, %p2219_p7  ;;  %p2122_p11 = por %p2121_p10, %p2120_p9 }
  0x45   : > { %p2116_p8 = pneg %p2115_p6 }
  0x47   : > { %p2123_p12 = pnand %p2122_p11, %p2116_p8 }
  0x49   : > { %2126 = shalt.err (!%p2123_p12)
}
  0x4a   : > { %1928 = dma.hbm_to_vmem [thread:$0]  (!%p2203_p5), %s2752_s4, 32, %s2209_s28, [#allocation5]  }
  0x4b   : > { %221 = sbr.rel (%p2193_p3) target bundleno = 805 (0x325), region = 40 }
  0x52   : > { %2132 = dma.done.wait (%p2189_p2), [#allocation3], 16  }
  0x53   : > { %2134 = vsyncadd (%p2189_p2), [#allocation3], 4294967280 }
  0x54   : > { %2136 = dma.done.wait (%p2189_p2), [#allocation5], 544  }
  0x55   : > { %2138 = vsyncadd (%p2189_p2), [#allocation5], 4294966752  ;;  %s1605_s26 = sshll.u32 %s1594_s21, 5  ;;  %v1949_v0 = vld [vmem:[%s2749_s1 + $0x40] sm:$0xff]   ;;  %v1951_v2 = vld [vmem:[%s2749_s1 + $0x48] sm:$0xff]   ;;  %vm1199_vm0 = vcmask 261120  }
  0x56   : > { %v1950_v1 = vld [vmem:[%s2749_s1] sm:$0xff]   ;;  %1706 = vmatprep.subr.bf16.mxu0 %v1949_v0  ;;  %p260_p3 = scmp.lt.s32.totalorder %s1605_s26, 63  ;;  %v1952_v3 = vld [vmem:[%s2749_s1 + $0x8] sm:$0xff]   ;;  %v1953_v4 = vld [vmem:[%s2749_s1 + $0x50] sm:$0xff]  }
  0x57   : > { %1707 = vmatpush3.bf16.msra.mxu0 %v1950_v1  ;;  %v1954_v5 = vld [vmem:[%s2749_s1 + $0x10] sm:$0xff]   ;;  %v1955_v6 = vld [vmem:[%s2749_s1 + $0x58] sm:$0xff]   ;;  %v1957_v8 = vld [vmem:[%s2749_s1 + $0x60] sm:$0xff]  }
  0x58   : > { %1708 = vmatprep.subr.bf16.mxu0 %v1951_v2  ;;  %s2759_s26 = smov (!%p260_p3, %s1605_s26), 63  ;;  %v1956_v7 = vld [vmem:[%s2749_s1 + $0x18] sm:$0xff]   ;;  %v1958_v9 = vld [vmem:[%s2749_s1 + $0x20] sm:$0xff]   ;;  %v1959_v10 = vld [vmem:[%s2749_s1 + $0x68] sm:$0xff]  }
  0x59   : > { %s1906_s12 = smul.u32 12, %s2759_s26  ;;  %v1968_v12 = vld [vmem:[%s2749_s1 + $0x80] sm:$0xff]   ;;  %v1960_v13 = vld [vmem:[%s2749_s1 + $0x28] sm:$0xff]   ;;  %v1961_v14 = vld [vmem:[%s2749_s1 + $0x70] sm:$0xff]  }
  0x5a   : > { %1890 = vmatprep.subr.bf16.mxu1 %v1968_v12  ;;  %v1975_v15 = vld [vmem:[%s2749_s1 + $0x88] sm:$0xff]   ;;  %v1962_v16 = vld [vmem:[%s2749_s1 + $0x30] sm:$0xff]   ;;  %v1963_v17 = vld [vmem:[%s2749_s1 + $0x78] sm:$0xff]  }
  0x5b   : > { %1709 = vmatpush3.bf16.msra.mxu0 %v1952_v3  ;;  %s2332_s19 = scalar_lea.vmem %s2748_s0, %s1906_s12  ;;  %1898 = vmatpush3.bf16.msra.mxu1 %v1968_v12  ;;  %v1982_v18 = vld [vmem:[%s2749_s1 + $0x90] sm:$0xff]   ;;  %v1964_v19 = vld [vmem:[%s2749_s1 + $0x38] sm:$0xff]   ;;  %v1990_v22 = vld [vmem:[%s2749_s1 + $0xa0] sm:$0xff]  }
  0x5c   : > { %1710 = vmatprep.subr.bf16.mxu0 %v1953_v4  ;;  %v1967_v11 = vld [vmem:[%s2332_s19 + $0x4] ss:$12 sps:$4 sm:$0xff]   ;;  %1891 = vmatprep.subr.bf16.mxu1 %v1975_v15  ;;  %v1965_v20 = vld [vmem:[%s2332_s19] ss:$12 sps:$4 sm:$0xff]   ;;  %v1989_v21 = vld [vmem:[%s2749_s1 + $0x98] sm:$0xff]  }
  0x5d   : > { %825 = vmatprep.mubr.bf16.mxu0 %v1967_v11  ;;  %v1969_v23 = vld [vmem:[%s2332_s19 + $0x1c] ss:$12 sps:$4 sm:$0xff]   ;;  %v1971_v26 = vld [vmem:[%s2332_s19 + $0x18] ss:$12 sps:$4 sm:$0xff]   ;;  %v1995_v27 = vld [vmem:[%s2749_s1 + $0xb0] sm:$0xff]  }
  0x5e   : > { %v1994_v24 = vld [vmem:[%s2749_s1 + $0xa8] sm:$0xff]   ;;  %v1972_v28 = vld [vmem:[%s2332_s19 + $0x34] ss:$12 sps:$4 sm:$0xff]   ;;  %v1999_v29 = vld [vmem:[%s2749_s1 + $0xb8] sm:$0xff]  }
  0x5f   : > { %1711 = vmatpush3.bf16.msra.mxu0 %v1954_v5  ;;  %1899 = vmatpush3.bf16.msra.mxu1 %v1975_v15  ;;  %v2000_v25 = vld [vmem:[%s2332_s19 + $0xc8] ss:$12 sps:$4 sm:$0xff]   ;;  %v1974_v30 = vld [vmem:[%s2332_s19 + $0x30] ss:$12 sps:$4 sm:$0xff]   ;;  %v1976_v31 = vld [vmem:[%s2332_s19 + $0x4c] ss:$12 sps:$4 sm:$0xff]  }
  0x60   : > { %1712 = vmatprep.subr.bf16.mxu0 %v1955_v6  ;;  %1892 = vmatprep.subr.bf16.mxu1 %v1982_v18  ;;  %v2001_v32 = vld [vmem:[%s2332_s19 + $0xe0] ss:$12 sps:$4 sm:$0xff]   ;;  %v2008_v33 = vld [vmem:[%s2332_s19 + $0xf8] ss:$12 sps:$4 sm:$0xff]   ;;  %v1978_v34 = vld [vmem:[%s2332_s19 + $0x48] ss:$12 sps:$4 sm:$0xff]  }
  0x61   : > { %1874 = vmatprep.mubr.bf16.mxu1 %v2000_v25  ;;  %v1979_v35 = vld [vmem:[%s2332_s19 + $0x64] ss:$12 sps:$4 sm:$0xff]   ;;  %v2016_v37 = vld [vmem:[%s2332_s19 + $0x128] ss:$12 sps:$4 sm:$0xff]   ;;  %v1981_v38 = vld [vmem:[%s2332_s19 + $0x60] ss:$12 sps:$4 sm:$0xff]  }
  0x62   : > { %v2009_v36 = vld [vmem:[%s2332_s19 + $0x110] ss:$12 sps:$4 sm:$0xff]   ;;  %v2017_v40 = vld [vmem:[%s2332_s19 + $0x140] ss:$12 sps:$4 sm:$0xff]   ;;  %v2024_v41 = vld [vmem:[%s2332_s19 + $0x158] ss:$12 sps:$4 sm:$0xff]  }
  0x63   : > { %1713 = vmatpush3.bf16.msra.mxu0 %v1956_v7  ;;  %1900 = vmatpush3.bf16.msra.mxu1 %v1982_v18  ;;  %v1983_v39 = vld [vmem:[%s2332_s19 + $0x7c] ss:$12 sps:$4 sm:$0xff]   ;;  %v1985_v42 = vld [vmem:[%s2332_s19 + $0x78] ss:$12 sps:$4 sm:$0xff]   ;;  %v1986_v43 = vld [vmem:[%s2332_s19 + $0x94] ss:$12 sps:$4 sm:$0xff]  }
  0x64   : > { %1714 = vmatprep.subr.bf16.mxu0 %v1957_v8  ;;  %1893 = vmatprep.subr.bf16.mxu1 %v1989_v21  ;;  %v2025_v44 = vld [vmem:[%s2332_s19 + $0x170] ss:$12 sps:$4 sm:$0xff]   ;;  %v1991_v46 = vld [vmem:[%s2332_s19 + $0xac] ss:$12 sps:$4 sm:$0xff]   ;;  %v1993_v47 = vld [vmem:[%s2332_s19 + $0xa8] ss:$12 sps:$4 sm:$0xff]  }
  0x65   : > { %v1988_v45 = vld [vmem:[%s2332_s19 + $0x90] ss:$12 sps:$4 sm:$0xff]   ;;  %v1998_v49 = vld [vmem:[%s2332_s19 + $0xc0] ss:$12 sps:$4 sm:$0xff]   ;;  %v2004_v51 = vld [vmem:[%s2332_s19 + $0xd8] ss:$12 sps:$4 sm:$0xff]  }
  0x66   : > { %v1996_v48 = vld [vmem:[%s2332_s19 + $0xc4] ss:$12 sps:$4 sm:$0xff]   ;;  %v2002_v50 = vld [vmem:[%s2332_s19 + $0xdc] ss:$12 sps:$4 sm:$0xff]   ;;  %v2005_v52 = vld [vmem:[%s2332_s19 + $0xf4] ss:$12 sps:$4 sm:$0xff]  }
  0x67   : > { %1715 = vmatpush3.bf16.msra.mxu0 %v1958_v9  ;;  %1901 = vmatpush3.bf16.msra.mxu1 %v1989_v21  ;;  %v2007_v53 = vld [vmem:[%s2332_s19 + $0xf0] ss:$12 sps:$4 sm:$0xff]   ;;  %v2010_v54 = vld [vmem:[%s2332_s19 + $0x10c] ss:$12 sps:$4 sm:$0xff]   ;;  %v2012_v55 = vld [vmem:[%s2332_s19 + $0x108] ss:$12 sps:$4 sm:$0xff]  }
  0x68   : > { %1716 = vmatprep.subr.bf16.mxu0 %v1959_v10  ;;  %1894 = vmatprep.subr.bf16.mxu1 %v1990_v22  ;;  %v2013_v56 = vld [vmem:[%s2332_s19 + $0x124] ss:$12 sps:$4 sm:$0xff]   ;;  %v2015_v57 = vld [vmem:[%s2332_s19 + $0x120] ss:$12 sps:$4 sm:$0xff]   ;;  %v2018_v58 = vld [vmem:[%s2332_s19 + $0x13c] ss:$12 sps:$4 sm:$0xff]  }
  0x69   : > { %v2020_v59 = vld [vmem:[%s2332_s19 + $0x138] ss:$12 sps:$4 sm:$0xff]   ;;  %v2021_v60 = vld [vmem:[%s2332_s19 + $0x154] ss:$12 sps:$4 sm:$0xff]   ;;  %v2023_v61 = vld [vmem:[%s2332_s19 + $0x150] ss:$12 sps:$4 sm:$0xff]  }
  0x6a   : > { %v2026_v62 = vld [vmem:[%s2332_s19 + $0x16c] ss:$12 sps:$4 sm:$0xff]   ;;  %v2028_v63 = vld [vmem:[%s2332_s19 + $0x168] ss:$12 sps:$4 sm:$0xff]   ;;  %v2032_v3 = vld [vmem:[%s2332_s19 + $0x50] ss:$12 sps:$4 sm:$0xff]  }
  0x6b   : > { %1717 = vmatpush3.bf16.msra.mxu0 %v1960_v13  ;;  %1902 = vmatpush3.bf16.msra.mxu1 %v1990_v22  ;;  %v2029_v0 = vld [vmem:[%s2332_s19 + $0x8] ss:$12 sps:$4 sm:$0xff]   ;;  %v2030_v1 = vld [vmem:[%s2332_s19 + $0x20] ss:$12 sps:$4 sm:$0xff]   ;;  %v2031_v2 = vld [vmem:[%s2332_s19 + $0x38] ss:$12 sps:$4 sm:$0xff]  }
  0x6c   : > { %1718 = vmatprep.subr.bf16.mxu0 %v1961_v14  ;;  %1895 = vmatprep.subr.bf16.mxu1 %v1994_v24  ;;  %v2033_v4 = vld [vmem:[%s2332_s19 + $0x68] ss:$12 sps:$4 sm:$0xff]   ;;  %v2034_v5 = vld [vmem:[%s2332_s19 + $0x80] ss:$12 sps:$4 sm:$0xff]   ;;  %v2035_v6 = vld [vmem:[%s2332_s19 + $0x98] ss:$12 sps:$4 sm:$0xff]  }
  0x6d   : > { %v2036_v7 = vld [vmem:[%s2332_s19 + $0xb0] ss:$12 sps:$4 sm:$0xff]   ;;  %v2037_v8 = vld [vmem:[#allocation4] ss:$8 sps:$4 sm:$0xff]   ;;  %s1705_s19 = sshll.u32 %s2759_s26, 4 }
  0x6e   : > { %v2039_v9 = vld [vmem:[#allocation4 + $0x4] ss:$8 sps:$4 sm:$0xff]   ;;  %v2040_v11 = vld [vmem:[#allocation4 + $0x10] ss:$8 sps:$4 sm:$0xff]   ;;  %s2615_s20 = scalar_lea.vmem %s2753_s5, %s1705_s19 }
  0x6f   : > { %1719 = vmatpush3.bf16.msra.mxu0 %v1962_v16  ;;  %1903 = vmatpush3.bf16.msra.mxu1 %v1994_v24 }
  0x70   : > { %1720 = vmatprep.subr.bf16.mxu0 %v1963_v17  ;;  %1896 = vmatprep.subr.bf16.mxu1 %v1995_v27 }
  0x73   : > { %1721 = vmatpush3.bf16.msra.mxu0 %v1964_v19  ;;  %1904 = vmatpush3.bf16.msra.mxu1 %v1995_v27 }
  0x74   : > { %1842 = vmatprep.subr.bf16.mxu0 %v1968_v12  ;;  %1897 = vmatprep.subr.bf16.mxu1 %v1999_v29 }
  0x76   : > { %826 = vmatmul.mubr.bf16.vlgmr.msra.gmra.mrb[0].mxu0 %v1965_v20  ;;  %v2148_v20 = vmov 0  }
  0x77   : > { %1843 = vmatpush3.bf16.msra.mxu0 %v1968_v12  ;;  %833 = vmatprep.mubr.bf16.mxu0 %v1969_v23  ;;  %v2042_v12 = vld [vmem:[#allocation4 + $0x14] ss:$8 sps:$4 sm:$0xff]  }
  0x78   : > { %1844 = vmatprep.subr.bf16.mxu0 %v1975_v15  ;;  %1905 = vmatpush3.bf16.msra.mxu1 %v1999_v29 }
  0x79   : > { %1248 = vmatprep.subr.bf16.mxu1 %v2039_v9 }
  0x7b   : > { %1845 = vmatpush3.bf16.msra.mxu0 %v1975_v15  ;;  %1875 = vmatmul.mubr.bf16.vlgmr.msra.gmra.mrb[0].mxu1 %v2001_v32 }
  0x7c   : > { %1846 = vmatprep.subr.bf16.mxu0 %v1982_v18  ;;  %1878 = vmatprep.mubr.bf16.mxu1 %v2008_v33 }
  0x7d   : > { %1249 = vmatpush1.bf16.msra.mxu1 %v2037_v8 }
  0x7e   : > { %834 = vmatmul.mubr.bf16.gmra.mrb[4].mxu0 %v1971_v26  ;;  %1250 = vmatprep.subr.bf16.mxu1 %v2042_v12 }
  0x7f   : > { %841 = vmatprep.mubr.bf16.mxu0 %v1972_v28  ;;  %1847 = vmatpush3.bf16.msra.mxu0 %v1982_v18 }
  0x80   : > { %1848 = vmatprep.subr.bf16.mxu0 %v1989_v21 }
  0x81   : > { %1251 = vmatpush1.bf16.msra.mxu1 %v2040_v11 }
  0x83   : > { %1849 = vmatpush3.bf16.msra.mxu0 %v1989_v21  ;;  %1879 = vmatmul.mubr.bf16.gmra.mrb[4].mxu1 %v2009_v36 }
  0x84   : > { %1850 = vmatprep.subr.bf16.mxu0 %v1990_v22  ;;  %1882 = vmatprep.mubr.bf16.mxu1 %v2016_v37 }
  0x86   : > { %842 = vmatmul.mubr.bf16.gmra.mrb[8].mxu0 %v1974_v30 }
  0x87   : > { %849 = vmatprep.mubr.bf16.mxu0 %v1976_v31  ;;  %1851 = vmatpush3.bf16.msra.mxu0 %v1990_v22 }
  0x88   : > { %1852 = vmatprep.subr.bf16.mxu0 %v1994_v24 }
  0x8b   : > { %1853 = vmatpush3.bf16.msra.mxu0 %v1994_v24  ;;  %1883 = vmatmul.mubr.bf16.gmra.mrb[8].mxu1 %v2017_v40 }
  0x8c   : > { %1854 = vmatprep.subr.bf16.mxu0 %v1995_v27  ;;  %1886 = vmatprep.mubr.bf16.mxu1 %v2024_v41 }
  0x8e   : > { %850 = vmatmul.mubr.bf16.gmra.mrb[12].mxu0 %v1978_v34 }
  0x8f   : > { %857 = vmatprep.mubr.bf16.mxu0 %v1979_v35  ;;  %1855 = vmatpush3.bf16.msra.mxu0 %v1995_v27 }
  0x90   : > { %1856 = vmatprep.subr.bf16.mxu0 %v1999_v29 }
  0x93   : > { %1857 = vmatpush3.bf16.msra.mxu0 %v1999_v29  ;;  %1887 = vmatmul.mubr.bf16.gmra.mrb[12].mxu1 %v2025_v44 }
  0x94   : > { %1280 = vmatprep.mubr.bf16.mxu1 %v2148_v20 }
  0x96   : > { %858 = vmatmul.mubr.bf16.gmra.mrb[16].mxu0 %v1981_v38 }
  0x97   : > { %865 = vmatprep.mubr.bf16.mxu0 %v1983_v39 }
  0x9e   : > { %866 = vmatmul.mubr.bf16.gmra.mrb[20].mxu0 %v1985_v42 }
  0x9f   : > { %873 = vmatprep.mubr.bf16.mxu0 %v1986_v43 }
  0xa6   : > { %874 = vmatmul.mubr.bf16.gmra.mrb[24].mxu0 %v1988_v45 }
  0xa7   : > { %881 = vmatprep.mubr.bf16.mxu0 %v1991_v46 }
  0xae   : > { %882 = vmatmul.mubr.bf16.gmra.mrb[28].mxu0 %v1993_v47 }
  0xaf   : > { %889 = vmatprep.mubr.bf16.mxu0 %v1996_v48 }
  0xb6   : > { %890 = vmatmul.mubr.bf16.gmra.mrb[32].mxu0 %v1998_v49 }
  0xb7   : > { %897 = vmatprep.mubr.bf16.mxu0 %v2002_v50 }
  0xbe   : > { %898 = vmatmul.mubr.bf16.gmra.mrb[36].mxu0 %v2004_v51 }
  0xbf   : > { %905 = vmatprep.mubr.bf16.mxu0 %v2005_v52 }
  0xc6   : > { %906 = vmatmul.mubr.bf16.gmra.mrb[40].mxu0 %v2007_v53 }
  0xc7   : > { %913 = vmatprep.mubr.bf16.mxu0 %v2010_v54 }
  0xce   : > { %914 = vmatmul.mubr.bf16.gmra.mrb[44].mxu0 %v2012_v55 }
  0xcf   : > { %921 = vmatprep.mubr.bf16.mxu0 %v2013_v56 }
  0xd6   : > { %922 = vmatmul.mubr.bf16.gmra.mrb[48].mxu0 %v2015_v57 }
  0xd7   : > { %929 = vmatprep.mubr.bf16.mxu0 %v2018_v58 }
  0xde   : > { %930 = vmatmul.mubr.bf16.gmra.mrb[52].mxu0 %v2020_v59 }
  0xdf   : > { %937 = vmatprep.mubr.bf16.mxu0 %v2021_v60 }
  0xe6   : > { %938 = vmatmul.mubr.bf16.gmra.mrb[56].mxu0 %v2023_v61 }
  0xe7   : > { %945 = vmatprep.mubr.bf16.mxu0 %v2026_v62 }
  0xee   : > { %946 = vmatmul.mubr.bf16.gmra.mrb[60].mxu0 %v2028_v63 }
  0xef   : > { %1858 = vmatprep.mubr.bf16.mxu0 %v2029_v0 }
  0xf6   : > { %1859 = vmatmul.mubr.bf16.vlgmr.msra.gmra.mrb[64].mxu0 %v2030_v1 }
  0xf7   : > { %1862 = vmatprep.mubr.bf16.mxu0 %v2031_v2 }
  0xfe   : > { %1863 = vmatmul.mubr.bf16.gmra.mrb[68].mxu0 %v2032_v3 }
  0xff   : > { %1866 = vmatprep.mubr.bf16.mxu0 %v2033_v4 }
 0x106   : > { %1867 = vmatmul.mubr.bf16.gmra.mrb[72].mxu0 %v2034_v5 }
 0x107   : > { %1870 = vmatprep.mubr.bf16.mxu0 %v2035_v6 }
 0x10e   : > { %1871 = vmatmul.mubr.bf16.gmra.mrb[76].mxu0 %v2036_v7 }
 0x149   : > { %v1722_v10 = vpop.f32.mrb[0].mxu0 }
 0x14a   : > { %v1723_v13 = vpop.f32.mrb[1].mxu0 }
 0x14b   : > { %v2427_v14 = vadd.f32 %v1723_v13, %v1722_v10  ;;  %v1725_v15 = vpop.f32.mrb[2].mxu0 }
 0x14c   : > { %v1726_v16 = vpop.f32.mrb[3].mxu0 }
 0x14d   : > { %v2429_v17 = vadd.f32 %v1726_v16, %v1725_v15 }
 0x14e   : > { %v2438_v29 = vpop.f32.mrb[0].mxu1 }
 0x14f   : > { %v1052_v31 = vpop.f32.mrb[1].mxu1 }
 0x150   : > { %v2442_v33 = vpop.f32.mrb[2].mxu1 }
 0x151   : > { %v1728_v18 = vpop.f32.mrb[4].mxu0  ;;  %v1055_v34 = vpop.f32.mrb[3].mxu1 }
 0x152   : > { %v1729_v19 = vpop.f32.mrb[5].mxu0 }
 0x153   : > { %v2432_v21 = vadd.f32 %v1729_v19, %v1728_v18  ;;  %v1731_v22 = vpop.f32.mrb[6].mxu0 }
 0x154   : > { %v1732_v23 = vpop.f32.mrb[7].mxu0 }
 0x155   : > { %v2434_v24 = vadd.f32 %v1732_v23, %v1731_v22  ;;  %v2488_v22 = vld [vmem:[#allocation2] ss:$0 sm:$0xff] }
 0x156   : > { %v2446_v39 = vpop.f32.mrb[4].mxu1 }
 0x157   : > { %v2448_v41 = vpop.f32.mrb[5].mxu1 }
 0x158   : > { %v2452_v43 = vpop.f32.mrb[6].mxu1 }
 0x159   : > { %v1734_v25 = vpop.f32.mrb[8].mxu0  ;;  %v2454_v44 = vpop.f32.mrb[7].mxu1 }
 0x15a   : > { %v1735_v26 = vpop.f32.mrb[9].mxu0 }
 0x15b   : > { %v2436_v27 = vadd.f32 %v1735_v26, %v1734_v25  ;;  %v1737_v28 = vpop.f32.mrb[10].mxu0 }
 0x15c   : > { %v1738_v30 = vpop.f32.mrb[11].mxu0 }
 0x15d   : > { %v2440_v32 = vadd.f32 %v1738_v30, %v1737_v28 }
 0x15e   : > { %v2458_v49 = vpop.f32.mrb[8].mxu1 }
 0x15f   : > { %v2460_v51 = vpop.f32.mrb[9].mxu1 }
 0x160   : > { %v2464_v53 = vpop.f32.mrb[10].mxu1 }
 0x161   : > { %v1740_v35 = vpop.f32.mrb[12].mxu0  ;;  %v2466_v54 = vpop.f32.mrb[11].mxu1 }
 0x162   : > { %v1741_v36 = vpop.f32.mrb[13].mxu0 }
 0x163   : > { %v2444_v37 = vadd.f32 %v1741_v36, %v1740_v35  ;;  %v1743_v38 = vpop.f32.mrb[14].mxu0 }
 0x164   : > { %v1744_v40 = vpop.f32.mrb[15].mxu0 }
 0x165   : > { %v2450_v42 = vadd.f32 %v1744_v40, %v1743_v38 }
 0x166   : > { %v2470_v59 = vpop.f32.mrb[12].mxu1 }
 0x167   : > { %v2472_v61 = vpop.f32.mrb[13].mxu1 }
 0x168   : > { %v2476_v63 = vpop.f32.mrb[14].mxu1 }
 0x169   : > { %v1746_v45 = vpop.f32.mrb[16].mxu0  ;;  %v2478_v0 = vpop.f32.mrb[15].mxu1 }
 0x16a   : > { %v1747_v46 = vpop.f32.mrb[17].mxu0 }
 0x16b   : > { %v2456_v47 = vadd.f32 %v1747_v46, %v1746_v45  ;;  %v1749_v48 = vpop.f32.mrb[18].mxu0 }
 0x16c   : > { %v1750_v50 = vpop.f32.mrb[19].mxu0 }
 0x16d   : > { %v2462_v52 = vadd.f32 %v1750_v50, %v1749_v48 }
 0x171   : > { %v1752_v55 = vpop.f32.mrb[20].mxu0 }
 0x172   : > { %v1753_v56 = vpop.f32.mrb[21].mxu0 }
 0x173   : > { %v2468_v57 = vadd.f32 %v1753_v56, %v1752_v55  ;;  %v1755_v58 = vpop.f32.mrb[22].mxu0 }
 0x174   : > { %v1756_v60 = vpop.f32.mrb[23].mxu0 }
 0x175   : > { %v2474_v62 = vadd.f32 %v1756_v60, %v1755_v58 }
 0x179   : > { %v1758_v1 = vpop.f32.mrb[24].mxu0 }
 0x17a   : > { %v1759_v2 = vpop.f32.mrb[25].mxu0 }
 0x17b   : > { %v2480_v3 = vadd.f32 %v1759_v2, %v1758_v1  ;;  %v1761_v4 = vpop.f32.mrb[26].mxu0 }
 0x17c   : > { %v1762_v5 = vpop.f32.mrb[27].mxu0 }
 0x17d   : > { %v2482_v6 = vadd.f32 %v1762_v5, %v1761_v4 }
 0x181   : > { %v1764_v7 = vpop.f32.mrb[28].mxu0 }
 0x182   : > { %v1765_v8 = vpop.f32.mrb[29].mxu0 }
 0x183   : > { %v2484_v9 = vadd.f32 %v1765_v8, %v1764_v7  ;;  %v1767_v10 = vpop.f32.mrb[30].mxu0 }
 0x184   : > { %v1768_v11 = vpop.f32.mrb[31].mxu0 }
 0x185   : > { %v2486_v12 = vadd.f32 %v1768_v11, %v1767_v10 }
 0x189   : > { %v1770_v13 = vpop.f32.mrb[32].mxu0 }
 0x18a   : > { %v1771_v15 = vpop.f32.mrb[33].mxu0 }
 0x18b   : > { %v1772_v16 = vadd.f32 %v1771_v15, %v1770_v13  ;;  %v1773_v18 = vpop.f32.mrb[34].mxu0 }
 0x18c   : > { %v1774_v19 = vpop.f32.mrb[35].mxu0 }
 0x18d   : > { %v1775_v23 = vadd.f32 %v1774_v19, %v1773_v18  ;;  %v892_v25 = vadd.f32 %v1772_v16, %v2488_v22 }
 0x18f   : > { %v1053_v26 = vadd.f32 %v1052_v31, %v892_v25  ;;  %v895_v28 = vadd.f32 %v1775_v23, %v2488_v22 }
 0x191   : > { %v1056_v30 = vadd.f32 %v1055_v34, %v895_v28  ;;  %v1776_v35 = vpop.f32.mrb[36].mxu0  ;;  %v1131_v38 = vmax.f32 %v1053_v26, 0.0 }
 0x192   : > { %v1777_v36 = vpop.f32.mrb[37].mxu0 }
 0x193   : > { %v1132_v40 = vmax.f32 %v1056_v30, 0.0  ;;  %v1778_v45 = vadd.f32 %v1777_v36, %v1776_v35  ;;  %v1779_v46 = vpop.f32.mrb[38].mxu0 }
 0x194   : > { %v1780_v48 = vpop.f32.mrb[39].mxu0 }
 0x195   : > { %v2492_v50 = vpack.c.bf16 %v1132_v40, %v1131_v38  ;;  %v900_v55 = vadd.f32 %v1778_v45, %v2488_v22  ;;  %v1781_v56 = vadd.f32 %v1780_v48, %v1779_v46 }
 0x197   : > { %v1061_v58 = vadd.f32 %v2438_v29, %v900_v55  ;;  %v903_v60 = vadd.f32 %v1781_v56, %v2488_v22 }
 0x199   : > { %v1064_v31 = vadd.f32 %v2442_v33, %v903_v60  ;;  %v1782_v1 = vpop.f32.mrb[40].mxu0  ;;  %v1133_v2 = vmax.f32 %v1061_v58, 0.0 }
 0x19a   : > { %v1783_v34 = vpop.f32.mrb[41].mxu0 }
 0x19b   : > { %v1134_v4 = vmax.f32 %v1064_v31, 0.0  ;;  %v1784_v5 = vadd.f32 %v1783_v34, %v1782_v1  ;;  %v1785_v7 = vpop.f32.mrb[42].mxu0 }
 0x19c   : > { %v1786_v8 = vpop.f32.mrb[43].mxu0 }
 0x19d   : > { %v2498_v10 = vpack.c.bf16 %v1134_v4, %v1133_v2  ;;  %v1787_v11 = vadd.f32 %v1786_v8, %v1785_v7  ;;  %v908_v13 = vadd.f32 %v1784_v5, %v2488_v22 }
 0x19f   : > { %v1069_v15 = vadd.f32 %v2448_v41, %v908_v13  ;;  %v911_v29 = vadd.f32 %v1787_v11, %v2488_v22 }
 0x1a1   : > { %v1072_v16 = vadd.f32 %v2454_v44, %v911_v29  ;;  %v1788_v18 = vpop.f32.mrb[44].mxu0  ;;  %v1135_v19 = vmax.f32 %v1069_v15, 0.0 }
 0x1a2   : > { %v1789_v33 = vpop.f32.mrb[45].mxu0 }
 0x1a3   : > { %v1136_v23 = vmax.f32 %v1072_v16, 0.0  ;;  %v1790_v25 = vadd.f32 %v1789_v33, %v1788_v18  ;;  %v1791_v26 = vpop.f32.mrb[46].mxu0 }
 0x1a4   : > { %v1792_v28 = vpop.f32.mrb[47].mxu0 }
 0x1a5   : > { %v2504_v30 = vpack.c.bf16 %v1136_v23, %v1135_v19  ;;  %v916_v35 = vadd.f32 %v1790_v25, %v2488_v22  ;;  %v1793_v36 = vadd.f32 %v1792_v28, %v1791_v26 }
 0x1a7   : > { %v1077_v38 = vadd.f32 %v2446_v39, %v916_v35  ;;  %v919_v41 = vadd.f32 %v1793_v36, %v2488_v22 }
 0x1a9   : > { %v1080_v40 = vadd.f32 %v2452_v43, %v919_v41  ;;  %v1794_v45 = vpop.f32.mrb[48].mxu0  ;;  %v1137_v46 = vmax.f32 %v1077_v38, 0.0 }
 0x1aa   : > { %v1795_v44 = vpop.f32.mrb[49].mxu0 }
 0x1ab   : > { %v1138_v48 = vmax.f32 %v1080_v40, 0.0  ;;  %v1796_v55 = vadd.f32 %v1795_v44, %v1794_v45  ;;  %v1797_v56 = vpop.f32.mrb[50].mxu0 }
 0x1ac   : > { %v1798_v58 = vpop.f32.mrb[51].mxu0 }
 0x1ad   : > { %v2510_v60 = vpack.c.bf16 %v1138_v48, %v1137_v46  ;;  %v1799_v31 = vadd.f32 %v1798_v58, %v1797_v56  ;;  %v924_v1 = vadd.f32 %v1796_v55, %v2488_v22 }
 0x1af   : > { %v1085_v34 = vadd.f32 %v2460_v51, %v924_v1  ;;  %v927_v39 = vadd.f32 %v1799_v31, %v2488_v22 }
 0x1b1   : > { %v1088_v2 = vadd.f32 %v2466_v54, %v927_v39  ;;  %v1800_v4 = vpop.f32.mrb[52].mxu0  ;;  %v1139_v5 = vmax.f32 %v1085_v34, 0.0 }
 0x1b2   : > { %v1801_v43 = vpop.f32.mrb[53].mxu0 }
 0x1b3   : > { %v1140_v7 = vmax.f32 %v1088_v2, 0.0  ;;  %v1802_v8 = vadd.f32 %v1801_v43, %v1800_v4  ;;  %v1803_v11 = vpop.f32.mrb[54].mxu0  ;;  %v836_v2 = vadd.f32 %v2432_v21, %v2488_v22  ;;  %v828_v43 = vadd.f32 %v2427_v14, %v2488_v22 }
 0x1b4   : > { %v1804_v13 = vpop.f32.mrb[55].mxu0 }
 0x1b5   : > { %v2516_v15 = vpack.c.bf16 %v1140_v7, %v1139_v5  ;;  %v932_v29 = vadd.f32 %v1802_v8, %v2488_v22  ;;  %v1805_v16 = vadd.f32 %v1804_v13, %v1803_v11  ;;  %v839_v8 = vadd.f32 %v2434_v24, %v2488_v22 }
 0x1b6   : > { %v852_v24 = vadd.f32 %v2444_v37, %v2488_v22 }
 0x1b7   : > { %v1093_v18 = vadd.f32 %v2458_v49, %v932_v29  ;;  %v935_v51 = vadd.f32 %v1805_v16, %v2488_v22  ;;  %v831_v16 = vadd.f32 %v2429_v17, %v2488_v22 }
 0x1b9   : > { %v1096_v33 = vadd.f32 %v2464_v53, %v935_v51  ;;  %v1806_v19 = vpop.f32.mrb[56].mxu0  ;;  %v1141_v23 = vmax.f32 %v1093_v18, 0.0 }
 0x1ba   : > { %v1807_v54 = vpop.f32.mrb[57].mxu0 }
 0x1bb   : > { %v1142_v25 = vmax.f32 %v1096_v33, 0.0  ;;  %v1808_v26 = vadd.f32 %v1807_v54, %v1806_v19  ;;  %v1809_v28 = vpop.f32.mrb[58].mxu0 }
 0x1bc   : > { %v1810_v35 = vpop.f32.mrb[59].mxu0 }
 0x1bd   : > { %v2522_v36 = vpack.c.bf16 %v1142_v25, %v1141_v23  ;;  %v1811_v38 = vadd.f32 %v1810_v35, %v1809_v28  ;;  %v940_v41 = vadd.f32 %v1808_v26, %v2488_v22  ;;  %v844_v28 = vadd.f32 %v2436_v27, %v2488_v22 }
 0x1bf   : > { %v1101_v40 = vadd.f32 %v2472_v61, %v940_v41  ;;  %v943_v49 = vadd.f32 %v1811_v38, %v2488_v22  ;;  %v855_v38 = vadd.f32 %v2450_v42, %v2488_v22  ;;  %v868_v42 = vadd.f32 %v2468_v57, %v2488_v22 }
 0x1c1   : > { %v1104_v45 = vadd.f32 %v2478_v0, %v943_v49  ;;  %v1812_v44 = vpop.f32.mrb[60].mxu0  ;;  %v1143_v46 = vmax.f32 %v1101_v40, 0.0  ;;  %v847_v49 = vadd.f32 %v2440_v32, %v2488_v22 }
 0x1c2   : > { %v1813_v53 = vpop.f32.mrb[61].mxu0 }
 0x1c3   : > { %v1144_v48 = vmax.f32 %v1104_v45, 0.0  ;;  %v1814_v55 = vadd.f32 %v1813_v53, %v1812_v44  ;;  %v1815_v56 = vpop.f32.mrb[62].mxu0 }
 0x1c4   : > { %v1816_v58 = vpop.f32.mrb[63].mxu0 }
 0x1c5   : > { %v2528_v31 = vpack.c.bf16 %v1144_v48, %v1143_v46  ;;  %v948_v1 = vadd.f32 %v1814_v55, %v2488_v22  ;;  %v1817_v34 = vadd.f32 %v1816_v58, %v1815_v56 }
 0x1c7   : > { %v1109_v39 = vadd.f32 %v2470_v59, %v948_v1  ;;  %v951_v61 = vadd.f32 %v1817_v34, %v2488_v22  ;;  %v860_v1 = vadd.f32 %v2456_v47, %v2488_v22 }
 0x1c9   : > { %v1112_v0 = vadd.f32 %v2476_v63, %v951_v61  ;;  %v1860_v4 = vpop.f32.mrb[64].mxu0  ;;  %v1145_v11 = vmax.f32 %v1109_v39, 0.0  ;;  %v871_v39 = vadd.f32 %v2474_v62, %v2488_v22  ;;  %v884_v62 = vadd.f32 %v2484_v9, %v2488_v22 }
 0x1ca   : > { %v997_v5 = vadd.f32 %v1860_v4, %v836_v2  ;;  %v988_v7 = vpop.f32.mrb[65].mxu0 }
 0x1cb   : > { %v1146_v13 = vmax.f32 %v1112_v0, 0.0  ;;  %v989_v29 = vadd.f32 %v988_v7, %v828_v43  ;;  %v1861_v59 = vpop.f32.mrb[66].mxu0  ;;  %v863_v0 = vadd.f32 %v2462_v52, %v2488_v22 }
 0x1cc   : > { %v1000_v18 = vadd.f32 %v1861_v59, %v839_v8  ;;  %v991_v21 = vpop.f32.mrb[67].mxu0  ;;  %v1117_v33 = vmax.f32 %v997_v5, 0.0  ;;  %v876_v59 = vadd.f32 %v2480_v3, %v2488_v22 }
 0x1cd   : > { %v2542_v51 = vpack.c.bf16 %v1146_v13, %v1145_v11  ;;  %v992_v63 = vadd.f32 %v991_v21, %v831_v16  ;;  %v1115_v14 = vmax.f32 %v989_v29, 0.0 }
 0x1ce   : > { %v1118_v19 = vmax.f32 %v1000_v18, 0.0  ;;  %v887_v18 = vadd.f32 %v2486_v12, %v2488_v22 }
 0x1cf   : > { %v1116_v54 = vmax.f32 %v992_v63, 0.0 }
 0x1d0   : > { %v1148_v23 = vpack.c.bf16 %v1118_v19, %v1117_v33  ;;  %v879_v33 = vadd.f32 %v2482_v6, %v2488_v22  ;;  %v1169_v6 = vlaneseq }
 0x1d1   : > { %v1147_v25 = vpack.c.bf16 %v1116_v54, %v1115_v14  ;;  %v1864_v26 = vpop.f32.mrb[68].mxu0 }
 0x1d2   : > { %v1013_v17 = vadd.f32 %v1864_v26, %v852_v24  ;;  %v1004_v35 = vpop.f32.mrb[69].mxu0  ;;  %v1170_v12 = vshrl.u32 %v1169_v6, 7 }
 0x1d3   : > { %v1005_v41 = vadd.f32 %v1004_v35, %v844_v28  ;;  %v1865_v40 = vpop.f32.mrb[70].mxu0  ;;  %1687 = vmatmul.mubr.msk.bf16.vlgmr.msra.gmra.mrb[16].mxu1 %vm1199_vm0, %v1147_v25 }
 0x1d4   : > { %v1016_v45 = vadd.f32 %v1865_v40, %v855_v38  ;;  %v1007_v37 = vpop.f32.mrb[71].mxu0  ;;  %1290 = vmatprep.mubr.bf16.mxu1 %v2148_v20  ;;  %v1121_v53 = vmax.f32 %v1013_v17, 0.0  ;;  %v1171_v22 = vsub.s32 0, %v1170_v12 }
 0x1d5   : > { %v1008_v44 = vadd.f32 %v1007_v37, %v847_v49  ;;  %v1119_v27 = vmax.f32 %v1005_v41, 0.0 }
 0x1d6   : > { %v1122_v46 = vmax.f32 %v1016_v45, 0.0 }
 0x1d7   : > { %v1120_v48 = vmax.f32 %v1008_v44, 0.0 }
 0x1d8   : > { %v1150_v55 = vpack.c.bf16 %v1122_v46, %v1121_v53 }
 0x1d9   : > { %v1149_v56 = vpack.c.bf16 %v1120_v48, %v1119_v27  ;;  %v1868_v58 = vpop.f32.mrb[72].mxu0 }
 0x1da   : > { %v1029_v34 = vadd.f32 %v1868_v58, %v868_v42  ;;  %v1020_v32 = vpop.f32.mrb[73].mxu0 }
 0x1db   : > { %v1021_v61 = vadd.f32 %v1020_v32, %v860_v1  ;;  %v1869_v2 = vpop.f32.mrb[74].mxu0  ;;  %1688 = vmatmul.mubr.msk.bf16.gmra.mrb[20].mxu1 %vm1199_vm0, %v1148_v23 }
 0x1dc   : > { %v1032_v4 = vadd.f32 %v1869_v2, %v871_v39  ;;  %v1023_v43 = vpop.f32.mrb[75].mxu0  ;;  %1300 = vmatprep.mubr.bf16.mxu1 %v2148_v20  ;;  %v1125_v5 = vmax.f32 %v1029_v34, 0.0 }
 0x1dd   : > { %v1024_v57 = vadd.f32 %v1023_v43, %v863_v0  ;;  %v1123_v47 = vmax.f32 %v1021_v61, 0.0 }
 0x1de   : > { %v1126_v7 = vmax.f32 %v1032_v4, 0.0 }
 0x1df   : > { %v1124_v8 = vmax.f32 %v1024_v57, 0.0 }
 0x1e0   : > { %v1152_v11 = vpack.c.bf16 %v1126_v7, %v1125_v5 }
 0x1e1   : > { %v1151_v13 = vpack.c.bf16 %v1124_v8, %v1123_v47  ;;  %v1872_v29 = vpop.f32.mrb[76].mxu0 }
 0x1e2   : > { %v1045_v16 = vadd.f32 %v1872_v29, %v884_v62  ;;  %v1036_v52 = vpop.f32.mrb[77].mxu0 }
 0x1e3   : > { %v1037_v21 = vadd.f32 %v1036_v52, %v876_v59  ;;  %v1873_v63 = vpop.f32.mrb[78].mxu0  ;;  %1689 = vmatmul.mubr.msk.bf16.gmra.mrb[24].mxu1 %vm1199_vm0, %v1149_v56 }
 0x1e4   : > { %v1048_v19 = vadd.f32 %v1873_v63, %v887_v18  ;;  %v1039_v14 = vpop.f32.mrb[79].mxu0  ;;  %1310 = vmatprep.mubr.bf16.mxu1 %v2148_v20  ;;  %v1129_v54 = vmax.f32 %v1045_v16, 0.0 }
 0x1e5   : > { %v1040_v9 = vadd.f32 %v1039_v14, %v879_v33  ;;  %v1127_v3 = vmax.f32 %v1037_v21, 0.0 }
 0x1e6   : > { %v1130_v23 = vmax.f32 %v1048_v19, 0.0 }
 0x1e7   : > { %v1128_v24 = vmax.f32 %v1040_v9, 0.0 }
 0x1e8   : > { %v1154_v25 = vpack.c.bf16 %v1130_v23, %v1129_v54 }
 0x1e9   : > { %v1153_v26 = vpack.c.bf16 %v1128_v24, %v1127_v3 }
 0x1eb   : > { %1690 = vmatmul.mubr.msk.bf16.gmra.mrb[28].mxu1 %vm1199_vm0, %v1150_v55 }
 0x1ec   : > { %1320 = vmatprep.mubr.bf16.mxu1 %v2148_v20 }
 0x1f3   : > { %1691 = vmatmul.mubr.msk.bf16.gmra.mrb[32].mxu1 %vm1199_vm0, %v1151_v13 }
 0x1f4   : > { %1330 = vmatprep.mubr.bf16.mxu1 %v2148_v20 }
 0x1fb   : > { %1692 = vmatmul.mubr.msk.bf16.gmra.mrb[36].mxu1 %vm1199_vm0, %v1152_v11 }
 0x1fc   : > { %1340 = vmatprep.mubr.bf16.mxu1 %v2148_v20 }
 0x203   : > { %1693 = vmatmul.mubr.msk.bf16.gmra.mrb[40].mxu1 %vm1199_vm0, %v1153_v26 }
 0x204   : > { %1350 = vmatprep.mubr.bf16.mxu1 %v2148_v20 }
 0x20b   : > { %1694 = vmatmul.mubr.msk.bf16.gmra.mrb[44].mxu1 %vm1199_vm0, %v1154_v25 }
 0x20c   : > { %1360 = vmatprep.mubr.bf16.mxu1 %v2148_v20 }
 0x213   : > { %1695 = vmatmul.mubr.msk.bf16.gmra.mrb[48].mxu1 %vm1199_vm0, %v2492_v50  ;;  %v1167_v50 = vld [vmem:[#allocation6] sm:$0x3] }
 0x214   : > { %1370 = vmatprep.mubr.bf16.mxu1 %v2148_v20 }
 0x21b   : > { %1696 = vmatmul.mubr.msk.bf16.gmra.mrb[52].mxu1 %vm1199_vm0, %v2498_v10  ;;  %v1175_v10 = vsub.s32 1, %v1170_v12 }
 0x21c   : > { %1380 = vmatprep.mubr.bf16.mxu1 %v2148_v20 }
 0x223   : > { %1697 = vmatmul.mubr.msk.bf16.gmra.mrb[56].mxu1 %vm1199_vm0, %v2504_v30  ;;  %v2608_v30 = vrot.slane %v1167_v50, %v1171_v22 }
 0x224   : > { %1390 = vmatprep.mubr.bf16.mxu1 %v2148_v20 }
 0x22b   : > { %1698 = vmatmul.mubr.msk.bf16.gmra.mrb[60].mxu1 %vm1199_vm0, %v2510_v60  ;;  %v2610_v60 = vrot.slane %v1167_v50, %v1175_v10 }
 0x22c   : > { %1400 = vmatprep.mubr.bf16.mxu1 %v2148_v20 }
 0x233   : > { %1699 = vmatmul.mubr.msk.bf16.gmra.mrb[64].mxu1 %vm1199_vm0, %v2516_v15 }
 0x234   : > { %1410 = vmatprep.mubr.bf16.mxu1 %v2148_v20 }
 0x23b   : > { %1700 = vmatmul.mubr.msk.bf16.gmra.mrb[68].mxu1 %vm1199_vm0, %v2522_v36 }
 0x23c   : > { %1420 = vmatprep.mubr.bf16.mxu1 %v2148_v20 }
 0x243   : > { %1701 = vmatmul.mubr.msk.bf16.gmra.mrb[72].mxu1 %vm1199_vm0, %v2528_v31 }
 0x244   : > { %1430 = vmatprep.mubr.bf16.mxu1 %v2148_v20 }
 0x24b   : > { %1702 = vmatmul.mubr.msk.bf16.gmra.mrb[76].mxu1 %vm1199_vm0, %v2542_v51 }
 0x2a6   : > { %v1282_v20 = vpop.f32.mrb[16].mxu1 }
 0x2a7   : > { %v1283_v15 = vadd.f32 %v1282_v20, %v2608_v30  ;;  %v1284_v36 = vpop.f32.mrb[17].mxu1 }
 0x2a8   : > { %v1285_v31 = vadd.f32 %v1284_v36, %v2610_v60  ;;  %v1286_v51 = vpop.f32.mrb[18].mxu1 }
 0x2a9   : > { %1441 = vst [vmem:[%s2615_s20] sm:$0xff] %v1283_v15  ;;  %v1287_v28 = vadd.f32 %v1286_v51, %v2608_v30  ;;  %v1288_v17 = vpop.f32.mrb[19].mxu1 }
 0x2aa   : > { %1442 = vst [vmem:[%s2615_s20 + $0x8] sm:$0xff] %v1285_v31  ;;  %v1289_v35 = vadd.f32 %v1288_v17, %v2610_v60 }
 0x2ab   : > { %1443 = vst [vmem:[%s2615_s20 + $0x10] sm:$0xff] %v1287_v28 }
 0x2ac   : > { %1444 = vst [vmem:[%s2615_s20 + $0x18] sm:$0xff] %v1289_v35 }
 0x2ae   : > { %v1292_v38 = vpop.f32.mrb[20].mxu1 }
 0x2af   : > { %v1293_v41 = vadd.f32 %v1292_v38, %v2608_v30  ;;  %v1294_v40 = vpop.f32.mrb[21].mxu1 }
 0x2b0   : > { %v1295_v49 = vadd.f32 %v1294_v40, %v2610_v60  ;;  %v1296_v45 = vpop.f32.mrb[22].mxu1 }
 0x2b1   : > { %1445 = vst [vmem:[%s2615_s20 + $0x20] sm:$0xff] %v1293_v41  ;;  %v1297_v37 = vadd.f32 %v1296_v45, %v2608_v30  ;;  %v1298_v44 = vpop.f32.mrb[23].mxu1 }
 0x2b2   : > { %1446 = vst [vmem:[%s2615_s20 + $0x28] sm:$0xff] %v1295_v49  ;;  %v1299_v53 = vadd.f32 %v1298_v44, %v2610_v60 }
 0x2b3   : > { %1447 = vst [vmem:[%s2615_s20 + $0x30] sm:$0xff] %v1297_v37 }
 0x2b4   : > { %1448 = vst [vmem:[%s2615_s20 + $0x38] sm:$0xff] %v1299_v53 }
 0x2b6   : > { %v1302_v46 = vpop.f32.mrb[24].mxu1 }
 0x2b7   : > { %v1303_v27 = vadd.f32 %v1302_v46, %v2608_v30  ;;  %v1304_v48 = vpop.f32.mrb[25].mxu1 }
 0x2b8   : > { %v1305_v55 = vadd.f32 %v1304_v48, %v2610_v60  ;;  %v1306_v42 = vpop.f32.mrb[26].mxu1 }
 0x2b9   : > { %1449 = vst [vmem:[%s2615_s20 + $0x40] sm:$0xff] %v1303_v27  ;;  %v1307_v56 = vadd.f32 %v1306_v42, %v2608_v30  ;;  %v1308_v58 = vpop.f32.mrb[27].mxu1 }
 0x2ba   : > { %1450 = vst [vmem:[%s2615_s20 + $0x48] sm:$0xff] %v1305_v55  ;;  %v1309_v1 = vadd.f32 %v1308_v58, %v2610_v60 }
 0x2bb   : > { %1451 = vst [vmem:[%s2615_s20 + $0x50] sm:$0xff] %v1307_v56 }
 0x2bc   : > { %1452 = vst [vmem:[%s2615_s20 + $0x58] sm:$0xff] %v1309_v1 }
 0x2be   : > { %v1312_v34 = vpop.f32.mrb[28].mxu1 }
 0x2bf   : > { %v1313_v32 = vadd.f32 %v1312_v34, %v2608_v30  ;;  %v1314_v39 = vpop.f32.mrb[29].mxu1 }
 0x2c0   : > { %v1315_v61 = vadd.f32 %v1314_v39, %v2610_v60  ;;  %v1316_v2 = vpop.f32.mrb[30].mxu1 }
 0x2c1   : > { %1453 = vst [vmem:[%s2615_s20 + $0x60] sm:$0xff] %v1313_v32  ;;  %v1317_v0 = vadd.f32 %v1316_v2, %v2608_v30  ;;  %v1318_v4 = vpop.f32.mrb[31].mxu1 }
 0x2c2   : > { %1454 = vst [vmem:[%s2615_s20 + $0x68] sm:$0xff] %v1315_v61  ;;  %v1319_v43 = vadd.f32 %v1318_v4, %v2610_v60 }
 0x2c3   : > { %1455 = vst [vmem:[%s2615_s20 + $0x70] sm:$0xff] %v1317_v0 }
 0x2c4   : > { %1456 = vst [vmem:[%s2615_s20 + $0x78] sm:$0xff] %v1319_v43 }
 0x2c6   : > { %v1322_v57 = vpop.f32.mrb[32].mxu1 }
 0x2c7   : > { %v1323_v5 = vadd.f32 %v1322_v57, %v2608_v30  ;;  %v1324_v7 = vpop.f32.mrb[33].mxu1 }
 0x2c8   : > { %v1325_v47 = vadd.f32 %v1324_v7, %v2610_v60  ;;  %v1326_v8 = vpop.f32.mrb[34].mxu1 }
 0x2c9   : > { %1457 = vst [vmem:[%s2615_s20 + $0x80] sm:$0xff] %v1323_v5  ;;  %v1327_v11 = vadd.f32 %v1326_v8, %v2608_v30  ;;  %v1328_v62 = vpop.f32.mrb[35].mxu1 }
 0x2ca   : > { %1458 = vst [vmem:[%s2615_s20 + $0x88] sm:$0xff] %v1325_v47  ;;  %v1329_v13 = vadd.f32 %v1328_v62, %v2610_v60 }
 0x2cb   : > { %1459 = vst [vmem:[%s2615_s20 + $0x90] sm:$0xff] %v1327_v11 }
 0x2cc   : > { %1460 = vst [vmem:[%s2615_s20 + $0x98] sm:$0xff] %v1329_v13 }
 0x2ce   : > { %v1332_v29 = vpop.f32.mrb[36].mxu1 }
 0x2cf   : > { %v1333_v59 = vadd.f32 %v1332_v29, %v2608_v30  ;;  %v1334_v16 = vpop.f32.mrb[37].mxu1 }
 0x2d0   : > { %v1335_v52 = vadd.f32 %v1334_v16, %v2610_v60  ;;  %v1336_v18 = vpop.f32.mrb[38].mxu1 }
 0x2d1   : > { %1461 = vst [vmem:[%s2615_s20 + $0xa0] sm:$0xff] %v1333_v59  ;;  %v1337_v21 = vadd.f32 %v1336_v18, %v2608_v30  ;;  %v1338_v63 = vpop.f32.mrb[39].mxu1 }
 0x2d2   : > { %1462 = vst [vmem:[%s2615_s20 + $0xa8] sm:$0xff] %v1335_v52  ;;  %v1339_v33 = vadd.f32 %v1338_v63, %v2610_v60 }
 0x2d3   : > { %1463 = vst [vmem:[%s2615_s20 + $0xb0] sm:$0xff] %v1337_v21 }
 0x2d4   : > { %1464 = vst [vmem:[%s2615_s20 + $0xb8] sm:$0xff] %v1339_v33 }
 0x2d6   : > { %v1342_v19 = vpop.f32.mrb[40].mxu1 }
 0x2d7   : > { %v1343_v14 = vadd.f32 %v1342_v19, %v2608_v30  ;;  %v1344_v9 = vpop.f32.mrb[41].mxu1 }
 0x2d8   : > { %v1345_v54 = vadd.f32 %v1344_v9, %v2610_v60  ;;  %v1346_v23 = vpop.f32.mrb[42].mxu1 }
 0x2d9   : > { %1465 = vst [vmem:[%s2615_s20 + $0xc0] sm:$0xff] %v1343_v14  ;;  %v1347_v3 = vadd.f32 %v1346_v23, %v2608_v30  ;;  %v1348_v24 = vpop.f32.mrb[43].mxu1 }
 0x2da   : > { %1466 = vst [vmem:[%s2615_s20 + $0xc8] sm:$0xff] %v1345_v54  ;;  %v1349_v25 = vadd.f32 %v1348_v24, %v2610_v60 }
 0x2db   : > { %1467 = vst [vmem:[%s2615_s20 + $0xd0] sm:$0xff] %v1347_v3 }
 0x2dc   : > { %1468 = vst [vmem:[%s2615_s20 + $0xd8] sm:$0xff] %v1349_v25 }
 0x2de   : > { %v1352_v26 = vpop.f32.mrb[44].mxu1 }
 0x2df   : > { %v1353_v6 = vadd.f32 %v1352_v26, %v2608_v30  ;;  %v1354_v12 = vpop.f32.mrb[45].mxu1 }
 0x2e0   : > { %v1355_v22 = vadd.f32 %v1354_v12, %v2610_v60  ;;  %v1356_v50 = vpop.f32.mrb[46].mxu1 }
 0x2e1   : > { %1469 = vst [vmem:[%s2615_s20 + $0xe0] sm:$0xff] %v1353_v6  ;;  %v1357_v10 = vadd.f32 %v1356_v50, %v2608_v30  ;;  %v1358_v20 = vpop.f32.mrb[47].mxu1 }
 0x2e2   : > { %1470 = vst [vmem:[%s2615_s20 + $0xe8] sm:$0xff] %v1355_v22  ;;  %v1359_v15 = vadd.f32 %v1358_v20, %v2610_v60 }
 0x2e3   : > { %1471 = vst [vmem:[%s2615_s20 + $0xf0] sm:$0xff] %v1357_v10 }
 0x2e4   : > { %1472 = vst [vmem:[%s2615_s20 + $0xf8] sm:$0xff] %v1359_v15 }
 0x2e6   : > { %v1362_v36 = vpop.f32.mrb[48].mxu1 }
 0x2e7   : > { %v1363_v31 = vadd.f32 %v1362_v36, %v2608_v30  ;;  %v1364_v51 = vpop.f32.mrb[49].mxu1 }
 0x2e8   : > { %v1365_v28 = vadd.f32 %v1364_v51, %v2610_v60  ;;  %v1366_v17 = vpop.f32.mrb[50].mxu1 }
 0x2e9   : > { %1473 = vst [vmem:[%s2615_s20 + $0x100] sm:$0xff] %v1363_v31  ;;  %v1367_v35 = vadd.f32 %v1366_v17, %v2608_v30  ;;  %v1368_v38 = vpop.f32.mrb[51].mxu1 }
 0x2ea   : > { %1474 = vst [vmem:[%s2615_s20 + $0x108] sm:$0xff] %v1365_v28  ;;  %v1369_v41 = vadd.f32 %v1368_v38, %v2610_v60 }
 0x2eb   : > { %1475 = vst [vmem:[%s2615_s20 + $0x110] sm:$0xff] %v1367_v35 }
 0x2ec   : > { %1476 = vst [vmem:[%s2615_s20 + $0x118] sm:$0xff] %v1369_v41 }
 0x2ee   : > { %v1372_v40 = vpop.f32.mrb[52].mxu1 }
 0x2ef   : > { %v1373_v49 = vadd.f32 %v1372_v40, %v2608_v30  ;;  %v1374_v45 = vpop.f32.mrb[53].mxu1 }
 0x2f0   : > { %v1375_v37 = vadd.f32 %v1374_v45, %v2610_v60  ;;  %v1376_v44 = vpop.f32.mrb[54].mxu1 }
 0x2f1   : > { %1477 = vst [vmem:[%s2615_s20 + $0x120] sm:$0xff] %v1373_v49  ;;  %v1377_v53 = vadd.f32 %v1376_v44, %v2608_v30  ;;  %v1378_v46 = vpop.f32.mrb[55].mxu1 }
 0x2f2   : > { %1478 = vst [vmem:[%s2615_s20 + $0x128] sm:$0xff] %v1375_v37  ;;  %v1379_v27 = vadd.f32 %v1378_v46, %v2610_v60 }
 0x2f3   : > { %1479 = vst [vmem:[%s2615_s20 + $0x130] sm:$0xff] %v1377_v53 }
 0x2f4   : > { %1480 = vst [vmem:[%s2615_s20 + $0x138] sm:$0xff] %v1379_v27 }
 0x2f6   : > { %v1382_v48 = vpop.f32.mrb[56].mxu1 }
 0x2f7   : > { %v1383_v55 = vadd.f32 %v1382_v48, %v2608_v30  ;;  %v1384_v42 = vpop.f32.mrb[57].mxu1 }
 0x2f8   : > { %v1385_v56 = vadd.f32 %v1384_v42, %v2610_v60  ;;  %v1386_v58 = vpop.f32.mrb[58].mxu1 }
 0x2f9   : > { %1481 = vst [vmem:[%s2615_s20 + $0x140] sm:$0xff] %v1383_v55  ;;  %v1387_v1 = vadd.f32 %v1386_v58, %v2608_v30  ;;  %v1388_v34 = vpop.f32.mrb[59].mxu1 }
 0x2fa   : > { %1482 = vst [vmem:[%s2615_s20 + $0x148] sm:$0xff] %v1385_v56  ;;  %v1389_v32 = vadd.f32 %v1388_v34, %v2610_v60 }
 0x2fb   : > { %1483 = vst [vmem:[%s2615_s20 + $0x150] sm:$0xff] %v1387_v1 }
 0x2fc   : > { %1484 = vst [vmem:[%s2615_s20 + $0x158] sm:$0xff] %v1389_v32 }
 0x2fe   : > { %v1392_v39 = vpop.f32.mrb[60].mxu1 }
 0x2ff   : > { %v1393_v61 = vadd.f32 %v1392_v39, %v2608_v30  ;;  %v1394_v2 = vpop.f32.mrb[61].mxu1 }
 0x300   : > { %v1395_v0 = vadd.f32 %v1394_v2, %v2610_v60  ;;  %v1396_v4 = vpop.f32.mrb[62].mxu1 }
 0x301   : > { %1485 = vst [vmem:[%s2615_s20 + $0x160] sm:$0xff] %v1393_v61  ;;  %v1397_v43 = vadd.f32 %v1396_v4, %v2608_v30  ;;  %v1398_v57 = vpop.f32.mrb[63].mxu1 }
 0x302   : > { %1486 = vst [vmem:[%s2615_s20 + $0x168] sm:$0xff] %v1395_v0  ;;  %v1399_v5 = vadd.f32 %v1398_v57, %v2610_v60 }
 0x303   : > { %1487 = vst [vmem:[%s2615_s20 + $0x170] sm:$0xff] %v1397_v43 }
 0x304   : > { %1488 = vst [vmem:[%s2615_s20 + $0x178] sm:$0xff] %v1399_v5 }
 0x306   : > { %v1402_v7 = vpop.f32.mrb[64].mxu1 }
 0x307   : > { %v1403_v47 = vadd.f32 %v1402_v7, %v2608_v30  ;;  %v1404_v8 = vpop.f32.mrb[65].mxu1 }
 0x308   : > { %v1405_v11 = vadd.f32 %v1404_v8, %v2610_v60  ;;  %v1406_v62 = vpop.f32.mrb[66].mxu1 }
 0x309   : > { %1489 = vst [vmem:[%s2615_s20 + $0x180] sm:$0xff] %v1403_v47  ;;  %v1407_v13 = vadd.f32 %v1406_v62, %v2608_v30  ;;  %v1408_v29 = vpop.f32.mrb[67].mxu1 }
 0x30a   : > { %1490 = vst [vmem:[%s2615_s20 + $0x188] sm:$0xff] %v1405_v11  ;;  %v1409_v59 = vadd.f32 %v1408_v29, %v2610_v60 }
 0x30b   : > { %1491 = vst [vmem:[%s2615_s20 + $0x190] sm:$0xff] %v1407_v13 }
 0x30c   : > { %1492 = vst [vmem:[%s2615_s20 + $0x198] sm:$0xff] %v1409_v59 }
 0x30e   : > { %v1412_v16 = vpop.f32.mrb[68].mxu1 }
 0x30f   : > { %v1413_v52 = vadd.f32 %v1412_v16, %v2608_v30  ;;  %v1414_v18 = vpop.f32.mrb[69].mxu1 }
 0x310   : > { %v1415_v21 = vadd.f32 %v1414_v18, %v2610_v60  ;;  %v1416_v63 = vpop.f32.mrb[70].mxu1 }
 0x311   : > { %1493 = vst [vmem:[%s2615_s20 + $0x1a0] sm:$0xff] %v1413_v52  ;;  %v1417_v33 = vadd.f32 %v1416_v63, %v2608_v30  ;;  %v1418_v19 = vpop.f32.mrb[71].mxu1 }
 0x312   : > { %1494 = vst [vmem:[%s2615_s20 + $0x1a8] sm:$0xff] %v1415_v21  ;;  %v1419_v14 = vadd.f32 %v1418_v19, %v2610_v60 }
 0x313   : > { %1495 = vst [vmem:[%s2615_s20 + $0x1b0] sm:$0xff] %v1417_v33 }
 0x314   : > { %1496 = vst [vmem:[%s2615_s20 + $0x1b8] sm:$0xff] %v1419_v14 }
 0x316   : > { %v1422_v9 = vpop.f32.mrb[72].mxu1 }
 0x317   : > { %v1423_v54 = vadd.f32 %v1422_v9, %v2608_v30  ;;  %v1424_v23 = vpop.f32.mrb[73].mxu1 }
 0x318   : > { %v1425_v3 = vadd.f32 %v1424_v23, %v2610_v60  ;;  %v1426_v24 = vpop.f32.mrb[74].mxu1 }
 0x319   : > { %1497 = vst [vmem:[%s2615_s20 + $0x1c0] sm:$0xff] %v1423_v54  ;;  %v1427_v25 = vadd.f32 %v1426_v24, %v2608_v30  ;;  %v1428_v26 = vpop.f32.mrb[75].mxu1 }
 0x31a   : > { %1498 = vst [vmem:[%s2615_s20 + $0x1c8] sm:$0xff] %v1425_v3  ;;  %v1429_v6 = vadd.f32 %v1428_v26, %v2610_v60 }
 0x31b   : > { %1499 = vst [vmem:[%s2615_s20 + $0x1d0] sm:$0xff] %v1427_v25 }
 0x31c   : > { %1500 = vst [vmem:[%s2615_s20 + $0x1d8] sm:$0xff] %v1429_v6 }
 0x31e   : > { %v1432_v12 = vpop.f32.mrb[76].mxu1 }
 0x31f   : > { %v1433_v22 = vadd.f32 %v1432_v12, %v2608_v30  ;;  %v1434_v50 = vpop.f32.mrb[77].mxu1 }
 0x320   : > { %v1435_v10 = vadd.f32 %v1434_v50, %v2610_v60  ;;  %v1436_v20 = vpop.f32.mrb[78].mxu1 }
 0x321   : > { %1501 = vst [vmem:[%s2615_s20 + $0x1e0] sm:$0xff] %v1433_v22  ;;  %v1437_v15 = vadd.f32 %v1436_v20, %v2608_v30  ;;  %v1438_v36 = vpop.f32.mrb[79].mxu1 }
 0x322   : > { %1502 = vst [vmem:[%s2615_s20 + $0x1e8] sm:$0xff] %v1435_v10  ;;  %v1439_v31 = vadd.f32 %v1438_v36, %v2610_v60 }
 0x323   : > { %1503 = vst [vmem:[%s2615_s20 + $0x1f0] sm:$0xff] %v1437_v15 }
 0x324   : > { %1504 = vst [vmem:[%s2615_s20 + $0x1f8] sm:$0xff] %v1439_v31 }
 0x325 PF: > { %s17_s18 = sadd.s32 1, %s2141_s18  }
 0x326   : > { %p14_p2 = scmp.ge.s32.totalorder %s17_s18, 4  }
 0x328   :  { %16 = sbr.rel (!%p14_p2) target bundleno = 2 (0x2), region = 83 }
 0x32f   :  { %1529 = vsyncpa [#allocation3], 1 }
 0x330   :  { %1531 = vsyncpa [#allocation3 + $0x1], 1 }
 0x331   :  { %1532 = vsyncpa [#allocation5], 1 }

// kernel: custom-call
= control target key start
LH: loop header
LB: loop body
LE: loop exit
PB: predicated region body
PF: predicated region fallthrough
CT: control target
= control target key end

     0   :  { %5 = vsyncpa [#allocation9], 0  ;;  %v1883_v0 = vmov 2147483648   ;;  %v1884_v1 = vmov 2147483647   ;;  %s2218_s0 = inlined_call_operand.vmem [shape: f32[2,7680], index: 0, kind: input, shape index: {}]   ;;  %s2219_s1 = inlined_call_operand.hbm [shape: f32[2,16], index: 1, kind: output, shape index: {0}]   ;;  %s2220_s2 = inlined_call_operand.vmem [shape: s32[2,16], index: 2, kind: output, shape index: {1}]  }
   0x1   :  { %7 = vst [vmem:[#allocation12] sm:$0xff] %v1883_v0  ;;  %9 = vst [vmem:[#allocation12 + $0x8] sm:$0xff] %v1883_v0 }
   0x2   :  { %10 = vst [vmem:[#allocation14] sm:$0xff] %v1884_v1  ;;  %12 = vst [vmem:[#allocation14 + $0x8] sm:$0xff] %v1884_v1 }
   0x3   :  { %v29_v2 = vld [vmem:[%s2218_s0] sm:$0xff]  ;;  %v31_v3 = vld [vmem:[%s2218_s0 + $0x8] sm:$0xff]  ;;  %v33_v4 = vld [vmem:[%s2218_s0 + $0x10] sm:$0xff]  ;;  %v64_v5 = vlaneseq  ;;  %v1885_v7 = vmov 2147483648   ;;  %v1886_v8 = vmov 2147483647  }
   0x4   :  { %vm74_vm0 = vcmp.lt.s32.totalorder %v29_v2, 0  ;;  %v75_v6 = vsub.s32 2147483647, %v29_v2  ;;  %261 = vst [vmem:[#allocation13] sm:$0xff] %v1885_v7  ;;  %263 = vst [vmem:[#allocation13 + $0x8] sm:$0xff] %v1885_v7  ;;  %v35_v9 = vld [vmem:[%s2218_s0 + $0x18] sm:$0xff] }
   0x5   :  { %264 = vst [vmem:[#allocation15] sm:$0xff] %v1886_v8  ;;  %266 = vst [vmem:[#allocation15 + $0x8] sm:$0xff] %v1886_v8  ;;  %v37_v10 = vld [vmem:[%s2218_s0 + $0x20] sm:$0xff]  ;;  %v1924_v11 = vshrl.u32 %v64_v5, 7  ;;  %vm83_vm1 = vcmp.lt.s32.totalorder %v31_v3, 0  ;;  %v39_v12 = vld [vmem:[%s2218_s0 + $0x28] sm:$0xff] }
   0x6   :  { %v84_v13 = vsub.s32 2147483647, %v31_v3  ;;  %vm92_vm2 = vcmp.lt.s32.totalorder %v33_v4, 0  ;;  %v41_v14 = vld [vmem:[%s2218_s0 + $0x30] sm:$0xff]  ;;  %v65_v15 = vand.u32 127, %v64_v5  ;;  %v76_v17 = vsel %vm74_vm0, %v75_v6, %v29_v2  ;;  %v43_v19 = vld [vmem:[%s2218_s0 + $0x38] sm:$0xff] }
   0x7   :  { %v68_v16 = vshrl.u32 %v1924_v11, 1  ;;  %v93_v18 = vsub.s32 2147483647, %v33_v4  ;;  %vm101_vm3 = vcmp.lt.s32.totalorder %v35_v9, 0  ;;  %v102_v21 = vsub.s32 2147483647, %v35_v9 }
   0x8   :  { %v85_v20 = vsel %vm83_vm1, %v84_v13, %v31_v3  ;;  %vm110_vm4 = vcmp.lt.s32.totalorder %v37_v10, 0  ;;  %v45_v22 = vld [vmem:[%s2218_s0 + $0x40] sm:$0xff]  ;;  %v111_v25 = vsub.s32 2147483647, %v37_v10  ;;  %vm119_vm5 = vcmp.lt.s32.totalorder %v39_v12, 0  ;;  %v47_v43 = vld [vmem:[%s2218_s0 + $0x48] sm:$0xff] }
   0x9   :  { %v70_v23 = vmul.u32 128, %v68_v16  ;;  %v94_v24 = vsel %vm92_vm2, %v93_v18, %v33_v4  ;;  %v103_v26 = vsel %vm101_vm3, %v102_v21, %v35_v9  ;;  %v120_v27 = vsub.s32 2147483647, %v39_v12  ;;  %v49_v47 = vld [vmem:[%s2218_s0 + $0x50] sm:$0xff]  ;;  %v51_v54 = vld [vmem:[%s2218_s0 + $0x58] sm:$0xff]  ;;  %v53_v57 = vld [vmem:[%s2218_s0 + $0x60] sm:$0xff] }
   0xa   :  { %vm128_vm6 = vcmp.lt.s32.totalorder %v41_v14, 0  ;;  %v129_v28 = vsub.s32 2147483647, %v41_v14  ;;  %v112_v30 = vsel %vm110_vm4, %v111_v25, %v37_v10  ;;  %vm137_vm7 = vcmp.lt.s32.totalorder %v43_v19, 0  ;;  %v55_v60 = vld [vmem:[%s2218_s0 + $0x68] sm:$0xff]  ;;  %v57_v3 = vld [vmem:[%s2218_s0 + $0x70] sm:$0xff] }
   0xb   :  { %v1941_v29 = vadd.s32 %v70_v23, %v65_v15  ;;  %v138_v31 = vsub.s32 2147483647, %v43_v19  ;;  %v121_v32 = vsel %vm119_vm5, %v120_v27, %v39_v12  ;;  %vm146_vm8 = vcmp.lt.s32.totalorder %v45_v22, 0  ;;  %s1979_s0 = smov 0  }
   0xc   :  { %v130_v33 = vsel %vm128_vm6, %v129_v28, %v41_v14  ;;  %v147_v34 = vsub.s32 2147483647, %v45_v22  ;;  %vm155_vm1 = vcmp.lt.s32.totalorder %v47_v43, 0  ;;  %v156_v55 = vsub.s32 2147483647, %v47_v43 }
   0xd   :  { %vm78_vm9 = vcmp.lt.s32.totalorder %v1941_v29, 7680  ;;  %v86_v35 = vadd.s32 512, %v1941_v29  ;;  %v95_v36 = vadd.s32 1024, %v1941_v29  ;;  %v104_v37 = vadd.s32 1536, %v1941_v29  ;;  %217 = vst [vmem:[#allocation17] sm:$0xff] %v1941_v29 }
   0xe   :  { %v79_v38 = vsel %vm78_vm9, %v76_v17, 2147483648  ;;  %v113_v39 = vadd.s32 2048, %v1941_v29  ;;  %v122_v40 = vadd.s32 2560, %v1941_v29  ;;  %v131_v41 = vadd.s32 3072, %v1941_v29 }
   0xf   :  { %80 = vst [vmem:[#allocation16] sm:$0xff] %v79_v38  ;;  %vm87_vm10 = vcmp.lt.s32.totalorder %v86_v35, 7680  ;;  %vm96_vm11 = vcmp.lt.s32.totalorder %v95_v36, 7680  ;;  %vm105_vm12 = vcmp.lt.s32.totalorder %v104_v37, 7680  ;;  %v139_v42 = vsel %vm137_vm7, %v138_v31, %v43_v19  ;;  %220 = vst [vmem:[#allocation17 + $0x8] sm:$0xff] %v86_v35 }
  0x10   :  { %223 = vst [vmem:[#allocation17 + $0x10] sm:$0xff] %v95_v36  ;;  %226 = vst [vmem:[#allocation17 + $0x18] sm:$0xff] %v104_v37  ;;  %v88_v44 = vsel %vm87_vm10, %v85_v20, 2147483648  ;;  %v97_v45 = vsel %vm96_vm11, %v94_v24, 2147483648  ;;  %v106_v46 = vsel %vm105_vm12, %v103_v26, 2147483648  ;;  %vm114_vm13 = vcmp.lt.s32.totalorder %v113_v39, 7680 }
  0x11   :  { %229 = vst [vmem:[#allocation17 + $0x20] sm:$0xff] %v113_v39  ;;  %232 = vst [vmem:[#allocation17 + $0x28] sm:$0xff] %v122_v40  ;;  %v115_v48 = vsel %vm114_vm13, %v112_v30, 2147483648  ;;  %vm123_vm14 = vcmp.lt.s32.totalorder %v122_v40, 7680  ;;  %vm132_vm15 = vcmp.lt.s32.totalorder %v131_v41, 7680  ;;  %v140_v49 = vadd.s32 3584, %v1941_v29 }
  0x12   :  { %235 = vst [vmem:[#allocation17 + $0x30] sm:$0xff] %v131_v41  ;;  %89 = vst [vmem:[#allocation16 + $0x8] sm:$0xff] %v88_v44  ;;  %v124_v50 = vsel %vm123_vm14, %v121_v32, 2147483648  ;;  %v133_v51 = vsel %vm132_vm15, %v130_v33, 2147483648  ;;  %v148_v52 = vsel %vm146_vm8, %v147_v34, %v45_v22  ;;  %v149_v53 = vadd.s32 4096, %v1941_v29 }
  0x13   :  { %98 = vst [vmem:[#allocation16 + $0x10] sm:$0xff] %v97_v45  ;;  %107 = vst [vmem:[#allocation16 + $0x18] sm:$0xff] %v106_v46  ;;  %vm141_vm0 = vcmp.lt.s32.totalorder %v140_v49, 7680  ;;  %v158_v56 = vadd.s32 4608, %v1941_v29  ;;  %vm164_vm3 = vcmp.lt.s32.totalorder %v49_v47, 0  ;;  %v157_v62 = vsel %vm155_vm1, %v156_v55, %v47_v43 }
  0x14   :  { %116 = vst [vmem:[#allocation16 + $0x20] sm:$0xff] %v115_v48  ;;  %125 = vst [vmem:[#allocation16 + $0x28] sm:$0xff] %v124_v50  ;;  %v142_v58 = vsel %vm141_vm0, %v139_v42, 2147483648  ;;  %vm150_vm2 = vcmp.lt.s32.totalorder %v149_v53, 7680  ;;  %v165_v59 = vsub.s32 2147483647, %v49_v47 }
  0x15   :  { %134 = vst [vmem:[#allocation16 + $0x30] sm:$0xff] %v133_v51  ;;  %238 = vst [vmem:[#allocation17 + $0x38] sm:$0xff] %v140_v49  ;;  %v151_v61 = vsel %vm150_vm2, %v148_v52, 2147483648  ;;  %vm159_vm4 = vcmp.lt.s32.totalorder %v158_v56, 7680  ;;  %v167_v63 = vadd.s32 5120, %v1941_v29  ;;  %vm173_vm5 = vcmp.lt.s32.totalorder %v51_v54, 0 }
  0x16   :  { %241 = vst [vmem:[#allocation17 + $0x40] sm:$0xff] %v149_v53  ;;  %143 = vst [vmem:[#allocation16 + $0x38] sm:$0xff] %v142_v58  ;;  %v160_v0 = vsel %vm159_vm4, %v157_v62, 2147483648  ;;  %v166_v1 = vsel %vm164_vm3, %v165_v59, %v49_v47  ;;  %v174_v2 = vsub.s32 2147483647, %v51_v54  ;;  %v176_v4 = vadd.s32 5632, %v1941_v29 }
  0x17   :  { %244 = vst [vmem:[#allocation17 + $0x48] sm:$0xff] %v158_v56  ;;  %152 = vst [vmem:[#allocation16 + $0x40] sm:$0xff] %v151_v61  ;;  %vm168_vm6 = vcmp.lt.s32.totalorder %v167_v63, 7680  ;;  %vm182_vm7 = vcmp.lt.s32.totalorder %v53_v57, 0  ;;  %v183_v6 = vsub.s32 2147483647, %v53_v57 }
  0x18   :  { %161 = vst [vmem:[#allocation16 + $0x48] sm:$0xff] %v160_v0  ;;  %247 = vst [vmem:[#allocation17 + $0x50] sm:$0xff] %v167_v63  ;;  %v169_v7 = vsel %vm168_vm6, %v166_v1, 2147483648  ;;  %v175_v8 = vsel %vm173_vm5, %v174_v2, %v51_v54  ;;  %v185_v9 = vadd.s32 6144, %v1941_v29  ;;  %vm191_vm8 = vcmp.lt.s32.totalorder %v55_v60, 0 }
  0x19   :  { %170 = vst [vmem:[#allocation16 + $0x50] sm:$0xff] %v169_v7  ;;  %vm177_vm9 = vcmp.lt.s32.totalorder %v176_v4, 7680  ;;  %v184_v10 = vsel %vm182_vm7, %v183_v6, %v53_v57  ;;  %v192_v12 = vsub.s32 2147483647, %v55_v60  ;;  %v194_v13 = vadd.s32 6656, %v1941_v29  ;;  %250 = vst [vmem:[#allocation17 + $0x58] sm:$0xff] %v176_v4 }
  0x1a   :  { %v178_v14 = vsel %vm177_vm9, %v175_v8, 2147483648  ;;  %vm186_vm10 = vcmp.lt.s32.totalorder %v185_v9, 7680  ;;  %vm200_vm11 = vcmp.lt.s32.totalorder %v57_v3, 0  ;;  %v201_v15 = vsub.s32 2147483647, %v57_v3  ;;  %253 = vst [vmem:[#allocation17 + $0x60] sm:$0xff] %v185_v9 }
  0x1b   :  { %179 = vst [vmem:[#allocation16 + $0x58] sm:$0xff] %v178_v14  ;;  %v187_v16 = vsel %vm186_vm10, %v184_v10, 2147483648  ;;  %v193_v17 = vsel %vm191_vm8, %v192_v12, %v55_v60  ;;  %vm195_vm12 = vcmp.lt.s32.totalorder %v194_v13, 7680  ;;  %v203_v18 = vadd.s32 7168, %v1941_v29  ;;  %256 = vst [vmem:[#allocation17 + $0x68] sm:$0xff] %v194_v13 }
  0x1c   :  { %188 = vst [vmem:[#allocation16 + $0x60] sm:$0xff] %v187_v16  ;;  %v196_v19 = vsel %vm195_vm12, %v193_v17, 2147483648  ;;  %v202_v20 = vsel %vm200_vm11, %v201_v15, %v57_v3 }
  0x1d   :  { %197 = vst [vmem:[#allocation16 + $0x68] sm:$0xff] %v196_v19  ;;  %vm204_vm13 = vcmp.lt.s32.totalorder %v203_v18, 7680  ;;  %259 = vst [vmem:[#allocation17 + $0x70] sm:$0xff] %v203_v18 }
  0x1e   :  { %v205_v21 = vsel %vm204_vm13, %v202_v20, 2147483648 }
  0x1f   :  { %206 = vst [vmem:[#allocation16 + $0x70] sm:$0xff] %v205_v21 }
  0x20 LB: > { %v274_v22 = vld [vmem:[#allocation16] sm:$0xff]  ;;  %v275_v23 = vld [vmem:[#allocation17] sm:$0xff]  ;;  %v278_v24 = vld [vmem:[#allocation16 + $0x8] sm:$0xff]  ;;  %s769_s11 = scalar_lea.vmem [#allocation13], %s1881_s0  ;;  %s771_s12 = scalar_lea.vmem [#allocation15], %s1881_s0  ;;  %s1881_s0 = sphi %s1979_s0, %s273_s0  }
  0x21   : > { %v280_v25 = vld [vmem:[#allocation17 + $0x8] sm:$0xff]  ;;  %vm282_vm14 = vcmp.gt.s32.totalorder %v278_v24, %v274_v22  ;;  %vm283_vm15 = vcmp.eq.s32.totalorder %v278_v24, %v274_v22  ;;  %v291_v26 = vld [vmem:[#allocation16 + $0x10] sm:$0xff]  ;;  %v293_v27 = vld [vmem:[#allocation17 + $0x10] sm:$0xff]  ;;  %s273_s0 = sadd.s32 1, %s1881_s0  }
  0x22   : > { %vm284_vm0 = vcmp.lt.s32.totalorder %v280_v25, %v275_v23  ;;  %v304_v30 = vld [vmem:[#allocation16 + $0x18] sm:$0xff]  ;;  %v306_v31 = vld [vmem:[#allocation17 + $0x18] sm:$0xff]  ;;  %v317_v34 = vld [vmem:[#allocation16 + $0x20] sm:$0xff]  ;;  %p270_p2 = scmp.ge.s32.totalorder %s273_s0, 16  }
  0x23   : > { %vm285_vm1 = vmand %vm283_vm15, %vm284_vm0  ;;  %v319_v35 = vld [vmem:[#allocation17 + $0x20] sm:$0xff]  ;;  %v330_v38 = vld [vmem:[#allocation16 + $0x28] sm:$0xff]  ;;  %s1892_s0 = smov (%p270_p2), [#allocation8]  }
  0x24   : > { %vm286_vm2 = vmor %vm282_vm14, %vm285_vm1  ;;  %v332_v39 = vld [vmem:[#allocation17 + $0x28] sm:$0xff]  ;;  %v343_v42 = vld [vmem:[#allocation16 + $0x30] sm:$0xff] }
  0x25   : > { %v287_v28 = vsel %vm286_vm2, %v278_v24, %v274_v22  ;;  %v288_v29 = vsel %vm286_vm2, %v280_v25, %v275_v23  ;;  %v345_v43 = vld [vmem:[#allocation17 + $0x30] sm:$0xff]  ;;  %v356_v46 = vld [vmem:[#allocation16 + $0x38] sm:$0xff]  ;;  %v358_v47 = vld [vmem:[#allocation17 + $0x38] sm:$0xff] }
  0x26   : > { %vm295_vm3 = vcmp.gt.s32.totalorder %v291_v26, %v287_v28  ;;  %vm296_vm4 = vcmp.eq.s32.totalorder %v291_v26, %v287_v28  ;;  %vm297_vm5 = vcmp.lt.s32.totalorder %v293_v27, %v288_v29  ;;  %v369_v50 = vld [vmem:[#allocation16 + $0x40] sm:$0xff]  ;;  %v371_v51 = vld [vmem:[#allocation17 + $0x40] sm:$0xff]  ;;  %v382_v54 = vld [vmem:[#allocation16 + $0x48] sm:$0xff] }
  0x27   : > { %vm298_vm6 = vmand %vm296_vm4, %vm297_vm5  ;;  %v384_v55 = vld [vmem:[#allocation17 + $0x48] sm:$0xff]  ;;  %v395_v58 = vld [vmem:[#allocation16 + $0x50] sm:$0xff] }
  0x28   : > { %vm299_vm7 = vmor %vm295_vm3, %vm298_vm6  ;;  %v397_v59 = vld [vmem:[#allocation17 + $0x50] sm:$0xff]  ;;  %v408_v62 = vld [vmem:[#allocation16 + $0x58] sm:$0xff] }
  0x29   : > { %v300_v32 = vsel %vm299_vm7, %v291_v26, %v287_v28  ;;  %v301_v33 = vsel %vm299_vm7, %v293_v27, %v288_v29  ;;  %v410_v63 = vld [vmem:[#allocation17 + $0x58] sm:$0xff]  ;;  %v421_v2 = vld [vmem:[#allocation16 + $0x60] sm:$0xff]  ;;  %v423_v3 = vld [vmem:[#allocation17 + $0x60] sm:$0xff] }
  0x2a   : > { %vm308_vm8 = vcmp.gt.s32.totalorder %v304_v30, %v300_v32  ;;  %vm309_vm9 = vcmp.eq.s32.totalorder %v304_v30, %v300_v32  ;;  %vm310_vm10 = vcmp.lt.s32.totalorder %v306_v31, %v301_v33  ;;  %v434_v7 = vld [vmem:[#allocation16 + $0x68] sm:$0xff]  ;;  %v436_v8 = vld [vmem:[#allocation17 + $0x68] sm:$0xff]  ;;  %v447_v12 = vld [vmem:[#allocation16 + $0x70] sm:$0xff] }
  0x2b   : > { %vm311_vm11 = vmand %vm309_vm9, %vm310_vm10  ;;  %v449_v13 = vld [vmem:[#allocation17 + $0x70] sm:$0xff] }
  0x2c   : > { %vm312_vm12 = vmor %vm308_vm8, %vm311_vm11 }
  0x2d   : > { %v313_v36 = vsel %vm312_vm12, %v304_v30, %v300_v32  ;;  %v314_v37 = vsel %vm312_vm12, %v306_v31, %v301_v33 }
  0x2e   : > { %vm321_vm13 = vcmp.gt.s32.totalorder %v317_v34, %v313_v36  ;;  %vm322_vm14 = vcmp.eq.s32.totalorder %v317_v34, %v313_v36  ;;  %vm323_vm15 = vcmp.lt.s32.totalorder %v319_v35, %v314_v37 }
  0x2f   : > { %vm324_vm0 = vmand %vm322_vm14, %vm323_vm15 }
  0x30   : > { %vm325_vm1 = vmor %vm321_vm13, %vm324_vm0 }
  0x31   : > { %v326_v40 = vsel %vm325_vm1, %v317_v34, %v313_v36  ;;  %v327_v41 = vsel %vm325_vm1, %v319_v35, %v314_v37 }
  0x32   : > { %vm334_vm2 = vcmp.gt.s32.totalorder %v330_v38, %v326_v40  ;;  %vm335_vm3 = vcmp.eq.s32.totalorder %v330_v38, %v326_v40  ;;  %vm336_vm4 = vcmp.lt.s32.totalorder %v332_v39, %v327_v41 }
  0x33   : > { %vm337_vm5 = vmand %vm335_vm3, %vm336_vm4 }
  0x34   : > { %vm338_vm6 = vmor %vm334_vm2, %vm337_vm5 }
  0x35   : > { %v339_v44 = vsel %vm338_vm6, %v330_v38, %v326_v40  ;;  %v340_v45 = vsel %vm338_vm6, %v332_v39, %v327_v41 }
  0x36   : > { %vm347_vm7 = vcmp.gt.s32.totalorder %v343_v42, %v339_v44  ;;  %vm348_vm8 = vcmp.eq.s32.totalorder %v343_v42, %v339_v44  ;;  %vm349_vm9 = vcmp.lt.s32.totalorder %v345_v43, %v340_v45 }
  0x37   : > { %vm350_vm10 = vmand %vm348_vm8, %vm349_vm9 }
  0x38   : > { %vm351_vm11 = vmor %vm347_vm7, %vm350_vm10 }
  0x39   : > { %v352_v48 = vsel %vm351_vm11, %v343_v42, %v339_v44  ;;  %v353_v49 = vsel %vm351_vm11, %v345_v43, %v340_v45 }
  0x3a   : > { %vm360_vm12 = vcmp.gt.s32.totalorder %v356_v46, %v352_v48  ;;  %vm361_vm13 = vcmp.eq.s32.totalorder %v356_v46, %v352_v48  ;;  %vm362_vm14 = vcmp.lt.s32.totalorder %v358_v47, %v353_v49 }
  0x3b   : > { %vm363_vm15 = vmand %vm361_vm13, %vm362_vm14 }
  0x3c   : > { %vm364_vm0 = vmor %vm360_vm12, %vm363_vm15 }
  0x3d   : > { %v365_v52 = vsel %vm364_vm0, %v356_v46, %v352_v48  ;;  %v366_v53 = vsel %vm364_vm0, %v358_v47, %v353_v49 }
  0x3e   : > { %vm373_vm1 = vcmp.gt.s32.totalorder %v369_v50, %v365_v52  ;;  %vm374_vm2 = vcmp.eq.s32.totalorder %v369_v50, %v365_v52  ;;  %vm375_vm3 = vcmp.lt.s32.totalorder %v371_v51, %v366_v53 }
  0x3f   : > { %vm376_vm4 = vmand %vm374_vm2, %vm375_vm3 }
  0x40   : > { %vm377_vm5 = vmor %vm373_vm1, %vm376_vm4 }
  0x41   : > { %v378_v56 = vsel %vm377_vm5, %v369_v50, %v365_v52  ;;  %v379_v57 = vsel %vm377_vm5, %v371_v51, %v366_v53 }
  0x42   : > { %vm386_vm6 = vcmp.gt.s32.totalorder %v382_v54, %v378_v56  ;;  %vm387_vm7 = vcmp.eq.s32.totalorder %v382_v54, %v378_v56  ;;  %vm388_vm8 = vcmp.lt.s32.totalorder %v384_v55, %v379_v57 }
  0x43   : > { %vm389_vm9 = vmand %vm387_vm7, %vm388_vm8 }
  0x44   : > { %vm390_vm10 = vmor %vm386_vm6, %vm389_vm9 }
  0x45   : > { %v391_v60 = vsel %vm390_vm10, %v382_v54, %v378_v56  ;;  %v392_v61 = vsel %vm390_vm10, %v384_v55, %v379_v57 }
  0x46   : > { %vm399_vm11 = vcmp.gt.s32.totalorder %v395_v58, %v391_v60  ;;  %vm400_vm12 = vcmp.eq.s32.totalorder %v395_v58, %v391_v60  ;;  %vm401_vm13 = vcmp.lt.s32.totalorder %v397_v59, %v392_v61 }
  0x47   : > { %vm402_vm14 = vmand %vm400_vm12, %vm401_vm13 }
  0x48   : > { %vm403_vm15 = vmor %vm399_vm11, %vm402_vm14 }
  0x49   : > { %v404_v0 = vsel %vm403_vm15, %v395_v58, %v391_v60  ;;  %v405_v1 = vsel %vm403_vm15, %v397_v59, %v392_v61 }
  0x4a   : > { %vm412_vm0 = vcmp.gt.s32.totalorder %v408_v62, %v404_v0  ;;  %vm413_vm1 = vcmp.eq.s32.totalorder %v408_v62, %v404_v0  ;;  %vm414_vm2 = vcmp.lt.s32.totalorder %v410_v63, %v405_v1 }
  0x4b   : > { %vm415_vm3 = vmand %vm413_vm1, %vm414_vm2 }
  0x4c   : > { %vm416_vm4 = vmor %vm412_vm0, %vm415_vm3 }
  0x4d   : > { %v417_v4 = vsel %vm416_vm4, %v408_v62, %v404_v0  ;;  %v418_v6 = vsel %vm416_vm4, %v410_v63, %v405_v1 }
  0x4e   : > { %vm425_vm5 = vcmp.gt.s32.totalorder %v421_v2, %v417_v4  ;;  %vm426_vm6 = vcmp.eq.s32.totalorder %v421_v2, %v417_v4  ;;  %vm427_vm7 = vcmp.lt.s32.totalorder %v423_v3, %v418_v6 }
  0x4f   : > { %vm428_vm8 = vmand %vm426_vm6, %vm427_vm7 }
  0x50   : > { %vm429_vm9 = vmor %vm425_vm5, %vm428_vm8 }
  0x51   : > { %v430_v9 = vsel %vm429_vm9, %v421_v2, %v417_v4  ;;  %v431_v10 = vsel %vm429_vm9, %v423_v3, %v418_v6 }
  0x52   : > { %vm438_vm10 = vcmp.gt.s32.totalorder %v434_v7, %v430_v9  ;;  %vm439_vm11 = vcmp.eq.s32.totalorder %v434_v7, %v430_v9  ;;  %vm440_vm12 = vcmp.lt.s32.totalorder %v436_v8, %v431_v10 }
  0x53   : > { %vm441_vm13 = vmand %vm439_vm11, %vm440_vm12 }
  0x54   : > { %vm442_vm14 = vmor %vm438_vm10, %vm441_vm13 }
  0x55   : > { %v443_v14 = vsel %vm442_vm14, %v434_v7, %v430_v9  ;;  %v444_v15 = vsel %vm442_vm14, %v436_v8, %v431_v10 }
  0x56   : > { %vm451_vm15 = vcmp.gt.s32.totalorder %v447_v12, %v443_v14  ;;  %vm452_vm0 = vcmp.eq.s32.totalorder %v447_v12, %v443_v14  ;;  %vm453_vm1 = vcmp.lt.s32.totalorder %v449_v13, %v444_v15 }
  0x57   : > { %vm454_vm2 = vmand %vm452_vm0, %vm453_vm1 }
  0x58   : > { %vm455_vm3 = vmor %vm451_vm15, %vm454_vm2 }
  0x59   : > { %v456_v16 = vsel %vm455_vm3, %v447_v12, %v443_v14  ;;  %v457_v17 = vsel %vm455_vm3, %v449_v13, %v444_v15 }
  0x5a   : > { %v459_v18 = vrot.slane %v456_v16, 2  ;;  %v460_v19 = vrot.slane %v457_v17, 2 }
  0x5c   : > { %vm462_vm4 = vcmp.gt.s32.totalorder %v459_v18, %v456_v16  ;;  %vm463_vm5 = vcmp.eq.s32.totalorder %v459_v18, %v456_v16  ;;  %vm464_vm6 = vcmp.lt.s32.totalorder %v460_v19, %v457_v17 }
  0x5d   : > { %vm465_vm7 = vmand %vm463_vm5, %vm464_vm6 }
  0x5e   : > { %vm466_vm8 = vmor %vm462_vm4, %vm465_vm7 }
  0x5f   : > { %v467_v20 = vsel %vm466_vm8, %v459_v18, %v456_v16  ;;  %v468_v21 = vsel %vm466_vm8, %v460_v19, %v457_v17 }
  0x60   : > { %v470_v22 = vrot.slane %v467_v20, 2  ;;  %v471_v23 = vrot.slane %v468_v21, 2 }
  0x62   : > { %vm473_vm9 = vcmp.gt.s32.totalorder %v470_v22, %v467_v20  ;;  %vm474_vm10 = vcmp.eq.s32.totalorder %v470_v22, %v467_v20  ;;  %vm475_vm11 = vcmp.lt.s32.totalorder %v471_v23, %v468_v21 }
  0x63   : > { %vm476_vm12 = vmand %vm474_vm10, %vm475_vm11 }
  0x64   : > { %vm477_vm13 = vmor %vm473_vm9, %vm476_vm12 }
  0x65   : > { %v478_v24 = vsel %vm477_vm13, %v470_v22, %v467_v20  ;;  %v479_v25 = vsel %vm477_vm13, %v471_v23, %v468_v21 }
  0x66   : > { %v481_v26 = vrot.slane %v478_v24, 2  ;;  %v482_v27 = vrot.slane %v479_v25, 2 }
  0x68   : > { %vm484_vm14 = vcmp.gt.s32.totalorder %v481_v26, %v478_v24  ;;  %vm485_vm15 = vcmp.eq.s32.totalorder %v481_v26, %v478_v24  ;;  %vm486_vm0 = vcmp.lt.s32.totalorder %v482_v27, %v479_v25 }
  0x69   : > { %vm487_vm1 = vmand %vm485_vm15, %vm486_vm0 }
  0x6a   : > { %vm488_vm2 = vmor %vm484_vm14, %vm487_vm1 }
  0x6b   : > { %v490_v28 = vsel %vm488_vm2, %v482_v27, %v479_v25  ;;  %v489_v29 = vsel %vm488_vm2, %v481_v26, %v478_v24 }
  0x6c   : > { %524 = vxpose.xlu1.b32.start [1/16] %v490_v28, 128  ;;  %492 = vxpose.xlu0.b32.start [1/16] %v489_v29, 128 }
  0x70   : > { %525 = vxpose.xlu1.b32.cont [2/16] %v490_v28, 128  ;;  %493 = vxpose.xlu0.b32.cont [2/16] %v489_v29, 128 }
  0x74   : > { %526 = vxpose.xlu1.b32.cont [3/16] %v490_v28, 128  ;;  %494 = vxpose.xlu0.b32.cont [3/16] %v489_v29, 128 }
  0x78   : > { %527 = vxpose.xlu1.b32.cont [4/16] %v490_v28, 128  ;;  %495 = vxpose.xlu0.b32.cont [4/16] %v489_v29, 128 }
  0x7c   : > { %528 = vxpose.xlu1.b32.cont [5/16] %v490_v28, 128  ;;  %496 = vxpose.xlu0.b32.cont [5/16] %v489_v29, 128 }
  0x80   : > { %529 = vxpose.xlu1.b32.cont [6/16] %v490_v28, 128  ;;  %497 = vxpose.xlu0.b32.cont [6/16] %v489_v29, 128 }
  0x84   : > { %530 = vxpose.xlu1.b32.cont [7/16] %v490_v28, 128  ;;  %498 = vxpose.xlu0.b32.cont [7/16] %v489_v29, 128 }
  0x88   : > { %531 = vxpose.xlu1.b32.cont [8/16] %v490_v28, 128  ;;  %499 = vxpose.xlu0.b32.cont [8/16] %v489_v29, 128 }
  0x8c   : > { %532 = vxpose.xlu1.b32.cont [9/16] %v490_v28, 128  ;;  %500 = vxpose.xlu0.b32.cont [9/16] %v489_v29, 128 }
  0x90   : > { %533 = vxpose.xlu1.b32.cont [10/16] %v490_v28, 128  ;;  %501 = vxpose.xlu0.b32.cont [10/16] %v489_v29, 128 }
  0x94   : > { %534 = vxpose.xlu1.b32.cont [11/16] %v490_v28, 128  ;;  %502 = vxpose.xlu0.b32.cont [11/16] %v489_v29, 128 }
  0x98   : > { %535 = vxpose.xlu1.b32.cont [12/16] %v490_v28, 128  ;;  %503 = vxpose.xlu0.b32.cont [12/16] %v489_v29, 128 }
  0x9c   : > { %536 = vxpose.xlu1.b32.cont [13/16] %v490_v28, 128  ;;  %504 = vxpose.xlu0.b32.cont [13/16] %v489_v29, 128 }
  0xa0   : > { %537 = vxpose.xlu1.b32.cont [14/16] %v490_v28, 128  ;;  %505 = vxpose.xlu0.b32.cont [14/16] %v489_v29, 128 }
  0xa4   : > { %538 = vxpose.xlu1.b32.cont [15/16] %v490_v28, 128  ;;  %506 = vxpose.xlu0.b32.cont [15/16] %v489_v29, 128 }
  0xa8   : > { %539 = vxpose.xlu1.b32.end [16/16] %v490_v28, 128  ;;  %507 = vxpose.xlu0.b32.end [16/16] %v489_v29, 128 }
  0xec   : > { %v540_v30 = vpop.trf.xlu1  ;;  %v508_v31 = vpop.trf.xlu0 }
  0xf0   : > { %v541_v32 = vpop.trf.xlu1  ;;  %v509_v33 = vpop.trf.xlu0 }
  0xf1   : > { %vm560_vm3 = vcmp.lt.s32.totalorder %v541_v32, %v540_v30  ;;  %vm558_vm4 = vcmp.gt.s32.totalorder %v509_v33, %v508_v31  ;;  %vm559_vm5 = vcmp.eq.s32.totalorder %v509_v33, %v508_v31 }
  0xf2   : > { %vm561_vm6 = vmand %vm559_vm5, %vm560_vm3 }
  0xf3   : > { %vm562_vm7 = vmor %vm558_vm4, %vm561_vm6 }
  0xf4   : > { %v563_v34 = vsel %vm562_vm7, %v509_v33, %v508_v31  ;;  %v542_v35 = vpop.trf.xlu1  ;;  %v564_v36 = vsel %vm562_vm7, %v541_v32, %v540_v30  ;;  %v510_v37 = vpop.trf.xlu0 }
  0xf5   : > { %vm569_vm8 = vcmp.lt.s32.totalorder %v542_v35, %v564_v36  ;;  %vm567_vm9 = vcmp.gt.s32.totalorder %v510_v37, %v563_v34  ;;  %vm568_vm10 = vcmp.eq.s32.totalorder %v510_v37, %v563_v34 }
  0xf6   : > { %vm570_vm11 = vmand %vm568_vm10, %vm569_vm8 }
  0xf7   : > { %vm571_vm12 = vmor %vm567_vm9, %vm570_vm11 }
  0xf8   : > { %v572_v38 = vsel %vm571_vm12, %v510_v37, %v563_v34  ;;  %v543_v39 = vpop.trf.xlu1  ;;  %v573_v40 = vsel %vm571_vm12, %v542_v35, %v564_v36  ;;  %v511_v41 = vpop.trf.xlu0 }
  0xf9   : > { %vm578_vm13 = vcmp.lt.s32.totalorder %v543_v39, %v573_v40  ;;  %vm576_vm14 = vcmp.gt.s32.totalorder %v511_v41, %v572_v38  ;;  %vm577_vm15 = vcmp.eq.s32.totalorder %v511_v41, %v572_v38 }
  0xfa   : > { %vm579_vm0 = vmand %vm577_vm15, %vm578_vm13 }
  0xfb   : > { %vm580_vm1 = vmor %vm576_vm14, %vm579_vm0 }
  0xfc   : > { %v581_v42 = vsel %vm580_vm1, %v511_v41, %v572_v38  ;;  %v544_v43 = vpop.trf.xlu1  ;;  %v582_v44 = vsel %vm580_vm1, %v543_v39, %v573_v40  ;;  %v512_v45 = vpop.trf.xlu0 }
  0xfd   : > { %vm587_vm2 = vcmp.lt.s32.totalorder %v544_v43, %v582_v44  ;;  %vm585_vm3 = vcmp.gt.s32.totalorder %v512_v45, %v581_v42  ;;  %vm586_vm4 = vcmp.eq.s32.totalorder %v512_v45, %v581_v42 }
  0xfe   : > { %vm588_vm5 = vmand %vm586_vm4, %vm587_vm2 }
  0xff   : > { %vm589_vm6 = vmor %vm585_vm3, %vm588_vm5 }
 0x100   : > { %v590_v46 = vsel %vm589_vm6, %v512_v45, %v581_v42  ;;  %v545_v47 = vpop.trf.xlu1  ;;  %v591_v48 = vsel %vm589_vm6, %v544_v43, %v582_v44  ;;  %v513_v49 = vpop.trf.xlu0 }
 0x101   : > { %vm596_vm7 = vcmp.lt.s32.totalorder %v545_v47, %v591_v48  ;;  %vm594_vm8 = vcmp.gt.s32.totalorder %v513_v49, %v590_v46  ;;  %vm595_vm9 = vcmp.eq.s32.totalorder %v513_v49, %v590_v46 }
 0x102   : > { %vm597_vm10 = vmand %vm595_vm9, %vm596_vm7 }
 0x103   : > { %vm598_vm11 = vmor %vm594_vm8, %vm597_vm10 }
 0x104   : > { %v599_v50 = vsel %vm598_vm11, %v513_v49, %v590_v46  ;;  %v546_v51 = vpop.trf.xlu1  ;;  %v600_v52 = vsel %vm598_vm11, %v545_v47, %v591_v48  ;;  %v514_v53 = vpop.trf.xlu0 }
 0x105   : > { %vm605_vm12 = vcmp.lt.s32.totalorder %v546_v51, %v600_v52  ;;  %vm603_vm13 = vcmp.gt.s32.totalorder %v514_v53, %v599_v50  ;;  %vm604_vm14 = vcmp.eq.s32.totalorder %v514_v53, %v599_v50 }
 0x106   : > { %vm606_vm15 = vmand %vm604_vm14, %vm605_vm12 }
 0x107   : > { %vm607_vm0 = vmor %vm603_vm13, %vm606_vm15 }
 0x108   : > { %v608_v54 = vsel %vm607_vm0, %v514_v53, %v599_v50  ;;  %v547_v55 = vpop.trf.xlu1  ;;  %v609_v56 = vsel %vm607_vm0, %v546_v51, %v600_v52  ;;  %v515_v57 = vpop.trf.xlu0 }
 0x109   : > { %vm614_vm1 = vcmp.lt.s32.totalorder %v547_v55, %v609_v56  ;;  %vm612_vm2 = vcmp.gt.s32.totalorder %v515_v57, %v608_v54  ;;  %vm613_vm3 = vcmp.eq.s32.totalorder %v515_v57, %v608_v54 }
 0x10a   : > { %vm615_vm4 = vmand %vm613_vm3, %vm614_vm1 }
 0x10b   : > { %vm616_vm5 = vmor %vm612_vm2, %vm615_vm4 }
 0x10c   : > { %v617_v58 = vsel %vm616_vm5, %v515_v57, %v608_v54  ;;  %v548_v59 = vpop.trf.xlu1  ;;  %v618_v60 = vsel %vm616_vm5, %v547_v55, %v609_v56  ;;  %v516_v61 = vpop.trf.xlu0 }
 0x10d   : > { %vm623_vm6 = vcmp.lt.s32.totalorder %v548_v59, %v618_v60  ;;  %vm621_vm7 = vcmp.gt.s32.totalorder %v516_v61, %v617_v58  ;;  %vm622_vm8 = vcmp.eq.s32.totalorder %v516_v61, %v617_v58 }
 0x10e   : > { %vm624_vm9 = vmand %vm622_vm8, %vm623_vm6 }
 0x10f   : > { %vm625_vm10 = vmor %vm621_vm7, %vm624_vm9 }
 0x110   : > { %v626_v62 = vsel %vm625_vm10, %v516_v61, %v617_v58  ;;  %v549_v63 = vpop.trf.xlu1  ;;  %v627_v0 = vsel %vm625_vm10, %v548_v59, %v618_v60  ;;  %v517_v1 = vpop.trf.xlu0  ;;  %v1887_v61 = vmov 2147483648  }
 0x111   : > { %vm632_vm11 = vcmp.lt.s32.totalorder %v549_v63, %v627_v0  ;;  %vm630_vm12 = vcmp.gt.s32.totalorder %v517_v1, %v626_v62  ;;  %vm631_vm13 = vcmp.eq.s32.totalorder %v517_v1, %v626_v62 }
 0x112   : > { %vm633_vm14 = vmand %vm631_vm13, %vm632_vm11 }
 0x113   : > { %vm634_vm15 = vmor %vm630_vm12, %vm633_vm14 }
 0x114   : > { %v635_v2 = vsel %vm634_vm15, %v517_v1, %v626_v62  ;;  %v550_v3 = vpop.trf.xlu1  ;;  %v636_v4 = vsel %vm634_vm15, %v549_v63, %v627_v0  ;;  %v518_v6 = vpop.trf.xlu0  ;;  %v1888_v62 = vmov 2147483647  }
 0x115   : > { %vm641_vm0 = vcmp.lt.s32.totalorder %v550_v3, %v636_v4  ;;  %vm639_vm1 = vcmp.gt.s32.totalorder %v518_v6, %v635_v2  ;;  %vm640_vm2 = vcmp.eq.s32.totalorder %v518_v6, %v635_v2 }
 0x116   : > { %vm642_vm3 = vmand %vm640_vm2, %vm641_vm0 }
 0x117   : > { %vm643_vm4 = vmor %vm639_vm1, %vm642_vm3 }
 0x118   : > { %v644_v7 = vsel %vm643_vm4, %v518_v6, %v635_v2  ;;  %v551_v8 = vpop.trf.xlu1  ;;  %v645_v9 = vsel %vm643_vm4, %v550_v3, %v636_v4  ;;  %v519_v10 = vpop.trf.xlu0  ;;  %v869_v6 = vld [vmem:[#allocation12] sm:$0xff] (%p270_p2) }
 0x119   : > { %vm650_vm5 = vcmp.lt.s32.totalorder %v551_v8, %v645_v9  ;;  %vm648_vm6 = vcmp.gt.s32.totalorder %v519_v10, %v644_v7  ;;  %vm649_vm7 = vcmp.eq.s32.totalorder %v519_v10, %v644_v7 }
 0x11a   : > { %vm651_vm8 = vmand %vm649_vm7, %vm650_vm5 }
 0x11b   : > { %vm652_vm9 = vmor %vm648_vm6, %vm651_vm8 }
 0x11c   : > { %v653_v12 = vsel %vm652_vm9, %v519_v10, %v644_v7  ;;  %v552_v13 = vpop.trf.xlu1  ;;  %v654_v14 = vsel %vm652_vm9, %v551_v8, %v645_v9  ;;  %v520_v15 = vpop.trf.xlu0  ;;  %v870_v7 = vld [vmem:[#allocation14] sm:$0xff] (%p270_p2)  ;;  %v890_v8 = vld [vmem:[#allocation12 + $0x8] sm:$0xff] (%p270_p2)  ;;  %v1889_v10 = vmov (%p270_p2), 839939668  }
 0x11d   : > { %vm659_vm10 = vcmp.lt.s32.totalorder %v552_v13, %v654_v14  ;;  %vm657_vm11 = vcmp.gt.s32.totalorder %v520_v15, %v653_v12  ;;  %vm658_vm12 = vcmp.eq.s32.totalorder %v520_v15, %v653_v12  ;;  %v892_v9 = vld [vmem:[#allocation14 + $0x8] sm:$0xff] (%p270_p2) }
 0x11e   : > { %vm660_vm13 = vmand %vm658_vm12, %vm659_vm10 }
 0x11f   : > { %vm661_vm14 = vmor %vm657_vm11, %vm660_vm13 }
 0x120   : > { %v662_v16 = vsel %vm661_vm14, %v520_v15, %v653_v12  ;;  %v553_v17 = vpop.trf.xlu1  ;;  %v663_v18 = vsel %vm661_vm14, %v552_v13, %v654_v14  ;;  %v521_v19 = vpop.trf.xlu0  ;;  %v945_v12 = vunpack.c.l.s4 (%p270_p2), %v1889_v10 }
 0x121   : > { %vm668_vm15 = vcmp.lt.s32.totalorder %v553_v17, %v663_v18  ;;  %vm666_vm0 = vcmp.gt.s32.totalorder %v521_v19, %v662_v16  ;;  %vm667_vm1 = vcmp.eq.s32.totalorder %v521_v19, %v662_v16 }
 0x122   : > { %vm669_vm2 = vmand %vm667_vm1, %vm668_vm15  ;;  %v946_v13 = vunpack.c.0.s8 (%p270_p2), %v945_v12 }
 0x123   : > { %vm670_vm3 = vmor %vm666_vm0, %vm669_vm2 }
 0x124   : > { %v671_v20 = vsel %vm670_vm3, %v521_v19, %v662_v16  ;;  %v554_v21 = vpop.trf.xlu1  ;;  %v672_v22 = vsel %vm670_vm3, %v553_v17, %v663_v18  ;;  %v522_v23 = vpop.trf.xlu0  ;;  %v1890_v17 = vmov (%p270_p2), 1417023538  }
 0x125   : > { %vm677_vm4 = vcmp.lt.s32.totalorder %v554_v21, %v672_v22  ;;  %vm675_vm5 = vcmp.gt.s32.totalorder %v522_v23, %v671_v20  ;;  %vm676_vm6 = vcmp.eq.s32.totalorder %v522_v23, %v671_v20  ;;  %v973_v18 = vunpack.c.l.s4 (%p270_p2), %v1890_v17 }
 0x126   : > { %vm678_vm7 = vmand %vm676_vm6, %vm677_vm4 }
 0x127   : > { %vm679_vm8 = vmor %vm675_vm5, %vm678_vm7 }
 0x128   : > { %v680_v24 = vsel %vm679_vm8, %v522_v23, %v671_v20  ;;  %v555_v25 = vpop.trf.xlu1  ;;  %v681_v26 = vsel %vm679_vm8, %v554_v21, %v672_v22  ;;  %v523_v27 = vpop.trf.xlu0  ;;  %v2000_v23 = vsub.s32 (%p270_p2), %v946_v13, %v1924_v11 }
 0x129   : > { %vm686_vm9 = vcmp.lt.s32.totalorder %v555_v25, %v681_v26  ;;  %vm684_vm10 = vcmp.gt.s32.totalorder %v523_v27, %v680_v24  ;;  %vm685_vm11 = vcmp.eq.s32.totalorder %v523_v27, %v680_v24 }
 0x12a   : > { %vm687_vm12 = vmand %vm685_vm11, %vm686_vm9 }
 0x12b   : > { %vm688_vm13 = vmor %vm684_vm10, %vm687_vm12 }
 0x12c   : > { %v689_v28 = vsel %vm688_vm13, %v523_v27, %v680_v24  ;;  %v690_v29 = vsel %vm688_vm13, %v555_v25, %v681_v26  ;;  %v966_v24 = vand.u32 (%p270_p2), 4, %v1924_v11  ;;  %v974_v25 = vunpack.c.0.s8 (%p270_p2), %v973_v18 }
 0x12d   : > { %v692_v30 = vrot.slane %v689_v28, 1  ;;  %v693_v31 = vrot.slane %v690_v29, 1 }
 0x12f   : > { %vm695_vm14 = vcmp.gt.s32.totalorder %v692_v30, %v689_v28  ;;  %vm696_vm15 = vcmp.eq.s32.totalorder %v692_v30, %v689_v28  ;;  %vm697_vm0 = vcmp.lt.s32.totalorder %v693_v31, %v690_v29 }
 0x130   : > { %vm698_vm1 = vmand %vm696_vm15, %vm697_vm0 }
 0x131   : > { %vm699_vm2 = vmor %vm695_vm14, %vm698_vm1 }
 0x132   : > { %v700_v32 = vsel %vm699_vm2, %v692_v30, %v689_v28  ;;  %v701_v33 = vsel %vm699_vm2, %v693_v31, %v690_v29 }
 0x133   : > { %v703_v34 = vrot.slane %v700_v32, 1  ;;  %v704_v35 = vrot.slane %v701_v33, 1 }
 0x135   : > { %vm706_vm3 = vcmp.gt.s32.totalorder %v703_v34, %v700_v32  ;;  %vm707_vm4 = vcmp.eq.s32.totalorder %v703_v34, %v700_v32  ;;  %vm708_vm5 = vcmp.lt.s32.totalorder %v704_v35, %v701_v33 }
 0x136   : > { %vm709_vm6 = vmand %vm707_vm4, %vm708_vm5 }
 0x137   : > { %vm710_vm7 = vmor %vm706_vm3, %vm709_vm6 }
 0x138   : > { %v711_v36 = vsel %vm710_vm7, %v703_v34, %v700_v32  ;;  %v712_v37 = vsel %vm710_vm7, %v704_v35, %v701_v33  ;;  %v2229_v33 = vmov (%p270_p2), 0 }
 0x139   : > { %v714_v38 = vrot.slane %v711_v36, 1  ;;  %v715_v39 = vrot.slane %v712_v37, 1 }
 0x13b   : > { %vm719_vm8 = vcmp.lt.s32.totalorder %v715_v39, %v712_v37  ;;  %vm717_vm9 = vcmp.gt.s32.totalorder %v714_v38, %v711_v36  ;;  %vm718_vm10 = vcmp.eq.s32.totalorder %v714_v38, %v711_v36 }
 0x13c   : > { %vm720_vm11 = vmand %vm718_vm10, %vm719_vm8 }
 0x13d   : > { %vm721_vm12 = vmor %vm717_vm9, %vm720_vm11 }
 0x13e   : > { %v722_v40 = vsel %vm721_vm12, %v714_v38, %v711_v36  ;;  %v723_v41 = vsel %vm721_vm12, %v715_v39, %v712_v37  ;;  %v1891_v37 = vmov (%p270_p2), 1732584193   ;;  %v2028_v39 = vsub.s32 (%p270_p2), %v974_v25, %v1924_v11 }
 0x13f   : > { %v725_v42 = vrot.slane %v722_v40, 1  ;;  %v726_v43 = vrot.slane %v723_v41, 1  ;;  %v1001_v38 = vunpack.c.l.s4 (%p270_p2), %v1891_v37 }
 0x141   : > { %vm728_vm13 = vcmp.gt.s32.totalorder %v725_v42, %v722_v40  ;;  %vm729_vm14 = vcmp.eq.s32.totalorder %v725_v42, %v722_v40  ;;  %vm730_vm15 = vcmp.lt.s32.totalorder %v726_v43, %v723_v41 }
 0x142   : > { %vm731_vm0 = vmand %vm729_vm14, %vm730_vm15 }
 0x143   : > { %vm732_vm1 = vmor %vm728_vm13, %vm731_vm0 }
 0x144   : > { %v733_v44 = vsel %vm732_vm1, %v725_v42, %v722_v40  ;;  %v734_v45 = vsel %vm732_vm1, %v726_v43, %v723_v41  ;;  %v994_v41 = vand.u32 (%p270_p2), 2, %v1924_v11 }
 0x145   : > { %v736_v46 = vrot.slane %v733_v44, 1  ;;  %v737_v47 = vrot.slane %v734_v45, 1 }
 0x147   : > { %vm739_vm2 = vcmp.gt.s32.totalorder %v736_v46, %v733_v44  ;;  %vm740_vm3 = vcmp.eq.s32.totalorder %v736_v46, %v733_v44  ;;  %vm741_vm4 = vcmp.lt.s32.totalorder %v737_v47, %v734_v45 }
 0x148   : > { %vm742_vm5 = vmand %vm740_vm3, %vm741_vm4 }
 0x149   : > { %vm743_vm6 = vmor %vm739_vm2, %vm742_vm5 }
 0x14a   : > { %v744_v48 = vsel %vm743_vm6, %v736_v46, %v733_v44  ;;  %v745_v49 = vsel %vm743_vm6, %v737_v47, %v734_v45  ;;  %v1002_v46 = vunpack.c.0.s8 (%p270_p2), %v1001_v38 }
 0x14b   : > { %v747_v50 = vrot.slane %v744_v48, 1  ;;  %v748_v51 = vrot.slane %v745_v49, 1 }
 0x14d   : > { %vm750_vm7 = vcmp.gt.s32.totalorder %v747_v50, %v744_v48  ;;  %vm751_vm8 = vcmp.eq.s32.totalorder %v747_v50, %v744_v48  ;;  %vm752_vm9 = vcmp.lt.s32.totalorder %v748_v51, %v745_v49 }
 0x14e   : > { %vm753_vm10 = vmand %vm751_vm8, %vm752_vm9 }
 0x14f   : > { %vm754_vm11 = vmor %vm750_vm7, %vm753_vm10 }
 0x150   : > { %v755_v52 = vsel %vm754_vm11, %v747_v50, %v744_v48  ;;  %v756_v53 = vsel %vm754_vm11, %v748_v51, %v745_v49  ;;  %v2231_v49 = vmov (%p270_p2), 0 }
 0x151   : > { %v758_v54 = vrot.slane %v755_v52, 1  ;;  %v759_v55 = vrot.slane %v756_v53, 1 }
 0x153   : > { %vm761_vm12 = vcmp.gt.s32.totalorder %v758_v54, %v755_v52  ;;  %vm762_vm13 = vcmp.eq.s32.totalorder %v758_v54, %v755_v52  ;;  %vm763_vm14 = vcmp.lt.s32.totalorder %v759_v55, %v756_v53 }
 0x154   : > { %vm764_vm15 = vmand %vm762_vm13, %vm763_vm14 }
 0x155   : > { %vm765_vm0 = vmor %vm761_vm12, %vm764_vm15 }
 0x156   : > { %v767_v56 = vsel %vm765_vm0, %v759_v55, %v756_v53  ;;  %v766_v57 = vsel %vm765_vm0, %v758_v54, %v755_v52  ;;  %v2058_v52 = vsub.s32 (%p270_p2), %v1002_v46, %v1924_v11 }
 0x157   : > { %774 = vxpose.xlu0.b32.start.end [1/1] (short) (narrow) %v767_v56, 8  ;;  %770 = vst [vmem:[%s769_s11] sm:$0x1] %v766_v57  ;;  %772 = vst [vmem:[%s771_s12] sm:$0x1] %v767_v56  ;;  %v1022_v56 = vand.u32 (%p270_p2), 1, %v1924_v11  ;;  %v2237_v11 = vmov (%p270_p2), 0  ;;  %s1758_s11 = sshll.u32 (%p270_p2), %s1892_s0, 4  ;;  %s1759_s11 = int_to_ptr.vmem [resolvable:$true] %s1758_s11 }
 0x158   :  { %s1851_s12 = scalar_lea.vmem (%p270_p2), %s1759_s11, 32  ;;  %p1856_p4 = scmp.lt.s32.totalorder (%p270_p2), %s1759_s11, %s1759_s11 }
 0x159   :  { %p1852_p3 = scmp.ne.s32.totalorder (%p270_p2), %s1759_s11, %s1851_s12  ;;  %p1857_p5 = scmp.lt.s32.totalorder (%p270_p2), %s1851_s12, %s1851_s12 }
 0x15b   :  { %p1858_p6 = por (%p270_p2), %p1857_p5, %p1856_p4 }
 0x15d   :  { %p1859_p7 = pnand (%p270_p2), %p1858_p6, %p1852_p3 }
 0x15e   :  { %v856_v1 = vld [vmem:[#allocation13 + $0x7] ss:$-1 sm:$0xff] (%p270_p2)  ;;  %v858_v2 = vld [vmem:[#allocation13 + $0xf] ss:$-1 sm:$0xff] (%p270_p2) }
 0x15f   :  { %v863_v3 = vld [vmem:[#allocation15 + $0x7] ss:$-1 sm:$0xff] (%p270_p2)  ;;  %v865_v4 = vld [vmem:[#allocation15 + $0xf] ss:$-1 sm:$0xff] (%p270_p2)  ;;  %vm875_vm3 = vcmp.gt.s32.totalorder (%p270_p2), %v869_v6, %v858_v2  ;;  %vm876_vm4 = vcmp.eq.s32.totalorder (%p270_p2), %v869_v6, %v858_v2  ;;  %vm899_vm7 = vcmp.gt.s32.totalorder (%p270_p2), %v890_v8, %v856_v1  ;;  %vm900_vm8 = vcmp.eq.s32.totalorder (%p270_p2), %v890_v8, %v856_v1 }
 0x160   :  { %vm877_vm5 = vcmp.lt.s32.totalorder (%p270_p2), %v870_v7, %v865_v4  ;;  %vm901_vm9 = vcmp.lt.s32.totalorder (%p270_p2), %v892_v9, %v863_v3 }
 0x161   :  { %vm878_vm6 = vmand (%p270_p2), %vm876_vm4, %vm877_vm5 }
 0x162   :  { %vm879_vm10 = vmor (%p270_p2), %vm875_vm3, %vm878_vm6 }
 0x163   :  { %v880_v14 = vsel (%p270_p2), %vm879_vm10, %v869_v6, %v858_v2  ;;  %vm902_vm11 = vmand (%p270_p2), %vm900_vm8, %vm901_vm9  ;;  %v1991_v15 = vsel (%p270_p2), %vm879_vm10, %v858_v2, %v869_v6  ;;  %v1993_v16 = vsel (%p270_p2), %vm879_vm10, %v865_v4, %v870_v7 }
 0x164   :  { %vm903_vm12 = vmor (%p270_p2), %vm899_vm7, %vm902_vm11  ;;  %vm2015_vm7 = vcmp.ne.s32.totalorder (%p270_p2), %v966_v24, 0 }
 0x165   :  { %v905_v19 = vsel (%p270_p2), %vm903_vm12, %v890_v8, %v856_v1  ;;  %v1995_v20 = vsel (%p270_p2), %vm903_vm12, %v856_v1, %v890_v8  ;;  %v911_v21 = vsel (%p270_p2), %vm903_vm12, %v892_v9, %v863_v3  ;;  %v1997_v22 = vsel (%p270_p2), %vm903_vm12, %v863_v3, %v892_v9 }
 0x166   :  { %vm926_vm13 = vcmp.gt.s32.totalorder (%p270_p2), %v880_v14, %v905_v19  ;;  %vm927_vm14 = vcmp.eq.s32.totalorder (%p270_p2), %v880_v14, %v905_v19  ;;  %vm1313_vm4 = vcmp.lt.s32.totalorder (%p270_p2), %v1993_v16, %v1997_v22  ;;  %v2230_v33 = vsel (%p270_p2), %vm2015_vm7, 4294967295, %v2229_v33 }
 0x1d7   : > { %v790_v58 = vpop.trf.xlu0 }
 0x1d8   : > { %v829_v59 = vrot.slane %v790_v58, 1  ;;  %1828 = vpush %v790_v58 }
 0x1da   : > { %1830 = vpush %v829_v59 }
 0x209   : > { %s1829_s13 = spop %1828 }
 0x20a   : > { %s807_s14 = sshrl.u32 %s1829_s13, 9  ;;  %s809_s15 = ssub.s32 0, %s1829_s13 }
 0x20b   : > { %p808_p0 = scmp.lt.s32.totalorder %s1829_s13, 0  ;;  %s1820_s16 = smin.u32 %s1829_s13, %s809_s15 }
 0x20c   : > { %s811_s17 = sand.u32 511, %s1820_s16   ;;  %s1822_s18 = sshll.u32 %s807_s14, 3 }
 0x20d   : > { %s812_s19 = ssub.s32 0, %s811_s17  ;;  %s1831_s20 = spop %1830 }
 0x20e   : > { %s2248_s19 = smov (!%p808_p0, %s812_s19), %s811_s17  ;;  %s833_s24 = ssub.s32 0, %s1831_s20 }
 0x20f   : > { %s814_s21 = sshrl.u32 %s2248_s19, 7  ;;  %s816_s22 = sand.u32 127, %s2248_s19  }
 0x210   : > { %s1821_s23 = sshll.u32 %s814_s21, 8  ;;  %s1824_s26 = smin.u32 %s1831_s20, %s833_s24 }
 0x211   : > { %s817_s25 = sadd.s32 %s1821_s23, %s816_s22  ;;  %p832_p1 = scmp.lt.s32.totalorder %s1831_s20, 0 }
 0x212   : > { %v819_v60 = vstv %s817_s25  ;;  %s835_s27 = sand.u32 511, %s1824_s26   ;;  %s823_s29 = scalar_lea.vmem [#allocation16], %s1822_s18 }
 0x213   : > { %vm821_vm1 = vcmp.eq.s32.totalorder %v64_v5, %v819_v60  ;;  %s836_s28 = ssub.s32 0, %s835_s27  ;;  %s826_s30 = scalar_lea.vmem [#allocation17], %s1822_s18 }
 0x214   : > { %824 = vst.msk [vmem:[%s823_s29] sm:$0xff] %vm821_vm1, %v1887_v61  ;;  %827 = vst.msk [vmem:[%s826_s30] sm:$0xff] %vm821_vm1, %v1888_v62  ;;  %s2250_s28 = smov (!%p832_p1, %s836_s28), %s835_s27  ;;  %s831_s3 = sshrl.u32 %s1831_s20, 9  ;;  %vm1311_vm1 = vcmp.gt.s32.totalorder (%p270_p2), %v1991_v15, %v1995_v20 }
 0x215   : > { %s838_s4 = sshrl.u32 %s2250_s28, 7  ;;  %s840_s5 = sand.u32 127, %s2250_s28  }
 0x216   : > { %s1825_s6 = sshll.u32 %s838_s4, 8  ;;  %s1826_s8 = sshll.u32 %s831_s3, 3 }
 0x217   : > { %s841_s7 = sadd.s32 %s1825_s6, %s840_s5  ;;  %s847_s9 = scalar_lea.vmem [#allocation16], %s1826_s8 }
 0x218   : > { %v843_v63 = vstv %s841_s7  ;;  %s850_s10 = scalar_lea.vmem [#allocation17], %s1826_s8 }
 0x219   : > { %v844_v0 = vadd.s32 128, %v843_v63  ;;  %272 = sbr.rel (!%p270_p2) target bundleno = 32 (0x20), region = 171 }
 0x21b   : > { %vm845_vm2 = vcmp.eq.s32.totalorder %v64_v5, %v844_v0  ;;  %v884_v5 = vsel (%p270_p2), %vm879_vm10, %v870_v7, %v865_v4 }
 0x21c   : > { %848 = vst.msk [vmem:[%s847_s9] sm:$0xff] %vm845_vm2, %v1887_v61  ;;  %851 = vst.msk [vmem:[%s850_s10] sm:$0xff] %vm845_vm2, %v1888_v62  ;;  %vm928_vm15 = vcmp.lt.s32.totalorder (%p270_p2), %v884_v5, %v911_v21  ;;  %vm1312_vm2 = vcmp.eq.s32.totalorder (%p270_p2), %v1991_v15, %v1995_v20 }
 0x21d   :  { %vm929_vm0 = vmand (%p270_p2), %vm927_vm14, %vm928_vm15 }
 0x21e   :  { %vm930_vm3 = vmor (%p270_p2), %vm926_vm13, %vm929_vm0 }
 0x21f   :  { %v931_v26 = vsel (%p270_p2), %vm930_vm3, %v880_v14, %v905_v19  ;;  %v933_v27 = vsel (%p270_p2), %vm930_vm3, %v905_v19, %v880_v14  ;;  %v935_v28 = vsel (%p270_p2), %vm930_vm3, %v884_v5, %v911_v21  ;;  %v937_v29 = vsel (%p270_p2), %vm930_vm3, %v911_v21, %v884_v5  ;;  %vm1314_vm5 = vmand (%p270_p2), %vm1312_vm2, %vm1313_vm4 }
 0x220   :  { %v950_v30 = vrot.slane %v931_v26, %v2000_v23  ;;  %v957_v31 = vrot.slane %v935_v28, %v2000_v23  ;;  %vm2011_vm6 = vmor %vm1311_vm1, %vm1314_vm5  ;;  %v1131_v34 = vrot.slane %v933_v27, %v2000_v23  ;;  %v1138_v35 = vrot.slane %v937_v29, %v2000_v23 }
 0x221   :  { %v2025_v36 = vsel %vm2011_vm6, %v1991_v15, %v1995_v20  ;;  %v2034_v40 = vsel %vm2011_vm6, %v1993_v16, %v1997_v22  ;;  %vm2047_vm5 = vcmp.ne.s32.totalorder %v994_v41, 0  ;;  %v2102_v13 = vsel %vm2011_vm6, %v1995_v20, %v1991_v15 }
 0x222   :  { %vm959_vm8 = vcmp.gt.s32.totalorder %v931_v26, %v950_v30  ;;  %vm960_vm9 = vcmp.eq.s32.totalorder %v931_v26, %v950_v30  ;;  %vm961_vm10 = vcmp.lt.s32.totalorder %v935_v28, %v957_v31  ;;  %vm1141_vm12 = vcmp.eq.s32.totalorder %v933_v27, %v1131_v34 }
 0x223   :  { %vm962_vm11 = vmand %vm960_vm9, %vm961_vm10  ;;  %vm1142_vm13 = vcmp.lt.s32.totalorder %v937_v29, %v1138_v35  ;;  %vm1140_vm15 = vcmp.gt.s32.totalorder %v933_v27, %v1131_v34  ;;  %v1335_v42 = vrot.slane %v2025_v36, %v2000_v23  ;;  %v1342_v43 = vrot.slane %v2034_v40, %v2000_v23 }
 0x224   :  { %vm963_vm14 = vmor %vm959_vm8, %vm962_vm11  ;;  %v2232_v49 = vsel %vm2047_vm5, 4294967295, %v2231_v49  ;;  %v2108_v14 = vsel %vm2011_vm6, %v1997_v22, %v1993_v16  ;;  %v2118_v15 = vrot.slane %v2102_v13, %v2000_v23 }
 0x225   :  { %vm968_vm0 = vmxor %vm963_vm14, %vm2015_vm7  ;;  %vm1345_vm2 = vcmp.eq.s32.totalorder %v2025_v36, %v1335_v42  ;;  %vm1346_vm4 = vcmp.lt.s32.totalorder %v2034_v40, %v1342_v43  ;;  %vm1344_vm14 = vcmp.gt.s32.totalorder %v2025_v36, %v1335_v42  ;;  %v2122_v16 = vrot.slane %v2108_v14, %v2000_v23 }
 0x226   :  { %v969_v44 = vsel %vm968_vm0, %v931_v26, %v950_v30  ;;  %v970_v45 = vsel %vm968_vm0, %v935_v28, %v957_v31  ;;  %vm1143_vm1 = vmand %vm1141_vm12, %vm1142_vm13 }
 0x227   :  { %v978_v47 = vrot.slane %v969_v44, %v2028_v39  ;;  %v985_v48 = vrot.slane %v970_v45, %v2028_v39  ;;  %vm1144_vm3 = vmor %vm1140_vm15, %vm1143_vm1 }
 0x228   :  { %vm1149_vm8 = vmxor %vm1144_vm3, %vm2015_vm7 }
 0x229   :  { %vm987_vm9 = vcmp.gt.s32.totalorder %v969_v44, %v978_v47  ;;  %vm988_vm10 = vcmp.eq.s32.totalorder %v969_v44, %v978_v47  ;;  %vm989_vm11 = vcmp.lt.s32.totalorder %v970_v45, %v985_v48  ;;  %v1150_v50 = vsel %vm1149_vm8, %v933_v27, %v1131_v34  ;;  %vm2053_vm12 = vmand %vm1345_vm2, %vm1346_vm4 }
 0x22a   :  { %vm990_vm13 = vmand %vm988_vm10, %vm989_vm11  ;;  %v1151_v53 = vsel %vm1149_vm8, %v937_v29, %v1138_v35  ;;  %v1159_v54 = vrot.slane %v1150_v50, %v2028_v39  ;;  %v2241_v34 = vmov 0 }
 0x22b   :  { %vm991_vm15 = vmor %vm987_vm9, %vm990_vm13  ;;  %v1166_v55 = vrot.slane %v1151_v53, %v2028_v39 }
 0x22c   :  { %vm996_vm0 = vmxor %vm991_vm15, %vm2047_vm5  ;;  %vm1168_vm1 = vcmp.gt.s32.totalorder %v1150_v50, %v1159_v54  ;;  %vm1169_vm2 = vcmp.eq.s32.totalorder %v1150_v50, %v1159_v54  ;;  %vm2074_vm15 = vcmp.ne.s32.totalorder %v1022_v56, 0 }
 0x22d   :  { %v997_v57 = vsel %vm996_vm0, %v969_v44, %v978_v47  ;;  %v998_v58 = vsel %vm996_vm0, %v970_v45, %v985_v48  ;;  %vm1170_vm3 = vcmp.lt.s32.totalorder %v1151_v53, %v1166_v55  ;;  %vm2068_vm4 = vmor %vm1344_vm14, %vm2053_vm12  ;;  %v2238_v11 = vsel %vm2074_vm15, 4294967295, %v2237_v11 }
 0x22e   :  { %v1006_v60 = vrot.slane %v997_v57, %v2058_v52  ;;  %v1013_v61 = vrot.slane %v998_v58, %v2058_v52  ;;  %vm1171_vm8 = vmand %vm1169_vm2, %vm1170_vm3 }
 0x22f   :  { %vm1172_vm9 = vmor %vm1168_vm1, %vm1171_vm8 }
 0x230   :  { %vm1015_vm10 = vcmp.gt.s32.totalorder %v997_v57, %v1006_v60  ;;  %vm1016_vm11 = vcmp.eq.s32.totalorder %v997_v57, %v1006_v60  ;;  %vm1017_vm13 = vcmp.lt.s32.totalorder %v998_v58, %v1013_v61  ;;  %vm1177_vm0 = vmxor %vm1172_vm9, %vm2047_vm5 }
 0x231   :  { %vm1018_vm12 = vmand %vm1016_vm11, %vm1017_vm13  ;;  %v1178_v62 = vsel %vm1177_vm0, %v1150_v50, %v1159_v54  ;;  %v1179_v63 = vsel %vm1177_vm0, %v1151_v53, %v1166_v55 }
 0x232   :  { %vm1019_vm14 = vmor %vm1015_vm10, %vm1018_vm12  ;;  %v1187_v0 = vrot.slane %v1178_v62, %v2058_v52  ;;  %v1194_v1 = vrot.slane %v1179_v63, %v2058_v52 }
 0x233   :  { %vm1024_vm1 = vmxor %vm1019_vm14, %vm2074_vm15 }
 0x234   :  { %v1025_v2 = vsel %vm1024_vm1, %v997_v57, %v1006_v60  ;;  %v1026_v3 = vsel %vm1024_vm1, %v998_v58, %v1013_v61  ;;  %vm1196_vm2 = vcmp.gt.s32.totalorder %v1178_v62, %v1187_v0  ;;  %vm1197_vm3 = vcmp.eq.s32.totalorder %v1178_v62, %v1187_v0  ;;  %vm1353_vm8 = vmxor %vm2068_vm4, %vm2015_vm7 }
 0x235   :  { %v1040_v4 = vrot.slane %v1025_v2, %v2000_v23  ;;  %v1047_v6 = vrot.slane %v1026_v3, %v2000_v23  ;;  %vm1198_vm9 = vcmp.lt.s32.totalorder %v1179_v63, %v1194_v1  ;;  %v1354_v7 = vsel %vm1353_vm8, %v2025_v36, %v1335_v42 }
 0x236   :  { %vm1199_vm10 = vmand %vm1197_vm3, %vm1198_vm9  ;;  %v1355_v8 = vsel %vm1353_vm8, %v2034_v40, %v1342_v43  ;;  %v1363_v9 = vrot.slane %v1354_v7, %v2028_v39 }
 0x237   :  { %vm1049_vm11 = vcmp.gt.s32.totalorder %v1025_v2, %v1040_v4  ;;  %vm1050_vm13 = vcmp.eq.s32.totalorder %v1025_v2, %v1040_v4  ;;  %vm1051_vm0 = vcmp.lt.s32.totalorder %v1026_v3, %v1047_v6  ;;  %vm2093_vm12 = vmor %vm1196_vm2, %vm1199_vm10  ;;  %v1370_v12 = vrot.slane %v1355_v8, %v2028_v39 }
 0x238   :  { %vm1052_vm4 = vmand %vm1050_vm13, %vm1051_vm0  ;;  %vm1373_vm1 = vcmp.eq.s32.totalorder %v1354_v7, %v1363_v9  ;;  %vm1372_vm8 = vcmp.gt.s32.totalorder %v1354_v7, %v1363_v9 }
 0x239   :  { %vm1053_vm14 = vmor %vm1049_vm11, %vm1052_vm4  ;;  %vm1374_vm2 = vcmp.lt.s32.totalorder %v1355_v8, %v1370_v12 }
 0x23a   :  { %vm1058_vm3 = vmxor %vm1053_vm14, %vm2015_vm7 }
 0x23b   :  { %v1059_v5 = vsel %vm1058_vm3, %v1025_v2, %v1040_v4  ;;  %v1060_v17 = vsel %vm1058_vm3, %v1026_v3, %v1047_v6  ;;  %vm1205_vm9 = vmxor %vm2093_vm12, %vm2074_vm15  ;;  %vm1526_vm15 = vcmp.eq.s32.totalorder %v2102_v13, %v2118_v15 }
 0x23c   :  { %v1068_v18 = vrot.slane %v1059_v5, %v2028_v39  ;;  %v1075_v19 = vrot.slane %v1060_v17, %v2028_v39  ;;  %v1206_v20 = vsel %vm1205_vm9, %v1178_v62, %v1187_v0  ;;  %v1207_v21 = vsel %vm1205_vm9, %v1179_v63, %v1194_v1  ;;  %vm1375_vm6 = vmand %vm1373_vm1, %vm1374_vm2 }
 0x23d   :  { %v1221_v22 = vrot.slane %v1206_v20, %v2000_v23  ;;  %v1228_v24 = vrot.slane %v1207_v21, %v2000_v23  ;;  %vm1376_vm10 = vmor %vm1372_vm8, %vm1375_vm6  ;;  %vm1527_vm2 = vcmp.lt.s32.totalorder %v2108_v14, %v2122_v16 }
 0x23e   :  { %vm1077_vm11 = vcmp.gt.s32.totalorder %v1059_v5, %v1068_v18  ;;  %vm1078_vm13 = vcmp.eq.s32.totalorder %v1059_v5, %v1068_v18  ;;  %vm1079_vm0 = vcmp.lt.s32.totalorder %v1060_v17, %v1075_v19  ;;  %vm1381_vm12 = vmxor %vm1376_vm10, %vm2047_vm5 }
 0x23f   :  { %vm1080_vm4 = vmand %vm1078_vm13, %vm1079_vm0  ;;  %vm1231_vm14 = vcmp.eq.s32.totalorder %v1206_v20, %v1221_v22  ;;  %vm1232_vm3 = vcmp.lt.s32.totalorder %v1207_v21, %v1228_v24  ;;  %v1382_v25 = vsel %vm1381_vm12, %v1354_v7, %v1363_v9  ;;  %vm1230_vm1 = vcmp.gt.s32.totalorder %v1206_v20, %v1221_v22 }
 0x240   :  { %vm1081_vm9 = vmor %vm1077_vm11, %vm1080_vm4  ;;  %v1383_v26 = vsel %vm1381_vm12, %v1355_v8, %v1370_v12  ;;  %v1391_v27 = vrot.slane %v1382_v25, %v2058_v52 }
 0x241   :  { %vm1086_vm8 = vmxor %vm1081_vm9, %vm2047_vm5  ;;  %v1398_v28 = vrot.slane %v1383_v26, %v2058_v52 }
 0x242   :  { %v1087_v29 = vsel %vm1086_vm8, %v1059_v5, %v1068_v18  ;;  %v1088_v30 = vsel %vm1086_vm8, %v1060_v17, %v1075_v19  ;;  %vm1233_vm6 = vmand %vm1231_vm14, %vm1232_vm3  ;;  %vm1401_vm10 = vcmp.eq.s32.totalorder %v1382_v25, %v1391_v27 }
 0x243   :  { %v1096_v31 = vrot.slane %v1087_v29, %v2058_v52  ;;  %v1103_v32 = vrot.slane %v1088_v30, %v2058_v52  ;;  %vm1234_vm11 = vmor %vm1230_vm1, %vm1233_vm6  ;;  %vm1402_vm13 = vcmp.lt.s32.totalorder %v1383_v26, %v1398_v28  ;;  %vm1400_vm1 = vcmp.gt.s32.totalorder %v1382_v25, %v1391_v27 }
 0x244   :  { %vm2143_vm0 = vmand %vm1526_vm15, %vm1527_vm2  ;;  %vm2243_vm15 = vnez %v2238_v11 }
 0x245   :  { %v2242_v34 = vsel %vm2143_vm0, 4294967295, %v2241_v34  ;;  %vm1239_vm12 = vmxor %vm1234_vm11, %vm2015_vm7  ;;  %vm1105_vm4 = vcmp.gt.s32.totalorder %v1087_v29, %v1096_v31  ;;  %vm1106_vm9 = vcmp.eq.s32.totalorder %v1087_v29, %v1096_v31  ;;  %vm1107_vm14 = vcmp.lt.s32.totalorder %v1088_v30, %v1103_v32 }
 0x246   :  { %v1240_v35 = vsel %vm1239_vm12, %v1206_v20, %v1221_v22  ;;  %vm1403_vm3 = vmand %vm1401_vm10, %vm1402_vm13  ;;  %v1241_v36 = vsel %vm1239_vm12, %v1207_v21, %v1228_v24  ;;  %vm1525_vm12 = vcmp.gt.s32.totalorder %v2102_v13, %v2118_v15 }
 0x247   :  { %vm1108_vm8 = vmand %vm1106_vm9, %vm1107_vm14  ;;  %v1249_v37 = vrot.slane %v1240_v35, %v2028_v39  ;;  %v1256_v38 = vrot.slane %v1241_v36, %v2028_v39 }
 0x248   :  { %vm1109_vm6 = vmor %vm1105_vm4, %vm1108_vm8  ;;  %vm2244_vm4 = vnez %v2232_v49 }
 0x249   :  { %vm1114_vm2 = vmxor %vm1109_vm6, %vm2243_vm15  ;;  %vm1258_vm0 = vcmp.gt.s32.totalorder %v1240_v35, %v1249_v37  ;;  %vm1259_vm5 = vcmp.eq.s32.totalorder %v1240_v35, %v1249_v37  ;;  %vm1260_vm11 = vcmp.lt.s32.totalorder %v1241_v36, %v1256_v38 }
 0x24a   :  { %v1115_v40 = vsel %vm1114_vm2, %v1087_v29, %v1096_v31  ;;  %v1116_v41 = vsel %vm1114_vm2, %v1088_v30, %v1103_v32  ;;  %vm1404_vm7 = vmor %vm1400_vm1, %vm1403_vm3  ;;  %vm2246_vm3 = vnez %v2230_v33 }
 0x24b   :  { %1118 = vst [vmem:[#allocation12] sm:$0xff] %v1115_v40  ;;  %1119 = vst [vmem:[#allocation14] sm:$0xff] %v1116_v41 }
 0x24c   :  { %vm1261_vm10 = vmand %vm1259_vm5, %vm1260_vm11  ;;  %vm2245_vm5 = vnez %v2242_v34 }
 0x24d   :  { %vm1262_vm13 = vmor %vm1258_vm0, %vm1261_vm10 }
 0x24e   :  { %vm1267_vm9 = vmxor %vm1262_vm13, %vm2244_vm4 }
 0x24f   :  { %v1268_v42 = vsel %vm1267_vm9, %v1240_v35, %v1249_v37  ;;  %v1269_v43 = vsel %vm1267_vm9, %v1241_v36, %v1256_v38  ;;  %vm1409_vm14 = vmxor %vm1404_vm7, %vm2243_vm15 }
 0x250   :  { %v1277_v44 = vrot.slane %v1268_v42, %v2058_v52  ;;  %v1284_v45 = vrot.slane %v1269_v43, %v2058_v52  ;;  %v1410_v46 = vsel %vm1409_vm14, %v1382_v25, %v1391_v27  ;;  %v1411_v47 = vsel %vm1409_vm14, %v1383_v26, %v1398_v28  ;;  %vm1529_vm0 = vmor %vm1525_vm12, %vm2245_vm5 }
 0x251   :  { %v1425_v48 = vrot.slane %v1410_v46, %v2000_v23  ;;  %v1432_v50 = vrot.slane %v1411_v47, %v2000_v23  ;;  %vm1534_vm8 = vmxor %vm1529_vm0, %vm2246_vm3 }
 0x252   :  { %vm1286_vm1 = vcmp.gt.s32.totalorder %v1268_v42, %v1277_v44  ;;  %vm1287_vm6 = vcmp.eq.s32.totalorder %v1268_v42, %v1277_v44  ;;  %vm1288_vm2 = vcmp.lt.s32.totalorder %v1269_v43, %v1284_v45  ;;  %v1535_v51 = vsel %vm1534_vm8, %v2102_v13, %v2118_v15  ;;  %v1720_v49 = vld [vmem:[#allocation14] sm:$0xff] }
 0x253   :  { %vm1289_vm7 = vmand %vm1287_vm6, %vm1288_vm2  ;;  %vm1435_vm11 = vcmp.eq.s32.totalorder %v1410_v46, %v1425_v48  ;;  %vm1436_vm10 = vcmp.lt.s32.totalorder %v1411_v47, %v1432_v50  ;;  %v1536_v53 = vsel %vm1534_vm8, %v2108_v14, %v2122_v16  ;;  %vm1434_vm12 = vcmp.gt.s32.totalorder %v1410_v46, %v1425_v48  ;;  %v1687_v20 = vld [vmem:[#allocation12] sm:$0xff]  ;;  %1723 = vxpose.xlu0.b32.start [1/2] (short) (narrow) %v1720_v49, 8 }
 0x254   :  { %vm1290_vm13 = vmor %vm1286_vm1, %vm1289_vm7  ;;  %v1544_v54 = vrot.slane %v1535_v51, %v2028_v39  ;;  %v1551_v55 = vrot.slane %v1536_v53, %v2028_v39  ;;  %v1689_v21 = vsub.s32 2147483647, %v1687_v20 }
 0x255   :  { %vm1295_vm9 = vmxor %vm1290_vm13, %vm2243_vm15 }
 0x256   :  { %v1296_v56 = vsel %vm1295_vm9, %v1268_v42, %v1277_v44  ;;  %v1297_v57 = vsel %vm1295_vm9, %v1269_v43, %v1284_v45  ;;  %vm1437_vm14 = vmand %vm1435_vm11, %vm1436_vm10  ;;  %vm1554_vm5 = vcmp.eq.s32.totalorder %v1535_v51, %v1544_v54  ;;  %vm1553_vm6 = vcmp.gt.s32.totalorder %v1535_v51, %v1544_v54 }
 0x257   :  { %1299 = vst [vmem:[#allocation12 + $0x8] sm:$0xff] %v1296_v56  ;;  %1300 = vst [vmem:[#allocation14 + $0x8] sm:$0xff] %v1297_v57  ;;  %vm1555_vm2 = vcmp.lt.s32.totalorder %v1536_v53, %v1551_v55 }
 0x258   :  { %vm1438_vm0 = vmor %vm1434_vm12, %vm1437_vm14 }
 0x259   :  { %vm1443_vm8 = vmxor %vm1438_vm0, %vm2246_vm3 }
 0x25a   :  { %v1444_v58 = vsel %vm1443_vm8, %v1410_v46, %v1425_v48  ;;  %v1445_v59 = vsel %vm1443_vm8, %v1411_v47, %v1432_v50  ;;  %vm1556_vm1 = vmand %vm1554_vm5, %vm1555_vm2 }
 0x25b   :  { %v1453_v60 = vrot.slane %v1444_v58, %v2028_v39  ;;  %v1460_v61 = vrot.slane %v1445_v59, %v2028_v39  ;;  %vm1557_vm7 = vmor %vm1553_vm6, %vm1556_vm1 }
 0x25c   :  { %vm1562_vm11 = vmxor %vm1557_vm7, %vm2244_vm4 }
 0x25d   :  { %vm1462_vm10 = vcmp.gt.s32.totalorder %v1444_v58, %v1453_v60  ;;  %vm1463_vm13 = vcmp.eq.s32.totalorder %v1444_v58, %v1453_v60  ;;  %vm1464_vm9 = vcmp.lt.s32.totalorder %v1445_v59, %v1460_v61  ;;  %v1563_v62 = vsel %vm1562_vm11, %v1535_v51, %v1544_v54 }
 0x25e   :  { %vm1465_vm12 = vmand %vm1463_vm13, %vm1464_vm9  ;;  %v1564_v63 = vsel %vm1562_vm11, %v1536_v53, %v1551_v55  ;;  %v1572_v0 = vrot.slane %v1563_v62, %v2058_v52  ;;  %v1693_v22 = vld [vmem:[#allocation12 + $0x8] sm:$0xff] }
 0x25f   :  { %vm1466_vm14 = vmor %vm1462_vm10, %vm1465_vm12  ;;  %v1579_v1 = vrot.slane %v1564_v63, %v2058_v52  ;;  %v1722_v24 = vld [vmem:[#allocation14 + $0x8] sm:$0xff] }
 0x260   :  { %vm1471_vm5 = vmxor %vm1466_vm14, %vm2244_vm4  ;;  %vm1581_vm0 = vcmp.gt.s32.totalorder %v1563_v62, %v1572_v0  ;;  %vm1582_vm2 = vcmp.eq.s32.totalorder %v1563_v62, %v1572_v0  ;;  %1724 = vxpose.xlu0.b32.end [2/2] (short) (narrow) %v1722_v24, 8 }
 0x261   :  { %v1472_v2 = vsel %vm1471_vm5, %v1444_v58, %v1453_v60  ;;  %v1473_v3 = vsel %vm1471_vm5, %v1445_v59, %v1460_v61  ;;  %vm1583_vm6 = vcmp.lt.s32.totalorder %v1564_v63, %v1579_v1 }
 0x262   :  { %v1481_v4 = vrot.slane %v1472_v2, %v2058_v52  ;;  %v1488_v6 = vrot.slane %v1473_v3, %v2058_v52  ;;  %vm1584_vm8 = vmand %vm1582_vm2, %vm1583_vm6 }
 0x263   :  { %vm1585_vm1 = vmor %vm1581_vm0, %vm1584_vm8 }
 0x264   :  { %vm1490_vm7 = vcmp.gt.s32.totalorder %v1472_v2, %v1481_v4  ;;  %vm1491_vm11 = vcmp.eq.s32.totalorder %v1472_v2, %v1481_v4  ;;  %vm1492_vm13 = vcmp.lt.s32.totalorder %v1473_v3, %v1488_v6  ;;  %vm1590_vm10 = vmxor %vm1585_vm1, %vm2243_vm15 }
 0x265   :  { %vm1493_vm9 = vmand %vm1491_vm11, %vm1492_vm13  ;;  %v1591_v7 = vsel %vm1590_vm10, %v1563_v62, %v1572_v0  ;;  %v1592_v8 = vsel %vm1590_vm10, %v1564_v63, %v1579_v1 }
 0x266   :  { %vm1494_vm12 = vmor %vm1490_vm7, %vm1493_vm9  ;;  %v1606_v9 = vrot.slane %v1591_v7, %v2000_v23  ;;  %v1613_v10 = vrot.slane %v1592_v8, %v2000_v23 }
 0x267   :  { %vm1499_vm14 = vmxor %vm1494_vm12, %vm2243_vm15 }
 0x268   :  { %v1500_v12 = vsel %vm1499_vm14, %v1472_v2, %v1481_v4  ;;  %v1501_v13 = vsel %vm1499_vm14, %v1473_v3, %v1488_v6  ;;  %vm1615_vm5 = vcmp.gt.s32.totalorder %v1591_v7, %v1606_v9  ;;  %vm1616_vm0 = vcmp.eq.s32.totalorder %v1591_v7, %v1606_v9 }
 0x269   :  { %1503 = vst [vmem:[#allocation13] sm:$0xff] %v1500_v12  ;;  %1504 = vst [vmem:[#allocation15] sm:$0xff] %v1501_v13  ;;  %vm1617_vm2 = vcmp.lt.s32.totalorder %v1592_v8, %v1613_v10 }
 0x26a   :  { %vm1618_vm6 = vmand %vm1616_vm0, %vm1617_vm2 }
 0x26b   :  { %vm1619_vm8 = vmor %vm1615_vm5, %vm1618_vm6 }
 0x26c   :  { %vm1624_vm1 = vmxor %vm1619_vm8, %vm2246_vm3  ;;  %vm1694_vm8 = vcmp.lt.s32.totalorder %v1693_v22, 0 }
 0x26d   :  { %v1625_v14 = vsel %vm1624_vm1, %v1591_v7, %v1606_v9  ;;  %v1626_v5 = vsel %vm1624_vm1, %v1592_v8, %v1613_v10 }
 0x26e   :  { %v1634_v17 = vrot.slane %v1625_v14, %v2028_v39  ;;  %v1641_v23 = vrot.slane %v1626_v5, %v2028_v39 }
 0x270   :  { %vm1643_vm7 = vcmp.gt.s32.totalorder %v1625_v14, %v1634_v17  ;;  %vm1644_vm11 = vcmp.eq.s32.totalorder %v1625_v14, %v1634_v17  ;;  %vm1645_vm13 = vcmp.lt.s32.totalorder %v1626_v5, %v1641_v23 }
 0x271   :  { %vm1646_vm10 = vmand %vm1644_vm11, %vm1645_vm13 }
 0x272   :  { %vm1647_vm9 = vmor %vm1643_vm7, %vm1646_vm10 }
 0x273   :  { %vm1652_vm12 = vmxor %vm1647_vm9, %vm2244_vm4  ;;  %vm1688_vm4 = vcmp.lt.s32.totalorder %v1687_v20, 0 }
 0x274   :  { %v1653_v15 = vsel %vm1652_vm12, %v1625_v14, %v1634_v17  ;;  %v1654_v16 = vsel %vm1652_vm12, %v1626_v5, %v1641_v23  ;;  %v1690_v25 = vsel %vm1688_vm4, %v1689_v21, %v1687_v20 }
 0x275   :  { %v1662_v18 = vrot.slane %v1653_v15, %v2058_v52  ;;  %v1669_v33 = vrot.slane %v1654_v16, %v2058_v52  ;;  %v1695_v52 = vsub.s32 2147483647, %v1693_v22  ;;  %1691 = vst [vmem:[#allocation12] sm:$0xff] %v1690_v25  ;;  %1701 = vxpose.xlu1.b32.start [1/2] (short) (narrow) %v1690_v25, 8 }
 0x277   :  { %vm1671_vm3 = vcmp.gt.s32.totalorder %v1653_v15, %v1662_v18  ;;  %vm1672_vm14 = vcmp.eq.s32.totalorder %v1653_v15, %v1662_v18  ;;  %vm1673_vm5 = vcmp.lt.s32.totalorder %v1654_v16, %v1669_v33  ;;  %v1696_v26 = vsel %vm1694_vm8, %v1695_v52, %v1693_v22 }
 0x278   :  { %vm1674_vm0 = vmand %vm1672_vm14, %vm1673_vm5  ;;  %1697 = vst [vmem:[#allocation12 + $0x8] sm:$0xff] %v1696_v26 }
 0x279   :  { %vm1675_vm2 = vmor %vm1671_vm3, %vm1674_vm0  ;;  %1702 = vxpose.xlu1.b32.end [2/2] (short) (narrow) %v1696_v26, 8 }
 0x27a   :  { %vm1680_vm6 = vmxor %vm1675_vm2, %vm2243_vm15 }
 0x27b   :  { %v1681_v39 = vsel %vm1680_vm6, %v1653_v15, %v1662_v18  ;;  %v1682_v19 = vsel %vm1680_vm6, %v1654_v16, %v1669_v33 }
 0x27c   :  { %1684 = vst [vmem:[#allocation13 + $0x8] sm:$0xff] %v1681_v39  ;;  %1685 = vst [vmem:[#allocation15 + $0x8] sm:$0xff] %v1682_v19 }
 0x2dc   :  { %v1725_v11 = vpop.trf.xlu0 }
 0x2dd   :  { %1741 = vst [vmem:[#allocation10] sm:$0xff] %v1725_v11 }
 0x2e4   :  { %v1751_v28 = vld [vmem:[#allocation10] sm:$0x3] }
 0x2e5   :  { %1753 = vst [vmem:[#allocation11] sm:$0x3] %v1751_v28 }
 0x2f5   :  { %v1703_v27 = vpop.trf.xlu1 }
 0x2f6   :  { %1719 = vst [vmem:[#allocation7] sm:$0xff] %v1703_v27 }
 0x2fd   :  { %v1745_v29 = vld [vmem:[#allocation7] sm:$0x3] }
 0x2fe   :  { %1747 = vst [vmem:[#allocation8] sm:$0x3] %v1745_v29 }
 0x2ff   :  { %1862 = shalt.err (!%p1859_p7)
}
 0x300   :  { %s1863_s15 = scalar_lea.hbm %s2219_s1, 32 }
 0x301   :  { %p1864_p8 = scmp.ne.s32.totalorder %s2219_s1, %s1863_s15  ;;  %p1867_p9 = scmp.lt.u32.totalorder %s1863_s15, %s2219_s1 }
 0x303   :  { %p1869_p10 = pnand %p1867_p9, %p1864_p8 }
 0x305   :  { %1872 = shalt.err (!%p1869_p10)
}
 0x306   :  { %1761 = dma.vmem_to_hbm [thread:$0]  %s1759_s11, 32, %s2219_s1, [#allocation9]   ;;  %v1777_v30 = vld [vmem:[#allocation11] sm:$0x3] }
 0x307   :  { %1778 = vst [vmem:[%s2220_s2] sm:$0x3] %v1777_v30 }
 0x308   :  { %1877 = dma.done.wait [#allocation9], 32  }
 0x309   :  { %1878 = vsyncadd [#allocation9], 4294967264 }
 0x30a   :  { %1794 = vsyncpa [#allocation9], 1 }

// kernel: faster_rcnn_forward.6
= control target key start
LH: loop header
LB: loop body
LE: loop exit
PB: predicated region body
PF: predicated region fallthrough
CT: control target
= control target key end

     0   :  { %s1509_s0 = inlined_call_operand.vmem [shape: s32[32], index: 0, kind: input, shape index: {}]   ;;  %s1510_s1 = inlined_call_operand.vmem [shape: s32[32,49,4], index: 1, kind: input, shape index: {}]   ;;  %s1511_s2 = inlined_call_operand.vmem [shape: f32[32,49,4], index: 2, kind: input, shape index: {}]   ;;  %s1512_s3 = inlined_call_operand.vmem [shape: s32[2,256], index: 3, kind: input, shape index: {}]   ;;  %s1513_s4 = inlined_call_operand.vmem [shape: bf16[2,256,32], index: 4, kind: input, shape index: {}]   ;;  %s1514_s5 = inlined_call_operand.vmem [shape: bf16[32,49,32], index: 5, kind: output, shape index: {}]  }
   0x1   :  { %s10_s20 = sshll.u32 %s1509_s0, 4  ;;  %s11_s20 = int_to_ptr.vmem [resolvable:$true] %s10_s20 }
   0x2   :  { %s1122_s21 = scalar_lea.vmem %s11_s20, 16  ;;  %p1127_p1 = scmp.lt.s32.totalorder %s11_s20, %s11_s20 }
   0x3   :  { %p1123_p0 = scmp.ne.s32.totalorder %s11_s20, %s1122_s21  ;;  %p1128_p2 = scmp.lt.s32.totalorder %s1122_s21, %s1122_s21 }
   0x5   :  { %p1129_p3 = por %p1128_p2, %p1127_p1 }
   0x7   :  { %p1130_p4 = pnand %p1129_p3, %p1123_p0 }
   0x9   :  { %1133 = shalt.err (!%p1130_p4)  }
   0xa   :  { %s1144_s22 = smov [#allocation3]  }
   0xb   :  { %13 = dma.vmem_to_smem %s11_s20, 16, %s1144_s22, [#allocation2] }
   0xc   :  { %1138 = dma.done.wait [#allocation2], 16 }
   0xd   :  { %1139 = vsyncadd [#allocation2], 4294967280 }
   0xe   :  { %15 = sfence }
   0xf   :  { %s1182_s23 = smov 0  }
  0x10 LB: > { %s1188_s0 = sadd.s32 4294967295, %s1142_s23   ;;  %p968_p5 = scmp.ge.s32.totalorder %s1142_s23, 1  ;;  %s1142_s23 = sphi %s1182_s23, %s21_s23  }
  0x11   : > { %p193_p6 = scmp.lt.s32.totalorder %s1142_s23, 33 }
  0x13   : > { %p194_p7 = pnand %p968_p5, %p193_p6 }
  0x14   : > { %p230_p8 = scmp.lt.s32.totalorder (!%p194_p7), %s1188_s0, 31  ;;  %v1145_v0 = vmov (!%p194_p7), 1   ;;  %v1146_v1 = vmov (!%p194_p7), 0   ;;  %v1147_v5 = vmov (!%p194_p7), 2   ;;  %v1148_v7 = vmov (!%p194_p7), 3   ;;  %s240_s7 = sld [smem:[#allocation3 + %s1188_s0]] (!%p194_p7) }
  0x15   : > { %197 = sbr.rel (%p194_p7) target bundleno = 550 (0x226), region = 36  ;;  %1080 = vset.pattern.permute.xlu1 (!%p194_p7), %v1145_v0  ;;  %1079 = vset.pattern.permute.xlu0 (!%p194_p7), %v1146_v1  ;;  %v270_v36 = vlaneseq (!%p194_p7)  ;;  %v267_v45 = vld [vmem:[%s1512_s3] ss:$2 sm:$0x3] (!%p194_p7) }
  0x17   : > { %v271_v39 = vshrl.u32 (!%p194_p7), %v270_v36, 7 }
  0x19   : > { %v272_v42 = vsub.s32 (!%p194_p7), 0, %v271_v39  ;;  %v276_v43 = vsub.s32 (!%p194_p7), 1, %v271_v39 }
  0x1a   : > { %p241_p9 = scmp.lt.s32.totalorder (!%p194_p7), %s240_s7, 1 }
  0x1b   : > { %v1332_v47 = vrot.slane (!%p194_p7), %v267_v45, %v272_v42  ;;  %v1334_v48 = vrot.slane (!%p194_p7), %v267_v45, %v276_v43 }
  0x1c   : > { %s1196_s24 = scalar_select %p230_p8, %s1188_s0, 31 }
  0x1d   : > { %s1516_s7 = smov (!%p241_p9, %s240_s7), 1 }
  0x1e   : > { %s1064_s25 = smul.u32 56, %s1196_s24  ;;  %s1000_s8 = sshll.u32 %s1516_s7, 7 }
  0x1f   : > { %s1259_s11 = scalar_lea.vmem %s1513_s4, %s1000_s8  ;;  %s1065_s16 = smul.u32 28, %s1196_s24 }
  0x20   : > { %s1202_s28 = scalar_lea.vmem %s1510_s1, %s1064_s25  ;;  %s1213_s6 = scalar_lea.vmem %s1511_s2, %s1064_s25  ;;  %v1106_v14 = vld [vmem:[%s1259_s11 + $0x40] sm:$0xff]   ;;  %v1108_v16 = vld [vmem:[%s1259_s11 + $0x48] sm:$0xff]   ;;  %v1110_v18 = vld [vmem:[%s1259_s11 + $0x50] sm:$0xff]  }
  0x21   : > { %v1205_v2 = vld [vmem:[%s1202_s28] sm:$0xff]  ;;  %v254_v3 = vld [vmem:[%s1202_s28 + $0x8] sm:$0xff]  ;;  %v1226_v8 = vld [vmem:[%s1202_s28 + $0x18] sm:$0xff]  ;;  %1008 = vmatprep.subr.bf16.mxu0 %v1106_v14  ;;  %1048 = vmatprep.subr.bf16.mxu1 %v1106_v14  ;;  %s1490_s19 = scalar_lea.vmem %s1514_s5, %s1065_s16 }
  0x22   : > { %363 = vperm.xlu1 %1080, %v1205_v2   ;;  %279 = vperm.xlu0 %1079, %v1205_v2   ;;  %v1216_v4 = vld [vmem:[%s1213_s6] sm:$0xff]  ;;  %v1234_v10 = vld [vmem:[%s1213_s6 + $0x18] sm:$0xff]  ;;  %v258_v11 = vld [vmem:[%s1202_s28 + $0x28] sm:$0xff] }
  0x23   : > { %v1221_v6 = vld [vmem:[%s1213_s6 + $0x20] sm:$0xff]  ;;  %v1242_v12 = vld [vmem:[%s1213_s6 + $0x8] sm:$0xff]  ;;  %v1111_v19 = vld [vmem:[%s1259_s11 + $0x10] sm:$0xff]  }
  0x24   : > { %v1231_v9 = vld [vmem:[%s1202_s28 + $0x20] sm:$0xff]  ;;  %v1245_v13 = vld [vmem:[%s1213_s6 + $0x28] sm:$0xff]  ;;  %v1112_v20 = vld [vmem:[%s1259_s11 + $0x58] sm:$0xff]  }
  0x25   : > { %v1107_v15 = vld [vmem:[%s1259_s11] sm:$0xff]   ;;  %v1109_v17 = vld [vmem:[%s1259_s11 + $0x8] sm:$0xff]   ;;  %v1113_v21 = vld [vmem:[%s1259_s11 + $0x18] sm:$0xff]  }
  0x26   : > { %366 = vperm.xlu1 %1080, %v254_v3   ;;  %282 = vperm.xlu0 %1079, %v254_v3   ;;  %v1114_v22 = vld [vmem:[%s1259_s11 + $0x60] sm:$0xff]   ;;  %v1116_v24 = vld [vmem:[%s1259_s11 + $0x68] sm:$0xff]   ;;  %v1118_v26 = vld [vmem:[%s1259_s11 + $0x70] sm:$0xff]  }
  0x27   : > { %1009 = vmatpush3.bf16.msra.mxu0 %v1107_v15  ;;  %1056 = vmatpush3.bf16.msra.mxu1 %v1107_v15  ;;  %v1115_v23 = vld [vmem:[%s1259_s11 + $0x20] sm:$0xff]   ;;  %v1117_v25 = vld [vmem:[%s1259_s11 + $0x28] sm:$0xff]   ;;  %v1119_v27 = vld [vmem:[%s1259_s11 + $0x30] sm:$0xff]  }
  0x28   : > { %1010 = vmatprep.subr.bf16.mxu0 %v1108_v16  ;;  %1049 = vmatprep.subr.bf16.mxu1 %v1108_v16  ;;  %v1120_v28 = vld [vmem:[%s1259_s11 + $0x78] sm:$0xff]   ;;  %v255_v29 = vld [vmem:[%s1202_s28 + $0x10] sm:$0xff] }
  0x29   : > { %v1121_v30 = vld [vmem:[%s1259_s11 + $0x38] sm:$0xff]   ;;  %v266_v31 = vld [vmem:[%s1213_s6 + $0x30] sm:$0x1] }
  0x2a   : > { %1081 = vset.pattern.permute.xlu1 %v1147_v5  ;;  %315 = vperm.xlu0 %1079, %v1216_v4   ;;  %v259_v32 = vld [vmem:[%s1202_s28 + $0x30] sm:$0x1] }
  0x2b   : > { %465 = vperm.xlu1 %1081, %v254_v3   ;;  %1011 = vmatpush3.bf16.msra.mxu0 %v1109_v17  ;;  %v262_v33 = vld [vmem:[%s1213_s6 + $0x10] sm:$0xff] }
  0x2c   : > { %1057 = vmatpush3.bf16.msra.mxu1 %v1109_v17  ;;  %1012 = vmatprep.subr.bf16.mxu0 %v1110_v18 }
  0x2d   : > { %1050 = vmatprep.subr.bf16.mxu1 %v1110_v18 }
  0x2e   : > { %335 = vperm.xlu0 %1079, %v1221_v6  }
  0x2f   : > { %1082 = vset.pattern.permute.xlu1 %v1148_v7  ;;  %1013 = vmatpush3.bf16.msra.mxu0 %v1111_v19 }
  0x30   : > { %539 = vperm.xlu1 %1082, %v1205_v2   ;;  %1058 = vmatpush3.bf16.msra.mxu1 %v1111_v19 }
  0x31   : > { %1014 = vmatprep.subr.bf16.mxu0 %v1112_v20  ;;  %1051 = vmatprep.subr.bf16.mxu1 %v1112_v20 }
  0x32   : > { %288 = vperm.xlu0 %1079, %v1226_v8  }
  0x33   : > { %1015 = vmatpush3.bf16.msra.mxu0 %v1113_v21 }
  0x34   : > { %1083 = vset.pattern.permute.xlu1 %v1146_v1  ;;  %1059 = vmatpush3.bf16.msra.mxu1 %v1113_v21 }
  0x35   : > { %291 = vperm.xlu1 %1083, %v1231_v9   ;;  %1016 = vmatprep.subr.bf16.mxu0 %v1114_v22 }
  0x36   : > { %330 = vperm.xlu0 %1079, %v1234_v10   ;;  %1052 = vmatprep.subr.bf16.mxu1 %v1114_v22 }
  0x37   : > { %1017 = vmatpush3.bf16.msra.mxu0 %v1115_v23 }
  0x38   : > { %1060 = vmatpush3.bf16.msra.mxu1 %v1115_v23  ;;  %1018 = vmatprep.subr.bf16.mxu0 %v1116_v24 }
  0x39   : > { %294 = vperm.xlu1 %1083, %v258_v11   ;;  %1053 = vmatprep.subr.bf16.mxu1 %v1116_v24 }
  0x3a   : > { %1096 = vset.pattern.permute.xlu0 %v1145_v0 }
  0x3b   : > { %378 = vperm.xlu0 %1096, %v258_v11   ;;  %1019 = vmatpush3.bf16.msra.mxu0 %v1117_v25 }
  0x3c   : > { %1061 = vmatpush3.bf16.msra.mxu1 %v1117_v25  ;;  %1020 = vmatprep.subr.bf16.mxu0 %v1118_v26 }
  0x3d   : > { %320 = vperm.xlu1 %1083, %v1242_v12   ;;  %1054 = vmatprep.subr.bf16.mxu1 %v1118_v26 }
  0x3f   : > { %418 = vperm.xlu0 %1096, %v1245_v13   ;;  %1021 = vmatpush3.bf16.msra.mxu0 %v1119_v27 }
  0x40   : > { %1062 = vmatpush3.bf16.msra.mxu1 %v1119_v27  ;;  %1022 = vmatprep.subr.bf16.mxu0 %v1120_v28 }
  0x41   : > { %1084 = vset.pattern.permute.xlu1 %v1145_v0  ;;  %1055 = vmatprep.subr.bf16.mxu1 %v1120_v28 }
  0x42   : > { %375 = vperm.xlu1 %1084, %v1231_v9  }
  0x43   : > { %410 = vperm.xlu0 %1096, %v1234_v10   ;;  %1023 = vmatpush3.bf16.msra.mxu0 %v1121_v30 }
  0x44   : > { %1063 = vmatpush3.bf16.msra.mxu1 %v1121_v30 }
  0x46   : > { %398 = vperm.xlu1 %1084, %v1216_v4  }
  0x47   : > { %1098 = vset.pattern.permute.xlu0 %v1148_v7 }
  0x48   : > { %542 = vperm.xlu0 %1098, %v254_v3  }
  0x4a   : > { %402 = vperm.xlu1 %1084, %v1242_v12  }
  0x4c   : > { %554 = vperm.xlu0 %1098, %v258_v11  }
  0x4e   : > { %1085 = vset.pattern.permute.xlu1 %v1147_v5 }
  0x4f   : > { %477 = vperm.xlu1 %1085, %v258_v11  }
  0x50   : > { %590 = vperm.xlu0 %1098, %v1221_v6  }
  0x53   : > { %497 = vperm.xlu1 %1085, %v1216_v4  }
  0x54   : > { %548 = vperm.xlu0 %1098, %v1226_v8  }
  0x57   : > { %1086 = vset.pattern.permute.xlu1 %v1148_v7 }
  0x58   : > { %551 = vperm.xlu1 %1086, %v1231_v9   ;;  %586 = vperm.xlu0 %1098, %v1234_v10  }
  0x5c   : > { %574 = vperm.xlu1 %1086, %v1216_v4   ;;  %1101 = vset.pattern.permute.xlu0 %v1147_v5 }
  0x5d   : > { %462 = vperm.xlu0 %1101, %v1205_v2  }
  0x60   : > { %578 = vperm.xlu1 %1086, %v1242_v12  }
  0x61   : > { %474 = vperm.xlu0 %1101, %v1231_v9  }
  0x64   : > { %1087 = vset.pattern.permute.xlu1 %v1146_v1 }
  0x65   : > { %340 = vperm.xlu1 %1087, %v1245_v13   ;;  %501 = vperm.xlu0 %1101, %v1242_v12  }
  0x69   : > { %1088 = vset.pattern.permute.xlu1 %v1145_v0  ;;  %468 = vperm.xlu0 %1101, %v255_v29  }
  0x6a   : > { %414 = vperm.xlu1 %1088, %v1221_v6  }
  0x6d   : > { %509 = vperm.xlu0 %1101, %v1234_v10  }
  0x6e   : > { %1089 = vset.pattern.permute.xlu1 %v1147_v5 }
  0x6f   : > { %513 = vperm.xlu1 %1089, %v1221_v6  }
  0x71   : > { %521 = vperm.xlu0 %1101, %v266_v31  }
  0x73   : > { %517 = vperm.xlu1 %1089, %v1245_v13  }
  0x75   : > { %1105 = vset.pattern.permute.xlu0 %v1148_v7 }
  0x77   : > { %1090 = vset.pattern.permute.xlu1 %v1148_v7 }
  0x78   : > { %594 = vperm.xlu1 %1090, %v1245_v13  }
  0x7c   : > { %1091 = vset.pattern.permute.xlu1 %v1146_v1 }
  0x7d   : > { %285 = vperm.xlu1 %1091, %v255_v29  }
  0x81   : > { %1092 = vset.pattern.permute.xlu1 %v1145_v0 }
  0x82   : > { %369 = vperm.xlu1 %1092, %v255_v29  }
  0x86   : > { %372 = vperm.xlu1 %1092, %v1226_v8  }
  0x8a   : > { %1093 = vset.pattern.permute.xlu1 %v1147_v5 }
  0x8b   : > { %471 = vperm.xlu1 %1093, %v1226_v8  }
  0x8f   : > { %1094 = vset.pattern.permute.xlu1 %v1148_v7 }
  0x90   : > { %545 = vperm.xlu1 %1094, %v255_v29  }
  0x94   : > { %1095 = vset.pattern.permute.xlu1 %v1146_v1 }
  0x95   : > { %297 = vperm.xlu1 %1095, %v259_v32  }
  0x99   : > { %325 = vperm.xlu1 %1095, %v262_v33  }
  0x9d   : > { %1097 = vset.pattern.permute.xlu1 %v1145_v0 }
  0x9e   : > { %381 = vperm.xlu1 %1097, %v259_v32  }
  0xa1   : > { %v1313_v34 = vpop.permute.xlu1 %363  ;;  %v1315_v35 = vpop.permute.xlu0 %279 }
  0xa2   : > { %406 = vperm.xlu1 %1097, %v262_v33   ;;  %vm299_vm4 = vcmp.eq.s32.totalorder %v1332_v47, %v1315_v35  ;;  %vm300_vm5 = vcmp.eq.s32.totalorder %v1334_v48, %v1315_v35  ;;  %vm383_vm6 = vcmp.eq.s32.totalorder %v1332_v47, %v1313_v34  ;;  %vm384_vm7 = vcmp.eq.s32.totalorder %v1334_v48, %v1313_v34 }
  0xa5   : > { %v1317_v37 = vpop.permute.xlu1 %366  ;;  %v1319_v38 = vpop.permute.xlu0 %282 }
  0xa6   : > { %1099 = vset.pattern.permute.xlu1 %v1147_v5  ;;  %vm385_vm8 = vcmp.eq.s32.totalorder %v1332_v47, %v1317_v37  ;;  %vm386_vm9 = vcmp.eq.s32.totalorder %v1334_v48, %v1317_v37  ;;  %vm301_vm12 = vcmp.eq.s32.totalorder %v1332_v47, %v1319_v38  ;;  %vm302_vm13 = vcmp.eq.s32.totalorder %v1334_v48, %v1319_v38 }
  0xa7   : > { %480 = vperm.xlu1 %1099, %v259_v32  }
  0xa9   : > { %v316_v40 = vpop.permute.xlu0 %315 }
  0xaa   : > { %v1322_v41 = vpop.permute.xlu1 %465  ;;  %v348_v13 = vsel %vm299_vm4, %v316_v40, 0.0  ;;  %v349_v14 = vsel %vm300_vm5, %v316_v40, 0.0 }
  0xab   : > { %505 = vperm.xlu1 %1099, %v262_v33  }
  0xad   : > { %v1324_v44 = vpop.permute.xlu0 %335 }
  0xaf   : > { %1100 = vset.pattern.permute.xlu1 %v1148_v7  ;;  %v1330_v46 = vpop.permute.xlu1 %539 }
  0xb0   : > { %557 = vperm.xlu1 %1100, %v259_v32  }
  0xb1   : > { %v289_v49 = vpop.permute.xlu0 %288 }
  0xb2   : > { %vm305_vm0 = vcmp.eq.s32.totalorder %v1332_v47, %v289_v49  ;;  %vm306_vm1 = vcmp.eq.s32.totalorder %v1334_v48, %v289_v49 }
  0xb4   : > { %582 = vperm.xlu1 %1100, %v262_v33   ;;  %v1338_v50 = vpop.permute.xlu1 %291 }
  0xb5   : > { %v331_v51 = vpop.permute.xlu0 %330  ;;  %vm307_vm4 = vcmp.eq.s32.totalorder %v1332_v47, %v1338_v50  ;;  %vm308_vm5 = vcmp.eq.s32.totalorder %v1334_v48, %v1338_v50 }
  0xb6   : > { %v1340_v52 = vsel %vm305_vm0, %v331_v51, 0.0  ;;  %v1342_v53 = vsel %vm306_vm1, %v331_v51, 0.0 }
  0xb8   : > { %1102 = vset.pattern.permute.xlu1 %v1146_v1  ;;  %v1345_v54 = vpop.permute.xlu1 %294 }
  0xb9   : > { %345 = vperm.xlu1 %1102, %v266_v31  }
  0xba   : > { %v1347_v55 = vpop.permute.xlu0 %378 }
  0xbc   : > { %v321_v56 = vpop.permute.xlu1 %320 }
  0xbd   : > { %1103 = vset.pattern.permute.xlu1 %v1145_v0  ;;  %v974_v0 = vld [vmem:[%s1512_s3 + $0x1] ss:$2 sm:$0x3]  ;;  %v350_v21 = vsel %vm301_vm12, %v321_v56, 0.0  ;;  %v351_v22 = vsel %vm302_vm13, %v321_v56, 0.0 }
  0xbe   : > { %422 = vperm.xlu1 %1103, %v266_v31   ;;  %v1350_v57 = vpop.permute.xlu0 %418  ;;  %v1366_v4 = vrot.slane %v974_v0, %v272_v42  ;;  %v1368_v5 = vrot.slane %v974_v0, %v276_v43 }
  0xc0   : > { %vm484_vm14 = vcmp.eq.s32.totalorder %v1366_v4, %v1322_v41  ;;  %vm485_vm15 = vcmp.eq.s32.totalorder %v1368_v5, %v1322_v41  ;;  %vm559_vm0 = vcmp.eq.s32.totalorder %v1366_v4, %v1330_v46  ;;  %vm560_vm1 = vcmp.eq.s32.totalorder %v1368_v5, %v1330_v46 }
  0xc1   : > { %v1352_v58 = vpop.permute.xlu1 %375 }
  0xc2   : > { %1104 = vset.pattern.permute.xlu1 %v1148_v7  ;;  %v1355_v59 = vpop.permute.xlu0 %410  ;;  %vm391_vm12 = vcmp.eq.s32.totalorder %v1332_v47, %v1352_v58  ;;  %vm392_vm13 = vcmp.eq.s32.totalorder %v1334_v48, %v1352_v58 }
  0xc3   : > { %598 = vperm.xlu1 %1104, %v266_v31  }
  0xc5   : > { %v399_v60 = vpop.permute.xlu1 %398 }
  0xc6   : > { %v425_v17 = vsel %vm383_vm6, %v399_v60, 0.0  ;;  %v426_v18 = vsel %vm384_vm7, %v399_v60, 0.0  ;;  %vm393_vm6 = vcmp.eq.s32.totalorder %v1332_v47, %v1347_v55  ;;  %vm394_vm7 = vcmp.eq.s32.totalorder %v1334_v48, %v1347_v55 }
  0xc7   : > { %v543_v61 = vpop.permute.xlu0 %542  ;;  %v439_v27 = vadd.f32 %v425_v17, %v348_v13  ;;  %v440_v28 = vadd.f32 %v426_v18, %v349_v14  ;;  %v356_v60 = vsel %vm307_vm4, %v1324_v44, 0.0  ;;  %v435_v50 = vsel %vm393_vm6, %v1350_v57, 0.0 }
  0xc9   : > { %v403_v62 = vpop.permute.xlu1 %402 }
  0xca   : > { %v427_v23 = vsel %vm385_vm8, %v403_v62, 0.0  ;;  %v428_v24 = vsel %vm386_vm9, %v403_v62, 0.0  ;;  %v436_v62 = vsel %vm394_vm7, %v1350_v57, 0.0 }
  0xcb   : > { %v1357_v63 = vpop.permute.xlu0 %554  ;;  %v441_v37 = vadd.f32 %v427_v23, %v350_v21  ;;  %v442_v38 = vadd.f32 %v428_v24, %v351_v22 }
  0xce   : > { %v1359_v1 = vpop.permute.xlu1 %477 }
  0xcf   : > { %v1361_v2 = vpop.permute.xlu0 %590 }
  0xd2   : > { %v498_v3 = vpop.permute.xlu1 %497 }
  0xd3   : > { %v549_v6 = vpop.permute.xlu0 %548 }
  0xd4   : > { %vm565_vm2 = vcmp.eq.s32.totalorder %v1366_v4, %v549_v6  ;;  %vm566_vm3 = vcmp.eq.s32.totalorder %v1368_v5, %v549_v6 }
  0xd7   : > { %v1372_v7 = vpop.permute.xlu1 %551  ;;  %v587_v8 = vpop.permute.xlu0 %586 }
  0xd8   : > { %v1374_v9 = vsel %vm565_vm2, %v587_v8, 0.0  ;;  %v1376_v10 = vsel %vm566_vm3, %v587_v8, 0.0  ;;  %vm561_vm2 = vcmp.eq.s32.totalorder %v1366_v4, %v543_v61  ;;  %vm562_vm3 = vcmp.eq.s32.totalorder %v1368_v5, %v543_v61 }
  0xd9   : > { %v357_v61 = vsel %vm308_vm5, %v1324_v44, 0.0 }
  0xdb   : > { %v575_v11 = vpop.permute.xlu1 %574 }
  0xdc   : > { %v463_v12 = vpop.permute.xlu0 %462  ;;  %v601_v25 = vsel %vm559_vm0, %v575_v11, 0.0  ;;  %v602_v26 = vsel %vm560_vm1, %v575_v11, 0.0  ;;  %vm569_vm0 = vcmp.eq.s32.totalorder %v1366_v4, %v1357_v63  ;;  %vm570_vm1 = vcmp.eq.s32.totalorder %v1368_v5, %v1357_v63 }
  0xdd   : > { %vm482_vm10 = vcmp.eq.s32.totalorder %v1366_v4, %v463_v12  ;;  %vm483_vm11 = vcmp.eq.s32.totalorder %v1368_v5, %v463_v12 }
  0xde   : > { %v524_v19 = vsel %vm482_vm10, %v498_v3, 0.0  ;;  %v525_v20 = vsel %vm483_vm11, %v498_v3, 0.0  ;;  %vm309_vm10 = vcmp.eq.s32.totalorder %v1332_v47, %v1345_v54  ;;  %vm310_vm11 = vcmp.eq.s32.totalorder %v1334_v48, %v1345_v54 }
  0xdf   : > { %v579_v15 = vpop.permute.xlu1 %578  ;;  %v615_v29 = vadd.f32 %v601_v25, %v524_v19  ;;  %v616_v30 = vadd.f32 %v602_v26, %v525_v20 }
  0xe0   : > { %v475_v16 = vpop.permute.xlu0 %474  ;;  %v603_v33 = vsel %vm561_vm2, %v579_v15, 0.0  ;;  %v604_v34 = vsel %vm562_vm3, %v579_v15, 0.0  ;;  %vm492_vm2 = vcmp.eq.s32.totalorder %v1366_v4, %v1359_v1  ;;  %vm493_vm3 = vcmp.eq.s32.totalorder %v1368_v5, %v1359_v1 }
  0xe1   : > { %v629_v42 = vmul.f32 %v615_v29, %v439_v27  ;;  %v630_v45 = vmul.f32 %v616_v30, %v440_v28  ;;  %vm490_vm8 = vcmp.eq.s32.totalorder %v1366_v4, %v475_v16  ;;  %vm491_vm9 = vcmp.eq.s32.totalorder %v1368_v5, %v475_v16 }
  0xe4   : > { %v341_v31 = vpop.permute.xlu1 %340  ;;  %v502_v32 = vpop.permute.xlu0 %501 }
  0xe5   : > { %v526_v35 = vsel %vm484_vm14, %v502_v32, 0.0  ;;  %v527_v36 = vsel %vm485_vm15, %v502_v32, 0.0  ;;  %vm567_vm14 = vcmp.eq.s32.totalorder %v1366_v4, %v1372_v7  ;;  %vm568_vm15 = vcmp.eq.s32.totalorder %v1368_v5, %v1372_v7 }
  0xe6   : > { %v617_v39 = vadd.f32 %v603_v33, %v526_v35  ;;  %v618_v40 = vadd.f32 %v604_v34, %v527_v36  ;;  %v358_v44 = vsel %vm309_vm10, %v341_v31, 0.0  ;;  %v359_v55 = vsel %vm310_vm11, %v341_v31, 0.0 }
  0xe7   : > { %v609_v57 = vsel %vm567_vm14, %v1361_v2, 0.0  ;;  %v610_v58 = vsel %vm568_vm15, %v1361_v2, 0.0  ;;  %v449_v8 = vadd.f32 %v435_v50, %v358_v44  ;;  %v450_v11 = vadd.f32 %v436_v62, %v359_v55 }
  0xe8   : > { %v631_v43 = vmul.f32 %v617_v39, %v441_v37  ;;  %v632_v46 = vmul.f32 %v618_v40, %v442_v38  ;;  %v469_v28 = vpop.permute.xlu0 %468 }
  0xe9   : > { %v415_v49 = vpop.permute.xlu1 %414  ;;  %vm486_vm10 = vcmp.eq.s32.totalorder %v1366_v4, %v469_v28  ;;  %vm487_vm11 = vcmp.eq.s32.totalorder %v1368_v5, %v469_v28 }
  0xea   : > { %v644_v51 = vpack.c.bf16 %v632_v46, %v630_v45  ;;  %v643_v56 = vpack.c.bf16 %v631_v43, %v629_v42  ;;  %v433_v6 = vsel %vm391_vm12, %v415_v49, 0.0  ;;  %v434_v7 = vsel %vm392_vm13, %v415_v49, 0.0 }
  0xeb   : > { %v447_v18 = vadd.f32 %v433_v6, %v356_v60  ;;  %v448_v19 = vadd.f32 %v434_v7, %v357_v61 }
  0xec   : > { %811 = vmatprep.mubr.bf16.mxu0 %v644_v51  ;;  %v510_v34 = vpop.permute.xlu0 %509 }
  0xed   : > { %812 = vmatmul.mubr.bf16.vlgmr.msra.gmra.mrb[0].mxu0 %v643_v56 }
  0xee   : > { %v514_v41 = vpop.permute.xlu1 %513 }
  0xef   : > { %v532_v54 = vsel %vm490_vm8, %v514_v41, 0.0  ;;  %v533_v3 = vsel %vm491_vm9, %v514_v41, 0.0 }
  0xf0   : > { %v623_v12 = vadd.f32 %v609_v57, %v532_v54  ;;  %v624_v13 = vadd.f32 %v610_v58, %v533_v3 }
  0xf2   : > { %v518_v0 = vpop.permute.xlu1 %517  ;;  %v637_v1 = vmul.f32 %v623_v12, %v447_v18  ;;  %v638_v23 = vmul.f32 %v624_v13, %v448_v19  ;;  %v522_v12 = vpop.permute.xlu0 %521 }
  0xf3   : > { %v534_v15 = vsel %vm492_vm2, %v518_v0, 0.0  ;;  %v535_v16 = vsel %vm493_vm3, %v518_v0, 0.0 }
  0xf7   : > { %v595_v14 = vpop.permute.xlu1 %594 }
  0xf8   : > { %v611_v63 = vsel %vm569_vm0, %v595_v14, 0.0  ;;  %v612_v17 = vsel %vm570_vm1, %v595_v14, 0.0 }
  0xf9   : > { %v625_v20 = vadd.f32 %v611_v63, %v534_v15  ;;  %v626_v21 = vadd.f32 %v612_v17, %v535_v16 }
  0xfb   : > { %v639_v22 = vmul.f32 %v625_v20, %v449_v8  ;;  %v640_v24 = vmul.f32 %v626_v21, %v450_v11 }
  0xfc   : > { %v286_v2 = vpop.permute.xlu1 %285 }
  0xfd   : > { %v648_v25 = vpack.c.bf16 %v640_v24, %v638_v23  ;;  %v647_v26 = vpack.c.bf16 %v639_v22, %v637_v1  ;;  %vm303_vm12 = vcmp.eq.s32.totalorder %v1332_v47, %v286_v2  ;;  %vm304_vm13 = vcmp.eq.s32.totalorder %v1334_v48, %v286_v2 }
  0xff   : > { %827 = vmatprep.mubr.bf16.mxu1 %v648_v25 }
 0x100   : > { %828 = vmatmul.mubr.bf16.vlgmr.msra.gmra.mrb[0].mxu1 %v647_v26 }
 0x101   : > { %v370_v27 = vpop.permute.xlu1 %369 }
 0x102   : > { %vm387_vm8 = vcmp.eq.s32.totalorder %v1332_v47, %v370_v27  ;;  %vm388_vm9 = vcmp.eq.s32.totalorder %v1334_v48, %v370_v27 }
 0x105   : > { %v373_v29 = vpop.permute.xlu1 %372 }
 0x106   : > { %vm389_vm4 = vcmp.eq.s32.totalorder %v1332_v47, %v373_v29  ;;  %vm390_vm5 = vcmp.eq.s32.totalorder %v1334_v48, %v373_v29 }
 0x107   : > { %v431_v30 = vsel %vm389_vm4, %v1355_v59, 0.0  ;;  %v432_v31 = vsel %vm390_vm5, %v1355_v59, 0.0 }
 0x108   : > { %v445_v32 = vadd.f32 %v431_v30, %v1340_v52  ;;  %v446_v33 = vadd.f32 %v432_v31, %v1342_v53 }
 0x10a   : > { %v472_v35 = vpop.permute.xlu1 %471 }
 0x10b   : > { %vm488_vm6 = vcmp.eq.s32.totalorder %v1366_v4, %v472_v35  ;;  %vm489_vm7 = vcmp.eq.s32.totalorder %v1368_v5, %v472_v35 }
 0x10c   : > { %v530_v36 = vsel %vm488_vm6, %v510_v34, 0.0  ;;  %v531_v37 = vsel %vm489_vm7, %v510_v34, 0.0 }
 0x10d   : > { %v621_v38 = vadd.f32 %v1374_v9, %v530_v36  ;;  %v622_v39 = vadd.f32 %v1376_v10, %v531_v37 }
 0x10f   : > { %v635_v40 = vmul.f32 %v621_v38, %v445_v32  ;;  %v636_v42 = vmul.f32 %v622_v39, %v446_v33  ;;  %v546_v43 = vpop.permute.xlu1 %545 }
 0x110   : > { %vm563_vm14 = vcmp.eq.s32.totalorder %v1366_v4, %v546_v43  ;;  %vm564_vm15 = vcmp.eq.s32.totalorder %v1368_v5, %v546_v43 }
 0x114   : > { %v298_v59 = vpop.permute.xlu1 %297 }
 0x115   : > { %vm311_vm4 = vcmp.eq.s32.totalorder %v1332_v47, %v298_v59  ;;  %vm312_vm5 = vcmp.eq.s32.totalorder %v1334_v48, %v298_v59 }
 0x118   : > { %v326_v45 = vpop.permute.xlu1 %325 }
 0x119   : > { %v352_v56 = vsel %vm303_vm12, %v326_v45, 0.0  ;;  %v353_v41 = vsel %vm304_vm13, %v326_v45, 0.0 }
 0x11d   : > { %v382_v52 = vpop.permute.xlu1 %381 }
 0x11e   : > { %vm395_vm2 = vcmp.eq.s32.totalorder %v1332_v47, %v382_v52  ;;  %vm396_vm3 = vcmp.eq.s32.totalorder %v1334_v48, %v382_v52 }
 0x121   : > { %v407_v46 = vpop.permute.xlu1 %406 }
 0x122   : > { %v429_v9 = vsel %vm387_vm8, %v407_v46, 0.0  ;;  %v430_v10 = vsel %vm388_vm9, %v407_v46, 0.0  ;;  %vm872_vm8 = vcmask 257024   ;;  %vm879_vm9 = vcmask 253952  }
 0x123   : > { %v443_v44 = vadd.f32 %v429_v9, %v352_v56  ;;  %v444_v55 = vadd.f32 %v430_v10, %v353_v41  ;;  %v882_v10 = vld [vmem:[%s1490_s19 + $0x18] sm:$0x1] }
 0x126   : > { %v481_v53 = vpop.permute.xlu1 %480 }
 0x127   : > { %vm494_vm0 = vcmp.eq.s32.totalorder %v1366_v4, %v481_v53  ;;  %vm495_vm1 = vcmp.eq.s32.totalorder %v1368_v5, %v481_v53 }
 0x128   : > { %v536_v15 = vsel %vm494_vm0, %v522_v12, 0.0  ;;  %v537_v16 = vsel %vm495_vm1, %v522_v12, 0.0 }
 0x12a   : > { %v506_v49 = vpop.permute.xlu1 %505 }
 0x12b   : > { %v528_v61 = vsel %vm486_vm10, %v506_v49, 0.0  ;;  %v529_v50 = vsel %vm487_vm11, %v506_v49, 0.0  ;;  %vm880_vm10 = vsmask.f32 256 }
 0x12c   : > { %vm881_vm11 = vmand %vm879_vm9, %vm880_vm10 }
 0x12f   : > { %v558_v51 = vpop.permute.xlu1 %557 }
 0x130   : > { %vm571_vm6 = vcmp.eq.s32.totalorder %v1366_v4, %v558_v51  ;;  %vm572_vm7 = vcmp.eq.s32.totalorder %v1368_v5, %v558_v51 }
 0x133   : > { %v583_v60 = vpop.permute.xlu1 %582 }
 0x134   : > { %v605_v62 = vsel %vm563_vm14, %v583_v60, 0.0  ;;  %v606_v0 = vsel %vm564_vm15, %v583_v60, 0.0 }
 0x135   : > { %v619_v54 = vadd.f32 %v605_v62, %v528_v61  ;;  %v620_v3 = vadd.f32 %v606_v0, %v529_v50 }
 0x137   : > { %v633_v57 = vmul.f32 %v619_v54, %v443_v44  ;;  %v634_v58 = vmul.f32 %v620_v3, %v444_v55 }
 0x138   : > { %v346_v6 = vpop.permute.xlu1 %345 }
 0x139   : > { %v646_v7 = vpack.c.bf16 %v636_v42, %v634_v58  ;;  %v645_v8 = vpack.c.bf16 %v635_v40, %v633_v57  ;;  %v360_v17 = vsel %vm311_vm4, %v346_v6, 0.0  ;;  %v361_v18 = vsel %vm312_vm5, %v346_v6, 0.0 }
 0x13b   : > { %819 = vmatprep.mubr.bf16.mxu0 %v646_v7 }
 0x13c   : > { %820 = vmatmul.mubr.bf16.gmra.mrb[4].mxu0 %v645_v8 }
 0x13d   : > { %v423_v11 = vpop.permute.xlu1 %422 }
 0x13e   : > { %v437_v13 = vsel %vm395_vm2, %v423_v11, 0.0  ;;  %v438_v14 = vsel %vm396_vm3, %v423_v11, 0.0 }
 0x13f   : > { %v451_v21 = vadd.f32 %v437_v13, %v360_v17  ;;  %v452_v1 = vadd.f32 %v438_v14, %v361_v18 }
 0x142   : > { %v599_v63 = vpop.permute.xlu1 %598 }
 0x143   : > { %v613_v19 = vsel %vm571_vm6, %v599_v63, 0.0  ;;  %v614_v20 = vsel %vm572_vm7, %v599_v63, 0.0 }
 0x144   : > { %v627_v22 = vadd.f32 %v613_v19, %v536_v15  ;;  %v628_v47 = vadd.f32 %v614_v20, %v537_v16 }
 0x146   : > { %v641_v23 = vmul.f32 %v627_v22, %v451_v21  ;;  %v642_v48 = vmul.f32 %v628_v47, %v452_v1 }
 0x148   : > { %v650_v24 = vpack.c.bf16 %v642_v48, %v642_v48  ;;  %v649_v2 = vpack.c.bf16 %v641_v23, %v641_v23 }
 0x14a   : > { %835 = vmatprep.mubr.bf16.mxu1 %v650_v24 }
 0x14b   : > { %836 = vmatmul.mubr.bf16.gmra.mrb[4].mxu1 %v649_v2 }
 0x1c0   : > { %v1024_v4 = vpop.f32.mrb[0].mxu0 }
 0x1c1   : > { %v1025_v25 = vpop.f32.mrb[1].mxu0 }
 0x1c2   : > { %v1026_v5 = vadd.f32 %v1025_v25, %v1024_v4  ;;  %v1027_v26 = vpop.f32.mrb[2].mxu0 }
 0x1c3   : > { %v1028_v27 = vpop.f32.mrb[3].mxu0 }
 0x1c4   : > { %v1001_v28 = vpack.c.bf16 %v1026_v5, %v1026_v5  ;;  %v1029_v29 = vadd.f32 %v1028_v27, %v1027_v26 }
 0x1c6   : > { %873 = vst.msk [vmem:[%s1490_s19] sm:$0xf] %vm872_vm8, %v1001_v28  ;;  %v1002_v30 = vpack.c.bf16 %v1029_v29, %v1029_v29 }
 0x1c8   : > { %874 = vst.msk [vmem:[%s1490_s19 + $0x4] sm:$0xf] %vm872_vm8, %v1002_v30 }
 0x1d3   : > { %v1036_v31 = vpop.f32.mrb[0].mxu1 }
 0x1d4   : > { %v1037_v32 = vpop.f32.mrb[1].mxu1 }
 0x1d5   : > { %v1038_v33 = vadd.f32 %v1037_v32, %v1036_v31  ;;  %v1039_v34 = vpop.f32.mrb[2].mxu1 }
 0x1d6   : > { %v1040_v35 = vpop.f32.mrb[3].mxu1 }
 0x1d7   : > { %v1005_v36 = vpack.c.bf16 %v1038_v33, %v1038_v33  ;;  %v1041_v37 = vadd.f32 %v1040_v35, %v1039_v34 }
 0x1d9   : > { %877 = vst.msk [vmem:[%s1490_s19 + $0x10] sm:$0xf] %vm872_vm8, %v1005_v36  ;;  %v1006_v38 = vpack.c.bf16 %v1041_v37, %v1041_v37 }
 0x1db   : > { %878 = vst.msk [vmem:[%s1490_s19 + $0x14] sm:$0xf] %vm872_vm8, %v1006_v38 }
 0x20f   : > { %v1030_v39 = vpop.f32.mrb[4].mxu0 }
 0x210   : > { %v1031_v40 = vpop.f32.mrb[5].mxu0 }
 0x211   : > { %v1032_v42 = vadd.f32 %v1031_v40, %v1030_v39  ;;  %v1033_v43 = vpop.f32.mrb[6].mxu0 }
 0x212   : > { %v1034_v59 = vpop.f32.mrb[7].mxu0 }
 0x213   : > { %v1003_v45 = vpack.c.bf16 %v1032_v42, %v1032_v42  ;;  %v1035_v52 = vadd.f32 %v1034_v59, %v1033_v43 }
 0x215   : > { %875 = vst.msk [vmem:[%s1490_s19 + $0x8] sm:$0xf] %vm872_vm8, %v1003_v45  ;;  %v1004_v46 = vpack.c.bf16 %v1035_v52, %v1035_v52 }
 0x217   : > { %876 = vst.msk [vmem:[%s1490_s19 + $0xc] sm:$0xf] %vm872_vm8, %v1004_v46 }
 0x21e   : > { %v1042_v53 = vpop.f32.mrb[4].mxu1 }
 0x21f   : > { %v1043_v49 = vpop.f32.mrb[5].mxu1 }
 0x220   : > { %v1044_v51 = vadd.f32 %v1043_v49, %v1042_v53  ;;  %v1045_v9 = vpop.f32.mrb[6].mxu1 }
 0x221   : > { %v1046_v56 = vpop.f32.mrb[7].mxu1 }
 0x222   : > { %v1007_v41 = vpack.c.bf16 %v1044_v51, %v1044_v51 }
 0x224   : > { %v883_v60 = vsel %vm881_vm11, %v1007_v41, %v882_v10 }
 0x225   : > { %884 = vst [vmem:[%s1490_s19 + $0x18] sm:$0x1] %v883_v60 }
 0x226 PF: > { %s21_s23 = sadd.s32 1, %s1142_s23  }
 0x227   : > { %p18_p10 = scmp.ge.s32.totalorder %s21_s23, 34  }
 0x229   :  { %20 = sbr.rel (!%p18_p10) target bundleno = 16 (0x10), region = 73 }

// kernel: faster_rcnn_forward.7
= control target key start
LH: loop header
LB: loop body
LE: loop exit
PB: predicated region body
PF: predicated region fallthrough
CT: control target
= control target key end

     0   :  { %vm1408_vm0 = vcmask 523264   ;;  %s2527_s1 = inlined_call_operand.vmem [shape: bf16[1664,64], index: 1, kind: input, shape index: {}]   ;;  %s2528_s0 = inlined_call_operand.vmem [shape: bf16[32,1664], index: 0, kind: input, shape index: {}]   ;;  %s2529_s3 = inlined_call_operand.vmem [shape: bf16[64,128], index: 3, kind: input, shape index: {}]   ;;  %s2530_s2 = inlined_call_operand.vmem [shape: f32[1,64], index: 2, kind: input, shape index: {}]   ;;  %s2531_s4 = inlined_call_operand.vmem [shape: f32[1,128], index: 4, kind: input, shape index: {}]   ;;  %s2532_s5 = inlined_call_operand.vmem [shape: f32[32,128], index: 5, kind: output, shape index: {}]  }
   0x1   :  { %v1879_v0 = vld [vmem:[%s2527_s1 + $0x40] sm:$0xff]   ;;  %v1883_v4 = vld [vmem:[%s2527_s1 + $0x48] sm:$0xff]   ;;  %v1887_v8 = vld [vmem:[%s2527_s1 + $0x50] sm:$0xff]  }
   0x2   :  { %v1880_v1 = vld [vmem:[%s2527_s1] sm:$0xff]   ;;  %1663 = vmatprep.subr.bf16.mxu0 %v1879_v0  ;;  %v1884_v5 = vld [vmem:[%s2527_s1 + $0x8] sm:$0xff]   ;;  %v1888_v9 = vld [vmem:[%s2527_s1 + $0x10] sm:$0xff]  }
   0x3   :  { %v1881_v2 = vld [vmem:[%s2527_s1 + $0xc0] sm:$0xff]   ;;  %1664 = vmatpush3.bf16.msra.mxu0 %v1880_v1  ;;  %v1885_v6 = vld [vmem:[%s2527_s1 + $0xc8] sm:$0xff]   ;;  %v1889_v10 = vld [vmem:[%s2527_s1 + $0xd0] sm:$0xff]  }
   0x4   :  { %v1882_v3 = vld [vmem:[%s2527_s1 + $0x80] sm:$0xff]   ;;  %1691 = vmatprep.subr.bf16.mxu1 %v1881_v2  ;;  %1665 = vmatprep.subr.bf16.mxu0 %v1883_v4  ;;  %v1886_v7 = vld [vmem:[%s2527_s1 + $0x88] sm:$0xff]   ;;  %v1890_v11 = vld [vmem:[%s2527_s1 + $0x90] sm:$0xff]  }
   0x5   :  { %1692 = vmatpush3.bf16.msra.mxu1 %v1882_v3  ;;  %v1891_v12 = vld [vmem:[%s2527_s1 + $0x58] sm:$0xff]   ;;  %v1895_v16 = vld [vmem:[%s2527_s1 + $0x60] sm:$0xff]   ;;  %v1899_v20 = vld [vmem:[%s2527_s1 + $0x68] sm:$0xff]  }
   0x6   :  { %1693 = vmatprep.subr.bf16.mxu1 %v1885_v6  ;;  %v1892_v13 = vld [vmem:[%s2527_s1 + $0x18] sm:$0xff]   ;;  %v1896_v17 = vld [vmem:[%s2527_s1 + $0x20] sm:$0xff]   ;;  %v1900_v21 = vld [vmem:[%s2527_s1 + $0x28] sm:$0xff]  }
   0x7   :  { %1666 = vmatpush3.bf16.msra.mxu0 %v1884_v5  ;;  %v1893_v14 = vld [vmem:[%s2527_s1 + $0xd8] sm:$0xff]   ;;  %v1897_v18 = vld [vmem:[%s2527_s1 + $0xe0] sm:$0xff]   ;;  %v1901_v22 = vld [vmem:[%s2527_s1 + $0xe8] sm:$0xff]  }
   0x8   :  { %1667 = vmatprep.subr.bf16.mxu0 %v1887_v8  ;;  %v1894_v15 = vld [vmem:[%s2527_s1 + $0x98] sm:$0xff]   ;;  %v1898_v19 = vld [vmem:[%s2527_s1 + $0xa0] sm:$0xff]   ;;  %v1902_v23 = vld [vmem:[%s2527_s1 + $0xa8] sm:$0xff]  }
   0x9   :  { %1694 = vmatpush3.bf16.msra.mxu1 %v1886_v7  ;;  %v1903_v24 = vld [vmem:[%s2527_s1 + $0x70] sm:$0xff]   ;;  %v1907_v28 = vld [vmem:[%s2527_s1 + $0x78] sm:$0xff]   ;;  %v1914_v34 = vld [vmem:[%s2527_s1 + $0x140] sm:$0xff]  }
   0xa   :  { %1695 = vmatprep.subr.bf16.mxu1 %v1889_v10  ;;  %v1904_v25 = vld [vmem:[%s2527_s1 + $0x30] sm:$0xff]   ;;  %v1908_v29 = vld [vmem:[%s2527_s1 + $0x38] sm:$0xff]   ;;  %v1917_v36 = vld [vmem:[%s2528_s0 + $0xc] ss:$52 sps:$4 sm:$0xff]  }
   0xb   :  { %1668 = vmatpush3.bf16.msra.mxu0 %v1888_v9  ;;  %v1905_v26 = vld [vmem:[%s2527_s1 + $0xf0] sm:$0xff]   ;;  %v1909_v30 = vld [vmem:[%s2527_s1 + $0xf8] sm:$0xff]   ;;  %v1918_v37 = vld [vmem:[%s2527_s1 + $0x100] sm:$0xff]   ;;  %1101 = vmatprep.mubr.bf16.mxu1 %v1917_v36 }
   0xc   :  { %1669 = vmatprep.subr.bf16.mxu0 %v1891_v12  ;;  %v1906_v27 = vld [vmem:[%s2527_s1 + $0xb0] sm:$0xff]   ;;  %v1912_v32 = vld [vmem:[%s2528_s0 + $0x4] ss:$52 sps:$4 sm:$0xff]   ;;  %v1915_v35 = vld [vmem:[%s2528_s0 + $0x8] ss:$52 sps:$4 sm:$0xff]  }
   0xd   :  { %1696 = vmatpush3.bf16.msra.mxu1 %v1890_v11  ;;  %v1910_v31 = vld [vmem:[%s2528_s0] ss:$52 sps:$4 sm:$0xff]   ;;  %v1913_v33 = vld [vmem:[%s2527_s1 + $0xb8] sm:$0xff]   ;;  %1052 = vmatprep.mubr.bf16.mxu0 %v1912_v32  ;;  %v1921_v40 = vld [vmem:[%s2527_s1 + $0x148] sm:$0xff]  }
   0xe   :  { %1697 = vmatprep.subr.bf16.mxu1 %v1893_v14  ;;  %v1919_v38 = vld [vmem:[%s2527_s1 + $0x1c0] sm:$0xff]   ;;  %v1922_v41 = vld [vmem:[%s2527_s1 + $0x108] sm:$0xff]   ;;  %v1925_v44 = vld [vmem:[%s2527_s1 + $0x150] sm:$0xff]  }
   0xf   :  { %1670 = vmatpush3.bf16.msra.mxu0 %v1892_v13  ;;  %v1920_v39 = vld [vmem:[%s2527_s1 + $0x180] sm:$0xff]   ;;  %v1923_v42 = vld [vmem:[%s2527_s1 + $0x1c8] sm:$0xff]   ;;  %v1926_v45 = vld [vmem:[%s2527_s1 + $0x110] sm:$0xff]  }
  0x10   :  { %1671 = vmatprep.subr.bf16.mxu0 %v1895_v16  ;;  %v1924_v43 = vld [vmem:[%s2527_s1 + $0x188] sm:$0xff]   ;;  %v1927_v46 = vld [vmem:[%s2527_s1 + $0x1d0] sm:$0xff]   ;;  %v1929_v48 = vld [vmem:[%s2527_s1 + $0x158] sm:$0xff]  }
  0x11   :  { %1698 = vmatpush3.bf16.msra.mxu1 %v1894_v15  ;;  %v1928_v47 = vld [vmem:[%s2527_s1 + $0x190] sm:$0xff]   ;;  %v1930_v49 = vld [vmem:[%s2527_s1 + $0x118] sm:$0xff]   ;;  %v1933_v52 = vld [vmem:[%s2527_s1 + $0x160] sm:$0xff]  }
  0x12   :  { %1699 = vmatprep.subr.bf16.mxu1 %v1897_v18  ;;  %v1931_v50 = vld [vmem:[%s2527_s1 + $0x1d8] sm:$0xff]   ;;  %v1934_v53 = vld [vmem:[%s2527_s1 + $0x120] sm:$0xff]   ;;  %v1937_v56 = vld [vmem:[%s2527_s1 + $0x168] sm:$0xff]  }
  0x13   :  { %1672 = vmatpush3.bf16.msra.mxu0 %v1896_v17  ;;  %v1932_v51 = vld [vmem:[%s2527_s1 + $0x198] sm:$0xff]   ;;  %v1935_v54 = vld [vmem:[%s2527_s1 + $0x1e0] sm:$0xff]   ;;  %v1940_v58 = vld [vmem:[%s2527_s1 + $0x128] sm:$0xff]  }
  0x14   :  { %1673 = vmatprep.subr.bf16.mxu0 %v1899_v20  ;;  %v1936_v55 = vld [vmem:[%s2527_s1 + $0x1a0] sm:$0xff]   ;;  %v1941_v59 = vld [vmem:[%s2528_s0 + $0x68] ss:$52 sps:$4 sm:$0xff]   ;;  %v1947_v0 = vld [vmem:[%s2527_s1 + $0x170] sm:$0xff]  }
  0x15   :  { %1700 = vmatpush3.bf16.msra.mxu1 %v1898_v19  ;;  %v1938_v57 = vld [vmem:[%s2528_s0 + $0x6c] ss:$52 sps:$4 sm:$0xff]   ;;  %v1943_v61 = vld [vmem:[%s2528_s0 + $0x74] ss:$52 sps:$4 sm:$0xff]   ;;  %v1946_v63 = vld [vmem:[%s2528_s0 + $0x70] ss:$52 sps:$4 sm:$0xff]  }
  0x16   :  { %1701 = vmatprep.subr.bf16.mxu1 %v1901_v22  ;;  %v1942_v60 = vld [vmem:[%s2527_s1 + $0x1e8] sm:$0xff]   ;;  %v1948_v1 = vld [vmem:[%s2527_s1 + $0x130] sm:$0xff]   ;;  %v1951_v4 = vld [vmem:[%s2527_s1 + $0x178] sm:$0xff]  }
  0x17   :  { %1674 = vmatpush3.bf16.msra.mxu0 %v1900_v21  ;;  %v1945_v62 = vld [vmem:[%s2527_s1 + $0x1a8] sm:$0xff]   ;;  %v1949_v2 = vld [vmem:[%s2527_s1 + $0x1f0] sm:$0xff]   ;;  %v1952_v5 = vld [vmem:[%s2527_s1 + $0x138] sm:$0xff]  }
  0x18   :  { %1675 = vmatprep.subr.bf16.mxu0 %v1903_v24  ;;  %v1950_v3 = vld [vmem:[%s2527_s1 + $0x1b0] sm:$0xff]   ;;  %v1953_v6 = vld [vmem:[%s2527_s1 + $0x1f8] sm:$0xff]   ;;  %v1958_v10 = vld [vmem:[%s2527_s1 + $0x240] sm:$0xff]  }
  0x19   :  { %1702 = vmatpush3.bf16.msra.mxu1 %v1902_v23  ;;  %v1954_v7 = vld [vmem:[%s2528_s0 + $0x10] ss:$52 sps:$4 sm:$0xff]   ;;  %v1956_v8 = vld [vmem:[%s2528_s0 + $0x14] ss:$52 sps:$4 sm:$0xff]   ;;  %v1957_v9 = vld [vmem:[%s2527_s1 + $0x1b8] sm:$0xff]  }
  0x1a   :  { %1703 = vmatprep.subr.bf16.mxu1 %v1905_v26  ;;  %v1959_v11 = vld [vmem:[%s2528_s0 + $0x18] ss:$52 sps:$4 sm:$0xff]   ;;  %v1961_v12 = vld [vmem:[%s2528_s0 + $0x1c] ss:$52 sps:$4 sm:$0xff]   ;;  %v1962_v13 = vld [vmem:[%s2527_s1 + $0x200] sm:$0xff]  }
  0x1b   :  { %1676 = vmatpush3.bf16.msra.mxu0 %v1904_v25  ;;  %v1963_v14 = vld [vmem:[%s2527_s1 + $0x2c0] sm:$0xff]   ;;  %v1965_v16 = vld [vmem:[%s2527_s1 + $0x248] sm:$0xff]   ;;  %v1968_v19 = vld [vmem:[%s2528_s0 + $0x7c] ss:$52 sps:$4 sm:$0xff]  }
  0x1c   :  { %1677 = vmatprep.subr.bf16.mxu0 %v1907_v28  ;;  %v1964_v15 = vld [vmem:[%s2527_s1 + $0x280] sm:$0xff]   ;;  %v1966_v17 = vld [vmem:[%s2527_s1 + $0x208] sm:$0xff]   ;;  %v1972_v22 = vld [vmem:[%s2527_s1 + $0x250] sm:$0xff]  }
  0x1d   :  { %1704 = vmatpush3.bf16.msra.mxu1 %v1906_v27  ;;  %v1967_v18 = vld [vmem:[%s2527_s1 + $0x2c8] sm:$0xff]   ;;  %v1973_v23 = vld [vmem:[%s2528_s0 + $0x84] ss:$52 sps:$4 sm:$0xff]   ;;  %v1975_v24 = vld [vmem:[%s2527_s1 + $0x210] sm:$0xff]  }
  0x1e   :  { %1705 = vmatprep.subr.bf16.mxu1 %v1909_v30  ;;  %v1970_v20 = vld [vmem:[%s2527_s1 + $0x288] sm:$0xff]   ;;  %v1976_v25 = vld [vmem:[%s2528_s0 + $0x80] ss:$52 sps:$4 sm:$0xff]   ;;  %v1979_v28 = vld [vmem:[%s2527_s1 + $0x258] sm:$0xff]  }
  0x1f   :  { %1678 = vmatpush3.bf16.msra.mxu0 %v1908_v29  ;;  %v1971_v21 = vld [vmem:[%s2528_s0 + $0x78] ss:$52 sps:$4 sm:$0xff]   ;;  %v1977_v26 = vld [vmem:[%s2527_s1 + $0x2d0] sm:$0xff]   ;;  %v1983_v32 = vld [vmem:[%s2527_s1 + $0x260] sm:$0xff]  }
  0x20   :  { %1719 = vmatprep.subr.bf16.mxu0 %v1914_v34  ;;  %v1978_v27 = vld [vmem:[%s2527_s1 + $0x290] sm:$0xff]   ;;  %v1980_v29 = vld [vmem:[%s2527_s1 + $0x218] sm:$0xff]   ;;  %v1985_v34 = vld [vmem:[%s2527_s1 + $0x2e0] sm:$0xff]  }
  0x21   :  { %1706 = vmatpush3.bf16.msra.mxu1 %v1913_v33  ;;  %v1981_v30 = vld [vmem:[%s2527_s1 + $0x2d8] sm:$0xff]   ;;  %v1984_v33 = vld [vmem:[%s2527_s1 + $0x220] sm:$0xff]   ;;  %v1987_v36 = vld [vmem:[%s2527_s1 + $0x268] sm:$0xff]  }
  0x22   :  { %1053 = vmatmul.mubr.bf16.vlgmr.msra.gmra.mrb[0].mxu0 %v1910_v31  ;;  %1747 = vmatprep.subr.bf16.mxu1 %v1919_v38  ;;  %v1982_v31 = vld [vmem:[%s2527_s1 + $0x298] sm:$0xff]   ;;  %v1989_v38 = vld [vmem:[%s2527_s1 + $0x2e8] sm:$0xff]  }
  0x23   :  { %1720 = vmatpush3.bf16.msra.mxu0 %v1918_v37  ;;  %1060 = vmatprep.mubr.bf16.mxu0 %v1938_v57  ;;  %v1988_v37 = vld [vmem:[%s2527_s1 + $0x228] sm:$0xff]  }
  0x24   :  { %1102 = vmatmul.mubr.bf16.vlgmr.msra.gmra.mrb[0].mxu1 %v1915_v35  ;;  %1721 = vmatprep.subr.bf16.mxu0 %v1921_v40  ;;  %v1986_v35 = vld [vmem:[%s2527_s1 + $0x2a0] sm:$0xff]   ;;  %v1991_v40 = vld [vmem:[%s2527_s1 + $0x270] sm:$0xff]  }
  0x25   :  { %1748 = vmatpush3.bf16.msra.mxu1 %v1920_v39  ;;  %1109 = vmatprep.mubr.bf16.mxu1 %v1943_v61  ;;  %v1990_v39 = vld [vmem:[%s2527_s1 + $0x2a8] sm:$0xff]   ;;  %v2019_v61 = vld [vmem:[%s2528_s0 + $0x30] ss:$52 sps:$4 sm:$0xff]  }
  0x26   :  { %1749 = vmatprep.subr.bf16.mxu1 %v1923_v42  ;;  %v1993_v42 = vld [vmem:[%s2527_s1 + $0x2f0] sm:$0xff]  }
  0x27   :  { %1722 = vmatpush3.bf16.msra.mxu0 %v1922_v41  ;;  %v1992_v41 = vld [vmem:[%s2527_s1 + $0x230] sm:$0xff]  }
  0x28   :  { %1723 = vmatprep.subr.bf16.mxu0 %v1925_v44  ;;  %v1995_v44 = vld [vmem:[%s2527_s1 + $0x278] sm:$0xff]   ;;  %v2011_v57 = vld [vmem:[%s2528_s0 + $0x94] ss:$52 sps:$4 sm:$0xff]  }
  0x29   :  { %1750 = vmatpush3.bf16.msra.mxu1 %v1924_v43  ;;  %v1994_v43 = vld [vmem:[%s2527_s1 + $0x2b0] sm:$0xff]  }
  0x2a   :  { %1751 = vmatprep.subr.bf16.mxu1 %v1927_v46  ;;  %1061 = vmatmul.mubr.bf16.gmra.mrb[4].mxu0 %v1941_v59  ;;  %v1997_v46 = vld [vmem:[%s2527_s1 + $0x2f8] sm:$0xff]   ;;  %v2013_v59 = vld [vmem:[%s2528_s0 + $0x90] ss:$52 sps:$4 sm:$0xff]  }
  0x2b   :  { %1724 = vmatpush3.bf16.msra.mxu0 %v1926_v45  ;;  %1150 = vmatprep.mubr.bf16.mxu0 %v1956_v8  ;;  %v1996_v45 = vld [vmem:[%s2527_s1 + $0x238] sm:$0xff]  }
  0x2c   :  { %1725 = vmatprep.subr.bf16.mxu0 %v1929_v48  ;;  %1110 = vmatmul.mubr.bf16.gmra.mrb[4].mxu1 %v1946_v63  ;;  %v2000_v48 = vld [vmem:[%s2528_s0 + $0x24] ss:$52 sps:$4 sm:$0xff]   ;;  %v2017_v63 = vld [vmem:[%s2527_s1 + $0x330] sm:$0xff]  }
  0x2d   :  { %1752 = vmatpush3.bf16.msra.mxu1 %v1928_v47  ;;  %1199 = vmatprep.mubr.bf16.mxu1 %v1961_v12  ;;  %v1998_v47 = vld [vmem:[%s2528_s0 + $0x20] ss:$52 sps:$4 sm:$0xff]  }
  0x2e   :  { %1753 = vmatprep.subr.bf16.mxu1 %v1931_v50  ;;  %v2002_v50 = vld [vmem:[%s2527_s1 + $0x300] sm:$0xff]  }
  0x2f   :  { %1726 = vmatpush3.bf16.msra.mxu0 %v1930_v49  ;;  %v2001_v49 = vld [vmem:[%s2527_s1 + $0x2b8] sm:$0xff]  }
  0x30   :  { %1727 = vmatprep.subr.bf16.mxu0 %v1933_v52  ;;  %v2005_v52 = vld [vmem:[%s2528_s0 + $0x2c] ss:$52 sps:$4 sm:$0xff]  }
  0x31   :  { %1754 = vmatpush3.bf16.msra.mxu1 %v1932_v51  ;;  %v2003_v51 = vld [vmem:[%s2528_s0 + $0x28] ss:$52 sps:$4 sm:$0xff]  }
  0x32   :  { %1755 = vmatprep.subr.bf16.mxu1 %v1935_v54  ;;  %v2007_v54 = vld [vmem:[%s2528_s0 + $0x8c] ss:$52 sps:$4 sm:$0xff]  }
  0x33   :  { %1728 = vmatpush3.bf16.msra.mxu0 %v1934_v53  ;;  %v2006_v53 = vld [vmem:[%s2527_s1 + $0x308] sm:$0xff]  }
  0x34   :  { %1729 = vmatprep.subr.bf16.mxu0 %v1937_v56  ;;  %v2010_v56 = vld [vmem:[%s2527_s1 + $0x310] sm:$0xff]  }
  0x35   :  { %1756 = vmatpush3.bf16.msra.mxu1 %v1936_v55  ;;  %v2009_v55 = vld [vmem:[%s2528_s0 + $0x88] ss:$52 sps:$4 sm:$0xff]  }
  0x36   :  { %1757 = vmatprep.subr.bf16.mxu1 %v1942_v60  ;;  %v2015_v60 = vld [vmem:[%s2527_s1 + $0x320] sm:$0xff]  }
  0x37   :  { %1730 = vmatpush3.bf16.msra.mxu0 %v1940_v58  ;;  %v2014_v58 = vld [vmem:[%s2527_s1 + $0x318] sm:$0xff]  }
  0x38   :  { %1731 = vmatprep.subr.bf16.mxu0 %v1947_v0  ;;  %v2018_v0 = vld [vmem:[%s2527_s1 + $0x338] sm:$0xff]  }
  0x39   :  { %1758 = vmatpush3.bf16.msra.mxu1 %v1945_v62  ;;  %v2016_v62 = vld [vmem:[%s2527_s1 + $0x328] sm:$0xff]  }
  0x3a   :  { %1759 = vmatprep.subr.bf16.mxu1 %v1949_v2  ;;  %v2021_v2 = vld [vmem:[%s2529_s3] sm:$0xff]  }
  0x3b   :  { %1732 = vmatpush3.bf16.msra.mxu0 %v1948_v1  ;;  %v2020_v1 = vld [vmem:[%s2528_s0 + $0x98] ss:$52 sps:$4 sm:$0xff]  }
  0x3c   :  { %1733 = vmatprep.subr.bf16.mxu0 %v1951_v4  ;;  %v2023_v4 = vld [vmem:[%s2529_s3 + $0x10] sm:$0xff]  }
  0x3d   :  { %1760 = vmatpush3.bf16.msra.mxu1 %v1950_v3  ;;  %v2022_v3 = vld [vmem:[%s2529_s3 + $0x8] sm:$0xff]  }
  0x3e   :  { %1761 = vmatprep.subr.bf16.mxu1 %v1953_v6 }
  0x3f   :  { %1734 = vmatpush3.bf16.msra.mxu0 %v1952_v5  ;;  %v2024_v5 = vld [vmem:[%s2529_s3 + $0x18] sm:$0xff]  }
  0x40   :  { %1775 = vmatprep.subr.bf16.mxu0 %v1958_v10 }
  0x41   :  { %1762 = vmatpush3.bf16.msra.mxu1 %v1957_v9 }
  0x42   :  { %1151 = vmatmul.mubr.bf16.vlgmr.msra.gmra.mrb[8].mxu0 %v1954_v7  ;;  %1803 = vmatprep.subr.bf16.mxu1 %v1963_v14  ;;  %v1525_v7 = vld [vmem:[%s2530_s2] ss:$0 sm:$0xff] }
  0x43   :  { %1776 = vmatpush3.bf16.msra.mxu0 %v1962_v13  ;;  %1158 = vmatprep.mubr.bf16.mxu0 %v1968_v19 }
  0x44   :  { %1200 = vmatmul.mubr.bf16.vlgmr.msra.gmra.mrb[8].mxu1 %v1959_v11  ;;  %1777 = vmatprep.subr.bf16.mxu0 %v1965_v16 }
  0x45   :  { %1804 = vmatpush3.bf16.msra.mxu1 %v1964_v15  ;;  %1207 = vmatprep.mubr.bf16.mxu1 %v1973_v23 }
  0x46   :  { %1805 = vmatprep.subr.bf16.mxu1 %v1967_v18 }
  0x47   :  { %1778 = vmatpush3.bf16.msra.mxu0 %v1966_v17 }
  0x48   :  { %1779 = vmatprep.subr.bf16.mxu0 %v1972_v22 }
  0x49   :  { %1806 = vmatpush3.bf16.msra.mxu1 %v1970_v20 }
  0x4a   :  { %1159 = vmatmul.mubr.bf16.gmra.mrb[12].mxu0 %v1971_v21  ;;  %1807 = vmatprep.subr.bf16.mxu1 %v1977_v26 }
  0x4b   :  { %1780 = vmatpush3.bf16.msra.mxu0 %v1975_v24  ;;  %1248 = vmatprep.mubr.bf16.mxu0 %v2000_v48 }
  0x4c   :  { %1208 = vmatmul.mubr.bf16.gmra.mrb[12].mxu1 %v1976_v25  ;;  %1781 = vmatprep.subr.bf16.mxu0 %v1979_v28 }
  0x4d   :  { %1808 = vmatpush3.bf16.msra.mxu1 %v1978_v27  ;;  %1297 = vmatprep.mubr.bf16.mxu1 %v2005_v52 }
  0x4e   :  { %1809 = vmatprep.subr.bf16.mxu1 %v1981_v30 }
  0x4f   :  { %1782 = vmatpush3.bf16.msra.mxu0 %v1980_v29 }
  0x50   :  { %1783 = vmatprep.subr.bf16.mxu0 %v1983_v32 }
  0x51   :  { %1810 = vmatpush3.bf16.msra.mxu1 %v1982_v31 }
  0x52   :  { %1811 = vmatprep.subr.bf16.mxu1 %v1985_v34 }
  0x53   :  { %1784 = vmatpush3.bf16.msra.mxu0 %v1984_v33 }
  0x54   :  { %1785 = vmatprep.subr.bf16.mxu0 %v1987_v36 }
  0x55   :  { %1812 = vmatpush3.bf16.msra.mxu1 %v1986_v35 }
  0x56   :  { %1813 = vmatprep.subr.bf16.mxu1 %v1989_v38 }
  0x57   :  { %1786 = vmatpush3.bf16.msra.mxu0 %v1988_v37 }
  0x58   :  { %1787 = vmatprep.subr.bf16.mxu0 %v1991_v40 }
  0x59   :  { %1814 = vmatpush3.bf16.msra.mxu1 %v1990_v39 }
  0x5a   :  { %1815 = vmatprep.subr.bf16.mxu1 %v1993_v42 }
  0x5b   :  { %1788 = vmatpush3.bf16.msra.mxu0 %v1992_v41 }
  0x5c   :  { %1789 = vmatprep.subr.bf16.mxu0 %v1995_v44 }
  0x5d   :  { %1816 = vmatpush3.bf16.msra.mxu1 %v1994_v43 }
  0x5e   :  { %1817 = vmatprep.subr.bf16.mxu1 %v1997_v46 }
  0x5f   :  { %1790 = vmatpush3.bf16.msra.mxu0 %v1996_v45 }
  0x60   :  { %1847 = vmatprep.subr.bf16.mxu0 %v2002_v50 }
  0x61   :  { %1818 = vmatpush3.bf16.msra.mxu1 %v2001_v49 }
  0x62   :  { %1249 = vmatmul.mubr.bf16.vlgmr.msra.gmra.mrb[16].mxu0 %v1998_v47  ;;  %1867 = vmatprep.subr.bf16.mxu1 %v2021_v2 }
  0x63   :  { %1848 = vmatpush3.bf16.msra.mxu0 %v2002_v50  ;;  %1256 = vmatprep.mubr.bf16.mxu0 %v2007_v54 }
  0x64   :  { %1298 = vmatmul.mubr.bf16.vlgmr.msra.gmra.mrb[16].mxu1 %v2003_v51  ;;  %1849 = vmatprep.subr.bf16.mxu0 %v2006_v53 }
  0x65   :  { %1305 = vmatprep.mubr.bf16.mxu1 %v2011_v57  ;;  %1868 = vmatpush3.bf16.msra.mxu1 %v2021_v2 }
  0x66   :  { %1869 = vmatprep.subr.bf16.mxu1 %v2022_v3 }
  0x67   :  { %1850 = vmatpush3.bf16.msra.mxu0 %v2006_v53 }
  0x68   :  { %1851 = vmatprep.subr.bf16.mxu0 %v2010_v56 }
  0x69   :  { %1870 = vmatpush3.bf16.msra.mxu1 %v2022_v3 }
  0x6a   :  { %1257 = vmatmul.mubr.bf16.gmra.mrb[20].mxu0 %v2009_v55  ;;  %1871 = vmatprep.subr.bf16.mxu1 %v2023_v4 }
  0x6b   :  { %1852 = vmatpush3.bf16.msra.mxu0 %v2010_v56  ;;  %1863 = vmatprep.mubr.bf16.mxu0 %v2019_v61 }
  0x6c   :  { %1853 = vmatprep.subr.bf16.mxu0 %v2014_v58  ;;  %1306 = vmatmul.mubr.bf16.gmra.mrb[20].mxu1 %v2013_v59 }
  0x6d   :  { %1872 = vmatpush3.bf16.msra.mxu1 %v2023_v4 }
  0x6e   :  { %1873 = vmatprep.subr.bf16.mxu1 %v2024_v5 }
  0x6f   :  { %1854 = vmatpush3.bf16.msra.mxu0 %v2014_v58 }
  0x70   :  { %1855 = vmatprep.subr.bf16.mxu0 %v2015_v60 }
  0x71   :  { %1874 = vmatpush3.bf16.msra.mxu1 %v2024_v5 }
  0x73   :  { %1856 = vmatpush3.bf16.msra.mxu0 %v2015_v60 }
  0x74   :  { %1857 = vmatprep.subr.bf16.mxu0 %v2016_v62 }
  0x77   :  { %1858 = vmatpush3.bf16.msra.mxu0 %v2016_v62 }
  0x78   :  { %1859 = vmatprep.subr.bf16.mxu0 %v2017_v63 }
  0x7b   :  { %1860 = vmatpush3.bf16.msra.mxu0 %v2017_v63 }
  0x7c   :  { %1861 = vmatprep.subr.bf16.mxu0 %v2018_v0 }
  0x7f   :  { %1862 = vmatpush3.bf16.msra.mxu0 %v2018_v0 }
  0x82   :  { %1864 = vmatmul.mubr.bf16.vlgmr.msra.gmra.mrb[24].mxu0 %v2020_v1 }
  0xf5   :  { %v1679_v6 = vpop.f32.mrb[0].mxu0 }
  0xf6   :  { %v1680_v8 = vpop.f32.mrb[1].mxu0 }
  0xf7   :  { %v1681_v9 = vadd.f32 %v1680_v8, %v1679_v6  ;;  %v1682_v10 = vpop.f32.mrb[2].mxu0  ;;  %v1707_v11 = vpop.f32.mrb[0].mxu1 }
  0xf8   :  { %v1683_v12 = vpop.f32.mrb[3].mxu0  ;;  %v1708_v15 = vpop.f32.mrb[1].mxu1 }
  0xf9   :  { %v1055_v13 = vadd.f32 %v1681_v9, %v1525_v7  ;;  %v1684_v14 = vadd.f32 %v1683_v12, %v1682_v10  ;;  %v1709_v16 = vadd.f32 %v1708_v15, %v1707_v11  ;;  %v1710_v17 = vpop.f32.mrb[2].mxu1 }
  0xfa   :  { %v1711_v19 = vpop.f32.mrb[3].mxu1 }
  0xfb   :  { %v1058_v18 = vadd.f32 %v1684_v14, %v1525_v7  ;;  %v1104_v20 = vadd.f32 %v1709_v16, %v1055_v13  ;;  %v1712_v21 = vadd.f32 %v1711_v19, %v1710_v17 }
  0xfd   :  { %v1107_v22 = vadd.f32 %v1712_v21, %v1058_v18  ;;  %v1685_v23 = vpop.f32.mrb[4].mxu0 }
  0xfe   :  { %v1686_v24 = vpop.f32.mrb[5].mxu0 }
  0xff   :  { %v1687_v25 = vadd.f32 %v1686_v24, %v1685_v23  ;;  %v1688_v26 = vpop.f32.mrb[6].mxu0  ;;  %v1713_v27 = vpop.f32.mrb[4].mxu1 }
 0x100   :  { %v1689_v28 = vpop.f32.mrb[7].mxu0  ;;  %v1714_v31 = vpop.f32.mrb[5].mxu1 }
 0x101   :  { %v1063_v29 = vadd.f32 %v1687_v25, %v1525_v7  ;;  %v1690_v30 = vadd.f32 %v1689_v28, %v1688_v26  ;;  %v1715_v32 = vadd.f32 %v1714_v31, %v1713_v27  ;;  %v1716_v33 = vpop.f32.mrb[6].mxu1 }
 0x102   :  { %v1717_v35 = vpop.f32.mrb[7].mxu1 }
 0x103   :  { %v1066_v34 = vadd.f32 %v1690_v30, %v1525_v7  ;;  %v1112_v36 = vadd.f32 %v1715_v32, %v1063_v29  ;;  %v1718_v37 = vadd.f32 %v1717_v35, %v1716_v33 }
 0x105   :  { %v1115_v38 = vadd.f32 %v1718_v37, %v1066_v34 }
 0x115   :  { %v1735_v39 = vpop.f32.mrb[8].mxu0 }
 0x116   :  { %v1736_v40 = vpop.f32.mrb[9].mxu0 }
 0x117   :  { %v1737_v41 = vadd.f32 %v1736_v40, %v1735_v39  ;;  %v1738_v42 = vpop.f32.mrb[10].mxu0  ;;  %v1763_v43 = vpop.f32.mrb[8].mxu1 }
 0x118   :  { %v1739_v44 = vpop.f32.mrb[11].mxu0  ;;  %v1764_v47 = vpop.f32.mrb[9].mxu1 }
 0x119   :  { %v1153_v45 = vadd.f32 %v1737_v41, %v1104_v20  ;;  %v1740_v46 = vadd.f32 %v1739_v44, %v1738_v42  ;;  %v1765_v48 = vadd.f32 %v1764_v47, %v1763_v43  ;;  %v1766_v49 = vpop.f32.mrb[10].mxu1 }
 0x11a   :  { %v1767_v51 = vpop.f32.mrb[11].mxu1 }
 0x11b   :  { %v1156_v50 = vadd.f32 %v1740_v46, %v1107_v22  ;;  %v1202_v52 = vadd.f32 %v1765_v48, %v1153_v45  ;;  %v1768_v53 = vadd.f32 %v1767_v51, %v1766_v49 }
 0x11d   :  { %v1205_v54 = vadd.f32 %v1768_v53, %v1156_v50  ;;  %v1741_v55 = vpop.f32.mrb[12].mxu0  ;;  %v1464_v53 = vlaneseq }
 0x11e   :  { %v1742_v56 = vpop.f32.mrb[13].mxu0 }
 0x11f   :  { %v1743_v57 = vadd.f32 %v1742_v56, %v1741_v55  ;;  %v1744_v58 = vpop.f32.mrb[14].mxu0  ;;  %v1769_v59 = vpop.f32.mrb[12].mxu1  ;;  %v1656_v55 = vld [vmem:[%s2531_s4] ss:$0 sm:$0xff] }
 0x120   :  { %v1745_v60 = vpop.f32.mrb[15].mxu0  ;;  %v1770_v63 = vpop.f32.mrb[13].mxu1 }
 0x121   :  { %v1161_v61 = vadd.f32 %v1743_v57, %v1112_v36  ;;  %v1746_v62 = vadd.f32 %v1745_v60, %v1744_v58  ;;  %v1771_v0 = vadd.f32 %v1770_v63, %v1769_v59  ;;  %v1772_v1 = vpop.f32.mrb[14].mxu1 }
 0x122   :  { %v1773_v3 = vpop.f32.mrb[15].mxu1 }
 0x123   :  { %v1164_v2 = vadd.f32 %v1746_v62, %v1115_v38  ;;  %v1210_v4 = vadd.f32 %v1771_v0, %v1161_v61  ;;  %v1774_v5 = vadd.f32 %v1773_v3, %v1772_v1 }
 0x125   :  { %v1213_v6 = vadd.f32 %v1774_v5, %v1164_v2 }
 0x135   :  { %v1791_v7 = vpop.f32.mrb[16].mxu0 }
 0x136   :  { %v1792_v8 = vpop.f32.mrb[17].mxu0 }
 0x137   :  { %v1793_v9 = vadd.f32 %v1792_v8, %v1791_v7  ;;  %v1794_v10 = vpop.f32.mrb[18].mxu0  ;;  %v1819_v13 = vpop.f32.mrb[16].mxu1 }
 0x138   :  { %v1795_v11 = vpop.f32.mrb[19].mxu0  ;;  %v1820_v15 = vpop.f32.mrb[17].mxu1 }
 0x139   :  { %v1251_v12 = vadd.f32 %v1793_v9, %v1202_v52  ;;  %v1796_v14 = vadd.f32 %v1795_v11, %v1794_v10  ;;  %v1821_v17 = vadd.f32 %v1820_v15, %v1819_v13  ;;  %v1822_v18 = vpop.f32.mrb[18].mxu1 }
 0x13a   :  { %v1823_v19 = vpop.f32.mrb[19].mxu1 }
 0x13b   :  { %v1254_v16 = vadd.f32 %v1796_v14, %v1205_v54  ;;  %v1824_v20 = vadd.f32 %v1823_v19, %v1822_v18  ;;  %v1300_v22 = vadd.f32 %v1821_v17, %v1251_v12  ;;  %v1465_v54 = vand.u32 127, %v1464_v53 }
 0x13d   :  { %v1797_v21 = vpop.f32.mrb[20].mxu0  ;;  %v1303_v26 = vadd.f32 %v1824_v20, %v1254_v16  ;;  %vm1466_vm1 = vcmp.ge.s32.totalorder %v1465_v54, 20  ;;  %vm1467_vm2 = vcmp.lt.s32.totalorder %v1465_v54, 25 }
 0x13e   :  { %v1798_v23 = vpop.f32.mrb[21].mxu0  ;;  %vm2479_vm3 = vmand %vm1466_vm1, %vm1467_vm2 }
 0x13f   :  { %v1799_v24 = vadd.f32 %v1798_v23, %v1797_v21  ;;  %v1800_v25 = vpop.f32.mrb[22].mxu0  ;;  %v1825_v29 = vpop.f32.mrb[20].mxu1 }
 0x140   :  { %v1801_v27 = vpop.f32.mrb[23].mxu0  ;;  %v1826_v31 = vpop.f32.mrb[21].mxu1 }
 0x141   :  { %v1259_v28 = vadd.f32 %v1799_v24, %v1210_v4  ;;  %v1802_v30 = vadd.f32 %v1801_v27, %v1800_v25  ;;  %v1827_v33 = vadd.f32 %v1826_v31, %v1825_v29  ;;  %v1828_v34 = vpop.f32.mrb[22].mxu1 }
 0x142   :  { %v1829_v35 = vpop.f32.mrb[23].mxu1 }
 0x143   :  { %v1262_v32 = vadd.f32 %v1802_v30, %v1213_v6  ;;  %v1830_v36 = vadd.f32 %v1829_v35, %v1828_v34  ;;  %v1308_v37 = vadd.f32 %v1827_v33, %v1259_v28 }
 0x145   :  { %v1311_v38 = vadd.f32 %v1830_v36, %v1262_v32 }
 0x155   :  { %v1865_v39 = vpop.f32.mrb[24].mxu0 }
 0x156   :  { %v1357_v40 = vadd.f32 %v1865_v39, %v1308_v37  ;;  %v1348_v41 = vpop.f32.mrb[25].mxu0 }
 0x157   :  { %v1349_v42 = vadd.f32 %v1348_v41, %v1300_v22  ;;  %v1866_v43 = vpop.f32.mrb[26].mxu0 }
 0x158   :  { %v1360_v44 = vadd.f32 %v1866_v43, %v1311_v38  ;;  %v1351_v45 = vpop.f32.mrb[27].mxu0  ;;  %v1365_v47 = vmax.f32 %v1357_v40, 0.0 }
 0x159   :  { %v1352_v46 = vadd.f32 %v1351_v45, %v1303_v26  ;;  %v1363_v49 = vmax.f32 %v1349_v42, 0.0 }
 0x15a   :  { %v1366_v48 = vmax.f32 %v1360_v44, 0.0 }
 0x15b   :  { %v1364_v50 = vmax.f32 %v1352_v46, 0.0 }
 0x15c   :  { %v1368_v51 = vpack.c.bf16 %v1366_v48, %v1365_v47 }
 0x15d   :  { %v1367_v52 = vpack.c.bf16 %v1364_v50, %v1363_v49 }
 0x15f   :  { %1875 = vmatprep.mubr.msk.bf16.mxu1 %vm1408_vm0, %v1367_v52 }
 0x160   :  { %1876 = vmatmul.mubr.msk.bf16.vlgmr.msra.gmra.mrb[24].mxu1 %vm1408_vm0, %v1368_v51 }
 0x233   :  { %v1877_v56 = vpop.f32.mrb[24].mxu1 }
 0x234   :  { %v2483_v58 = vadd.f32 %v1877_v56, %v1656_v55  ;;  %v1449_v59 = vpop.f32.mrb[25].mxu1 }
 0x235   :  { %v1450_v60 = vadd.f32 %v1656_v55, %v1449_v59  ;;  %v1878_v61 = vpop.f32.mrb[26].mxu1 }
 0x236   :  { %v2485_v62 = vadd.f32 %v1878_v61, %v1656_v55  ;;  %v1452_v63 = vpop.f32.mrb[27].mxu1  ;;  %v1471_v0 = vsel %vm2479_vm3, %v2483_v58, -1e+30 }
 0x237   :  { %v1453_v1 = vadd.f32 %v1656_v55, %v1452_v63  ;;  %1477 = vmax.xlane.f32.xlu1 %v1471_v0  ;;  %v1469_v2 = vsel %vm2479_vm3, %v1450_v60, -1e+30 }
 0x238   :  { %1473 = vmax.xlane.f32.xlu0 %v1469_v2  ;;  %v1472_v3 = vsel %vm2479_vm3, %v2485_v62, -1e+30 }
 0x239   :  { %v1470_v4 = vsel %vm2479_vm3, %v1453_v1, -1e+30 }
 0x23b   :  { %1479 = vmax.xlane.f32.xlu1 %v1472_v3 }
 0x23c   :  { %1475 = vmax.xlane.f32.xlu0 %v1470_v4 }
 0x2c4   :  { %v1478_v5 = vpop.xlane.xlu1 %1477 }
 0x2c5   :  { %v1483_v6 = vsub.f32 %v1471_v0, %v1478_v5  ;;  %v1474_v7 = vpop.xlane.xlu0 %1473 }
 0x2c6   :  { %v1481_v8 = vsub.f32 %v1469_v2, %v1474_v7 }
 0x2c7   :  { %v1489_v9 = vmul.f32 1.442695, %v1483_v6 }
 0x2c8   :  { %v1485_v10 = vmul.f32 1.442695, %v1481_v8  ;;  %v1480_v11 = vpop.xlane.xlu1 %1479 }
 0x2c9   :  { %v1484_v12 = vsub.f32 %v1472_v3, %v1480_v11  ;;  %v1476_v13 = vpop.xlane.xlu0 %1475 }
 0x2ca   :  { %2025 = vpow2.f32 %v1485_v10  ;;  %v1482_v14 = vsub.f32 %v1470_v4, %v1476_v13 }
 0x2cb   :  { %2027 = vpow2.f32 %v1489_v9  ;;  %v1491_v15 = vmul.f32 1.442695, %v1484_v12 }
 0x2cc   :  { %v1487_v16 = vmul.f32 1.442695, %v1482_v14 }
 0x2ce   :  { %2029 = vpow2.f32 %v1487_v16 }
 0x2cf   :  { %2031 = vpow2.f32 %v1491_v15 }
 0x2d4   :  { %v2026_v17 = vpop.eup %2025 }
 0x2d5   :  { %v1493_v18 = vsel %vm2479_vm3, %v2026_v17, 0.0  ;;  %v2028_v19 = vpop.eup %2027 }
 0x2d6   :  { %1497 = vadd.xlane.f32.xlu0 %v1493_v18  ;;  %v1495_v21 = vsel %vm2479_vm3, %v2028_v19, 0.0 }
 0x2d8   :  { %v2030_v20 = vpop.eup %2029 }
 0x2d9   :  { %v1494_v22 = vsel %vm2479_vm3, %v2030_v20, 0.0  ;;  %v2032_v23 = vpop.eup %2031 }
 0x2da   :  { %1501 = vadd.xlane.f32.xlu0 %v1495_v21  ;;  %1499 = vadd.xlane.f32.xlu1 %v1494_v22  ;;  %v1496_v24 = vsel %vm2479_vm3, %v2032_v23, 0.0 }
 0x2de   :  { %1503 = vadd.xlane.f32.xlu1 %v1496_v24 }
 0x363   :  { %v1498_v25 = vpop.xlane.xlu0 %1497 }
 0x364   :  { %2033 = vrcp.f32 %v1498_v25 }
 0x367   :  { %v1500_v26 = vpop.xlane.xlu1 %1499  ;;  %v1502_v27 = vpop.xlane.xlu0 %1501 }
 0x368   :  { %2035 = vrcp.f32 %v1500_v26 }
 0x369   :  { %2037 = vrcp.f32 %v1502_v27 }
 0x36b   :  { %v1504_v28 = vpop.xlane.xlu1 %1503 }
 0x36c   :  { %2039 = vrcp.f32 %v1504_v28 }
 0x36e   :  { %v2034_v29 = vpop.eup %2033 }
 0x36f   :  { %v1506_v30 = vmul.f32 %v2034_v29, %v1493_v18 }
 0x371   :  { %v1513_v31 = vsel %vm2479_vm3, %v1506_v30, %v1450_v60 }
 0x372   :  { %v2036_v32 = vpop.eup %2035  ;;  %1517 = vst [vmem:[%s2532_s5] sm:$0xff] %v1513_v31 }
 0x373   :  { %v2038_v33 = vpop.eup %2037  ;;  %v1508_v34 = vmul.f32 %v2036_v32, %v1494_v22 }
 0x374   :  { %v1510_v35 = vmul.f32 %v2038_v33, %v1495_v21 }
 0x375   :  { %v1514_v36 = vsel %vm2479_vm3, %v1508_v34, %v1453_v1 }
 0x376   :  { %v2040_v37 = vpop.eup %2039  ;;  %1518 = vst [vmem:[%s2532_s5 + $0x8] sm:$0xff] %v1514_v36  ;;  %v1515_v38 = vsel %vm2479_vm3, %v1510_v35, %v2483_v58 }
 0x377   :  { %1519 = vst [vmem:[%s2532_s5 + $0x10] sm:$0xff] %v1515_v38  ;;  %v1512_v39 = vmul.f32 %v2040_v37, %v1496_v24 }
 0x379   :  { %v1516_v40 = vsel %vm2479_vm3, %v1512_v39, %v2485_v62 }
 0x37a   :  { %1520 = vst [vmem:[%s2532_s5 + $0x18] sm:$0xff] %v1516_v40 }

</bundles_post_ra>
